<compile_context>
chip_gen: v7x
topology: tpu7x:2x2x1
jax: 0.10.0
libtpu: 0.0.40
codegen_flags: <defaults>
</compile_context>

<pallas_src>
import math

import jax
import jax.numpy as jnp
from jax.experimental import pallas as pl
from jax.experimental.pallas import tpu as pltpu

# ----------------------------------------------------------------------------
# Config (mirrors transformer_cfg / module __init__ arguments)
# ----------------------------------------------------------------------------
D_MODEL = 32
NHEAD = 4
HEAD_DIM = D_MODEL // NHEAD
NUM_ENC_LAYERS = 2
NUM_DEC_LAYERS = 2
DIM_FF = 64
N_CHANNELS = 4
D_OBJ_EMBED = 16
MAX_SEQ_LEN = 16
IS_CAUSAL = True
MASK_MEMORY_KEY = True
REMOVE_SCENE = False
LN_EPS = 1e-5
NEG_INF = -1e30  # finite stand-in for -inf in additive attention masks
ATTN_SCALE = 1.0 / math.sqrt(HEAD_DIM)

W_COLS = 3 * D_MODEL   # 96: width of the matrix slab (widest weight = fused QKV)
V_COLS = 128           # lane-width of the vector slab


# ----------------------------------------------------------------------------
# Parameter construction (deterministic, synthetic weights)
# ----------------------------------------------------------------------------
def _dense_params(key, d_in, d_out, scale=0.05):
    kw, _ = jax.random.split(key)
    return {
        "w": scale * jax.random.normal(kw, (d_in, d_out), jnp.float32),
        "b": jnp.zeros((d_out,), jnp.float32),
    }


def _attn_params(key, d):
    ks = jax.random.split(key, 4)
    p = {}
    for name, kk in zip(("q", "k", "v", "o"), ks):
        dp = _dense_params(kk, d, d)
        p["w" + name] = dp["w"]
        p["b" + name] = dp["b"]
    return p


def init_params(key):
    keys = iter(jax.random.split(key, 64))
    params = {
        "map_objs": _dense_params(next(keys), D_OBJ_EMBED, D_MODEL),
        "map_channels": _dense_params(next(keys), N_CHANNELS, D_MODEL),
        "inv_map_channels": _dense_params(next(keys), D_MODEL, N_CHANNELS),
    }

    # sinusoidal positional encoding (MAX_SEQ_LEN, D_MODEL)
    pos = jnp.arange(MAX_SEQ_LEN, dtype=jnp.float32)[:, None]
    div = jnp.exp(jnp.arange(0, D_MODEL, 2, dtype=jnp.float32)
                  * (-math.log(10000.0) / D_MODEL))
    pe = jnp.zeros((MAX_SEQ_LEN, D_MODEL), jnp.float32)
    pe = pe.at[:, 0::2].set(jnp.sin(pos * div))
    pe = pe.at[:, 1::2].set(jnp.cos(pos * div))
    params["pos_enc"] = pe

    def ln_pair():
        return jnp.ones((D_MODEL,), jnp.float32), jnp.zeros((D_MODEL,), jnp.float32)

    enc_layers = []
    for _ in range(NUM_ENC_LAYERS):
        lp = {"self_attn": _attn_params(next(keys), D_MODEL)}
        ff1 = _dense_params(next(keys), D_MODEL, DIM_FF)
        ff2 = _dense_params(next(keys), DIM_FF, D_MODEL)
        lp["w1"], lp["b1"] = ff1["w"], ff1["b"]
        lp["w2"], lp["b2"] = ff2["w"], ff2["b"]
        lp["ln1_g"], lp["ln1_b"] = ln_pair()
        lp["ln2_g"], lp["ln2_b"] = ln_pair()
        enc_layers.append(lp)
    params["enc_layers"] = enc_layers
    params["enc_norm_g"], params["enc_norm_b"] = ln_pair()

    dec_layers = []
    for _ in range(NUM_DEC_LAYERS):
        lp = {
            "self_attn": _attn_params(next(keys), D_MODEL),
            "cross_attn": _attn_params(next(keys), D_MODEL),
        }
        ff1 = _dense_params(next(keys), D_MODEL, DIM_FF)
        ff2 = _dense_params(next(keys), DIM_FF, D_MODEL)
        lp["w1"], lp["b1"] = ff1["w"], ff1["b"]
        lp["w2"], lp["b2"] = ff2["w"], ff2["b"]
        lp["ln1_g"], lp["ln1_b"] = ln_pair()
        lp["ln2_g"], lp["ln2_b"] = ln_pair()
        lp["ln3_g"], lp["ln3_b"] = ln_pair()
        dec_layers.append(lp)
    params["dec_layers"] = dec_layers
    params["dec_norm_g"], params["dec_norm_b"] = ln_pair()
    return params


# ----------------------------------------------------------------------------
# One-time packing of params into TWO flat VMEM slabs + static offset table
# ----------------------------------------------------------------------------
def pack_params(params):
    """Returns (w_slab f32 (RW, 96), v_slab f32 (RV, 128), offsets dict)."""
    w_blocks, v_blocks = [], []
    off = {}
    cur = {"w": 0, "v": 0}

    def add_w(name, mat):
        mat = jnp.asarray(mat, jnp.float32)
        r, c = mat.shape
        rp = r + ((-r) % 8)                       # keep row offsets 8-aligned
        blk = jnp.zeros((rp, W_COLS), jnp.float32).at[:r, :c].set(mat)
        off["w_" + name] = cur["w"]
        w_blocks.append(blk)
        cur["w"] += rp

    def add_v(name, arr):
        arr = jnp.asarray(arr, jnp.float32)
        if arr.ndim == 1:
            arr = arr[None, :]
        r, c = arr.shape
        blk = jnp.zeros((r, V_COLS), jnp.float32).at[:, :c].set(arr)
        off["v_" + name] = cur["v"]
        v_blocks.append(blk)
        cur["v"] += r

    # positional encoding first (8-aligned rows at offset 0)
    add_v("pos_enc", params["pos_enc"])                          # (MAX_SEQ_LEN, D)

    # embeddings
    add_w("map_objs", params["map_objs"]["w"])                   # (E, D)
    add_v("map_objs_b", params["map_objs"]["b"])
    add_w("map_ch", params["map_channels"]["w"])                 # (C, D)
    add_v("map_ch_b", params["map_channels"]["b"])
    # inv_map stored transposed: (C, D) so out = (W^T) @ y^T via a plain NT dot
    add_w("inv_ch", params["inv_map_channels"]["w"].T)           # (C, D)
    add_v("inv_ch_b", params["inv_map_channels"]["b"].reshape(N_CHANNELS, 1))

    def add_attn(name, p):
        wqkv = jnp.concatenate([p["wq"], p["wk"], p["wv"]], axis=1)   # (D, 3D)
        bqkv = jnp.concatenate([p["bq"], p["bk"], p["bv"]], axis=0)   # (3D,)
        add_w(name + "_qkv", wqkv)
        add_v(name + "_bqkv", bqkv)
        add_w(name + "_o", p["wo"])
        add_v(name + "_bo", p["bo"])

    for l, lp in enumerate(params["enc_layers"]):
        add_attn(f"enc{l}_sa", lp["self_attn"])
    for l, lp in enumerate(params["dec_layers"]):
        add_attn(f"dec{l}_sa", lp["self_attn"])
        add_attn(f"dec{l}_ca", lp["cross_attn"])

    def add_ffn(name, lp):
        add_w(name + "_w1", lp["w1"]); add_v(name + "_b1", lp["b1"])
        add_w(name + "_w2", lp["w2"]); add_v(name + "_b2", lp["b2"])

    for l, lp in enumerate(params["enc_layers"]):
        add_ffn(f"enc{l}_ffn", lp)
    for l, lp in enumerate(params["dec_layers"]):
        add_ffn(f"dec{l}_ffn", lp)

    def add_ln(name, g, b):
        add_v(name + "_g", g); add_v(name + "_b", b)

    for l, lp in enumerate(params["enc_layers"]):
        add_ln(f"enc{l}_ln1", lp["ln1_g"], lp["ln1_b"])
        add_ln(f"enc{l}_ln2", lp["ln2_g"], lp["ln2_b"])
    add_ln("enc_norm", params["enc_norm_g"], params["enc_norm_b"])
    for l, lp in enumerate(params["dec_layers"]):
        add_ln(f"dec{l}_ln1", lp["ln1_g"], lp["ln1_b"])
        add_ln(f"dec{l}_ln2", lp["ln2_g"], lp["ln2_b"])
        add_ln(f"dec{l}_ln3", lp["ln3_g"], lp["ln3_b"])
    add_ln("dec_norm", params["dec_norm_g"], params["dec_norm_b"])

    w_slab = jnp.concatenate(w_blocks, axis=0)
    v_slab = jnp.concatenate(v_blocks, axis=0)
    pad = (-v_slab.shape[0]) % 8
    if pad:
        v_slab = jnp.concatenate(
            [v_slab, jnp.zeros((pad, V_COLS), jnp.float32)], axis=0)
    return w_slab, v_slab, off


# ----------------------------------------------------------------------------
# Kernel + forward wrapper (batch grid, resident weight slabs)
# ----------------------------------------------------------------------------
def build_forward(off):
    D, H, DH, FF = D_MODEL, NHEAD, HEAD_DIM, DIM_FF

    def forward(w_slab, v_slab, hidden, objects):
        B, C, T = hidden.shape
        _, O, E = objects.shape
        RW, WC = w_slab.shape
        RV, VC = v_slab.shape

        def mm(a, b):      # (M,K) @ (K,N) -> (M,N), f32 accumulation
            return jax.lax.dot_general(a, b, (((1,), (0,)), ((), ())),
                                       preferred_element_type=jnp.float32)

        def mm_nt(a, b):   # (M,K) x (N,K) -> (M,N): contract last axes
            return jax.lax.dot_general(a, b, (((1,), (1,)), ((), ())),
                                       preferred_element_type=jnp.float32)

        def kernel(hidden_ref, objects_ref, w_ref, v_ref, out_ref):
            V = v_ref[...]                                   # (RV, 128) f32

            def vec(name, c):                                # (1, c) bias / LN row
                r = off["v_" + name]
                return V[r:r + 1, :c]

            def col(name, rows):                             # (rows, 1) column bias
                r = off["v_" + name]
                return V[r:r + rows, 0:1]

            def wmat(name, rows, c):                         # (rows, c) weight block
                r = off["w_" + name]
                return w_ref[r:r + rows, 0:c]

            def layer_norm(x, name):
                g = vec(name + "_g", D)
                b = vec(name + "_b", D)
                mu = jnp.mean(x, axis=-1, keepdims=True)
                xc = x - mu
                var = jnp.mean(xc * xc, axis=-1, keepdims=True)
                return xc * jax.lax.rsqrt(var + LN_EPS) * g + b

            def attention(xq, xkv, name, bias, self_attn):
                """Fused-projection MHA; `bias` broadcasts to (H*rows_q, rows_k)."""
                wqkv = wmat(name + "_qkv", D, 3 * D)         # (D, 96)
                bqkv = vec(name + "_bqkv", 3 * D)            # (1, 96)
                if self_attn:
                    qkv = mm(xq, wqkv) + bqkv                # one (D,3D) matmul
                    q = qkv[:, 0:D]
                    k = qkv[:, D:2 * D]
                    v = qkv[:, 2 * D:3 * D]
                else:
                    q = mm(xq, wqkv[:, 0:D]) + bqkv[:, 0:D]
                    kv = mm(xkv, wqkv[:, D:3 * D]) + bqkv[:, D:3 * D]
                    k = kv[:, 0:D]
                    v = kv[:, D:2 * D]
                rq = xq.shape[0]
                # per-head scores stacked along rows -> ONE softmax pass
                s = jnp.concatenate(
                    [mm_nt(q[:, h * DH:(h + 1) * DH], k[:, h * DH:(h + 1) * DH])
                     for h in range(H)], axis=0) * ATTN_SCALE   # (H*rq, rk)
                s = s + bias
                m = jnp.max(s, axis=-1, keepdims=True)
                p = jnp.exp(s - m)
                p = p / jnp.sum(p, axis=-1, keepdims=True)       # exact division
                # per-head PV, concatenated along lanes -> one W_o matmul
                o = jnp.concatenate(
                    [mm(p[h * rq:(h + 1) * rq, :], v[:, h * DH:(h + 1) * DH])
                     for h in range(H)], axis=1)                 # (rq, D)
                return mm(o, wmat(name + "_o", D, D)) + vec(name + "_bo", D)

            def ffn(x, name):
                h1 = jnp.maximum(
                    mm(x, wmat(name + "_w1", D, FF)) + vec(name + "_b1", FF), 0.0)
                return mm(h1, wmat(name + "_w2", FF, D)) + vec(name + "_b2", D)

            # ------------------------- encoder (scene memory) -------------------
            if REMOVE_SCENE:
                memory = jnp.zeros((1, D), jnp.float32)
                mem_bias = jnp.zeros((1, 1), jnp.float32)
            else:
                obj = objects_ref[0]                              # (O, E)
                # key-padding mask: sum(obj, -1) < 0.1, laid out as a (1, O) row
                colsum = mm_nt(jnp.ones((1, E), jnp.float32), obj)
                pad_bias = jnp.where(colsum < 0.1, NEG_INF, 0.0).astype(jnp.float32)
                x = mm(obj, wmat("map_objs", E, D)) + vec("map_objs_b", D)
                for l in range(NUM_ENC_LAYERS):
                    sa = attention(x, x, f"enc{l}_sa", pad_bias, True)
                    x = layer_norm(x + sa, f"enc{l}_ln1")
                    x = layer_norm(x + ffn(x, f"enc{l}_ffn"), f"enc{l}_ln2")
                memory = layer_norm(x, "enc_norm")                # final encoder LN
                mem_bias = (pad_bias if MASK_MEMORY_KEY
                            else jnp.zeros((1, O), jnp.float32))

            # ------------------------------ decoder ------------------------------
            hid = hidden_ref[0]                                   # (C, T)
            # 'b c t -> b t c' folded into the contraction dims: (C,T)x(C,D)->(T,D)
            y = jax.lax.dot_general(hid, wmat("map_ch", C, D),
                                    (((0,), (0,)), ((), ())),
                                    preferred_element_type=jnp.float32)
            y = y + vec("map_ch_b", D)
            r_pe = off["v_pos_enc"]
            y = y + V[r_pe:r_pe + T, 0:D]                         # positional encoding

            if IS_CAUSAL:
                ri = jax.lax.broadcasted_iota(jnp.int32, (T, T), 0)
                ci = jax.lax.broadcasted_iota(jnp.int32, (T, T), 1)
                causal = jnp.where(ri >= ci, 0.0, NEG_INF).astype(jnp.float32)
                causal = jnp.concatenate([causal] * H, axis=0)    # (H*T, T)
            else:
                causal = jnp.zeros((1, T), jnp.float32)

            for l in range(NUM_DEC_LAYERS):
                sa = attention(y, y, f"dec{l}_sa", causal, True)
                y = layer_norm(y + sa, f"dec{l}_ln1")
                ca = attention(y, memory, f"dec{l}_ca", mem_bias, False)
                y = layer_norm(y + ca, f"dec{l}_ln2")
                y = layer_norm(y + ffn(y, f"dec{l}_ffn"), f"dec{l}_ln3")
            y = layer_norm(y, "dec_norm")                         # final decoder LN

            # inv_map_channels with the 'b t c -> b c t' rearrange folded in:
            # W_inv stored transposed (C, D); (C,D)x(T,D) -> (C,T)
            out_ct = mm_nt(wmat("inv_ch", D, C)[0:C, 0:D] if False else
                           wmat("inv_ch", C, D), y)               # (C, T)
            out_ct = out_ct + col("inv_ch_b", C)
            out_ref[0] = out_ct.astype(out_ref.dtype)

        return pl.pallas_call(
            kernel,
            grid=(B,),
            in_specs=[
                pl.BlockSpec((1, C, T), lambda b: (b, 0, 0)),     # hidden (gridded)
                pl.BlockSpec((1, O, E), lambda b: (b, 0, 0)),     # objects (gridded)
                pl.BlockSpec((RW, WC), lambda b: (0, 0)),         # weight slab (resident)
                pl.BlockSpec((RV, VC), lambda b: (0, 0)),         # bias/LN slab (resident)
            ],
            out_specs=pl.BlockSpec((1, C, T), lambda b: (b, 0, 0)),
            out_shape=jax.ShapeDtypeStruct((B, C, T), jnp.float32),
            compiler_params=pltpu.CompilerParams(
                dimension_semantics=("parallel",)),               # v7x: 2 TCs split batch
        )(hidden, objects, w_slab, v_slab)

    return forward


# ----------------------------------------------------------------------------
# Demo
# ----------------------------------------------------------------------------
if __name__ == "__main__":
    key = jax.random.PRNGKey(0)
    k_par, k_hid, k_obj = jax.random.split(key, 3)

    B, T, O = 2, 8, 6
    params = init_params(k_par)
    w_slab, v_slab, off = pack_params(params)
    forward = jax.jit(build_forward(off))

    hidden = jax.random.normal(k_hid, (B, N_CHANNELS, T), jnp.float32)
    # objects: first 4 objects strictly "present" (sum >= 0.1), last 2 all-zero
    # so they exercise the `sum(objects, -1) < 0.1` key-padding mask path.
    obj_valid = jnp.abs(jax.random.normal(k_obj, (B, 4, D_OBJ_EMBED), jnp.float32)) + 0.5
    objects = jnp.concatenate(
        [obj_valid, jnp.zeros((B, 2, D_OBJ_EMBED), jnp.float32)], axis=1)

    out = forward(w_slab, v_slab, hidden, objects)
    out = jax.block_until_ready(out)
    assert out.shape == (B, N_CHANNELS, T), out.shape
    assert bool(jnp.all(jnp.isfinite(out)))
    print("KERNEL_OK")
</pallas_src>

<mosaic_0001>
module attributes {stable_mosaic.version = 11 : i64} {
  func.func @kernel(%arg0: i32, %arg1: memref<1x4x8xf32, #tpu.memory_space<vmem>>, %arg2: memref<1x6x16xf32, #tpu.memory_space<vmem>>, %arg3: memref<800x96xf32, #tpu.memory_space<vmem>>, %arg4: memref<72x128xf32, #tpu.memory_space<vmem>>, %arg5: memref<1x4x8xf32, #tpu.memory_space<vmem>>) attributes {dimension_semantics = [#tpu.dimension_semantics<parallel>], iteration_bounds = array<i64: 2>, scalar_prefetch = 0 : i64, scratch_operands = 0 : i64, tpu.core_type = #tpu.core_type<tc>, window_params = [{transform_indices = @transform_0, window_bounds = array<i64: 1, 4, 8>}, {transform_indices = @transform_1, window_bounds = array<i64: 1, 6, 16>}, {pipeline_mode = #tpu.pipeline_mode<synchronous>, transform_indices = @transform_2, window_bounds = array<i64: 800, 96>}, {pipeline_mode = #tpu.pipeline_mode<synchronous>, transform_indices = @transform_3, window_bounds = array<i64: 72, 128>}, {transform_indices = @transform_4, window_bounds = array<i64: 1, 4, 8>}]} {
    %c0 = arith.constant 0 : index
    %c0_0 = arith.constant 0 : index
    %0 = vector.load %arg4[%c0, %c0_0] : memref<72x128xf32, #tpu.memory_space<vmem>>, vector<72x128xf32>
    %c0_1 = arith.constant 0 : index
    %c0_2 = arith.constant 0 : index
    %c0_3 = arith.constant 0 : index
    %1 = vector.load %arg2[%c0_1, %c0_2, %c0_3] : memref<1x6x16xf32, #tpu.memory_space<vmem>>, vector<1x6x16xf32>
    %2 = vector.shape_cast %1 : vector<1x6x16xf32> to vector<6x16xf32>
    %cst = arith.constant 1.000000e+00 : f32
    %3 = vector.broadcast %cst : f32 to vector<1x16xf32>
    %cst_4 = arith.constant dense<0.000000e+00> : vector<1x6xf32>
    %4 = tpu.matmul %3, %2, %cst_4 {dimension_numbers = #tpu.dot_dimension_numbers<[1], [1], [0], [0], [0, 0, 1, 0], [], []>} : vector<1x16xf32>, vector<6x16xf32>, vector<1x6xf32> -> vector<1x6xf32>
    %cst_5 = arith.constant 1.000000e-01 : f32
    %5 = vector.broadcast %cst_5 : f32 to vector<1x6xf32>
    %6 = arith.cmpf olt, %4, %5 : vector<1x6xf32>
    %cst_6 = arith.constant -1.000000e+30 : f32
    %cst_7 = arith.constant 0.000000e+00 : f32
    %7 = vector.broadcast %cst_6 : f32 to vector<1x6xf32>
    %8 = vector.broadcast %cst_7 : f32 to vector<1x6xf32>
    %9 = arith.select %6, %7, %8 : vector<1x6xi1>, vector<1x6xf32>
    %c0_8 = arith.constant 0 : index
    %c0_9 = arith.constant 0 : index
    %10 = vector.load %arg3[%c0_8, %c0_9] : memref<800x96xf32, #tpu.memory_space<vmem>>, vector<16x32xf32>
    %cst_10 = arith.constant dense<0.000000e+00> : vector<6x32xf32>
    %11 = tpu.matmul %2, %10, %cst_10 {dimension_numbers = #tpu.dot_dimension_numbers<[1], [0], [0], [1], [0, 0, 1, 1], [], []>} : vector<6x16xf32>, vector<16x32xf32>, vector<6x32xf32> -> vector<6x32xf32>
    %12 = vector.extract_strided_slice %0 {offsets = [16, 0], sizes = [1, 32], strides = [1, 1]} : vector<72x128xf32> to vector<1x32xf32>
    %13 = vector.broadcast %12 : vector<1x32xf32> to vector<6x32xf32>
    %14 = arith.addf %11, %13 : vector<6x32xf32>
    %c32 = arith.constant 32 : index
    %c0_11 = arith.constant 0 : index
    %15 = vector.load %arg3[%c32, %c0_11] : memref<800x96xf32, #tpu.memory_space<vmem>>, vector<32x96xf32>
    %16 = vector.extract_strided_slice %0 {offsets = [22, 0], sizes = [1, 96], strides = [1, 1]} : vector<72x128xf32> to vector<1x96xf32>
    %cst_12 = arith.constant dense<0.000000e+00> : vector<6x96xf32>
    %17 = tpu.matmul %14, %15, %cst_12 {dimension_numbers = #tpu.dot_dimension_numbers<[1], [0], [0], [1], [0, 0, 1, 1], [], []>} : vector<6x32xf32>, vector<32x96xf32>, vector<6x96xf32> -> vector<6x96xf32>
    %18 = vector.broadcast %16 : vector<1x96xf32> to vector<6x96xf32>
    %19 = arith.addf %17, %18 : vector<6x96xf32>
    %20 = vector.extract_strided_slice %19 {offsets = [0, 0], sizes = [6, 32], strides = [1, 1]} : vector<6x96xf32> to vector<6x32xf32>
    %21 = vector.extract_strided_slice %19 {offsets = [0, 32], sizes = [6, 32], strides = [1, 1]} : vector<6x96xf32> to vector<6x32xf32>
    %22 = vector.extract_strided_slice %19 {offsets = [0, 64], sizes = [6, 32], strides = [1, 1]} : vector<6x96xf32> to vector<6x32xf32>
    %23 = vector.extract_strided_slice %20 {offsets = [0, 0], sizes = [6, 8], strides = [1, 1]} : vector<6x32xf32> to vector<6x8xf32>
    %24 = vector.extract_strided_slice %21 {offsets = [0, 0], sizes = [6, 8], strides = [1, 1]} : vector<6x32xf32> to vector<6x8xf32>
    %cst_13 = arith.constant dense<0.000000e+00> : vector<6x6xf32>
    %25 = tpu.matmul %23, %24, %cst_13 {dimension_numbers = #tpu.dot_dimension_numbers<[1], [1], [0], [0], [0, 0, 1, 0], [], []>} : vector<6x8xf32>, vector<6x8xf32>, vector<6x6xf32> -> vector<6x6xf32>
    %26 = vector.extract_strided_slice %20 {offsets = [0, 8], sizes = [6, 8], strides = [1, 1]} : vector<6x32xf32> to vector<6x8xf32>
    %27 = vector.extract_strided_slice %21 {offsets = [0, 8], sizes = [6, 8], strides = [1, 1]} : vector<6x32xf32> to vector<6x8xf32>
    %cst_14 = arith.constant dense<0.000000e+00> : vector<6x6xf32>
    %28 = tpu.matmul %26, %27, %cst_14 {dimension_numbers = #tpu.dot_dimension_numbers<[1], [1], [0], [0], [0, 0, 1, 0], [], []>} : vector<6x8xf32>, vector<6x8xf32>, vector<6x6xf32> -> vector<6x6xf32>
    %29 = vector.extract_strided_slice %20 {offsets = [0, 16], sizes = [6, 8], strides = [1, 1]} : vector<6x32xf32> to vector<6x8xf32>
    %30 = vector.extract_strided_slice %21 {offsets = [0, 16], sizes = [6, 8], strides = [1, 1]} : vector<6x32xf32> to vector<6x8xf32>
    %cst_15 = arith.constant dense<0.000000e+00> : vector<6x6xf32>
    %31 = tpu.matmul %29, %30, %cst_15 {dimension_numbers = #tpu.dot_dimension_numbers<[1], [1], [0], [0], [0, 0, 1, 0], [], []>} : vector<6x8xf32>, vector<6x8xf32>, vector<6x6xf32> -> vector<6x6xf32>
    %32 = vector.extract_strided_slice %20 {offsets = [0, 24], sizes = [6, 8], strides = [1, 1]} : vector<6x32xf32> to vector<6x8xf32>
    %33 = vector.extract_strided_slice %21 {offsets = [0, 24], sizes = [6, 8], strides = [1, 1]} : vector<6x32xf32> to vector<6x8xf32>
    %cst_16 = arith.constant dense<0.000000e+00> : vector<6x6xf32>
    %34 = tpu.matmul %32, %33, %cst_16 {dimension_numbers = #tpu.dot_dimension_numbers<[1], [1], [0], [0], [0, 0, 1, 0], [], []>} : vector<6x8xf32>, vector<6x8xf32>, vector<6x6xf32> -> vector<6x6xf32>
    %35 = tpu.concatenate %25, %28, %31, %34 in 0 : vector<6x6xf32>, vector<6x6xf32>, vector<6x6xf32>, vector<6x6xf32> -> vector<24x6xf32>
    %cst_17 = arith.constant 0.353553385 : f32
    %36 = vector.broadcast %cst_17 : f32 to vector<24x6xf32>
    %37 = arith.mulf %35, %36 : vector<24x6xf32>
    %38 = vector.broadcast %9 : vector<1x6xf32> to vector<24x6xf32>
    %39 = arith.addf %37, %38 : vector<24x6xf32>
    %cst_18 = arith.constant dense<0xFF800000> : vector<24xf32>
    %40 = vector.multi_reduction <maximumf>, %39, %cst_18 [1] : vector<24x6xf32> to vector<24xf32>
    %41 = vector.shape_cast %40 : vector<24xf32> to vector<24x1xf32>
    %42 = vector.broadcast %41 : vector<24x1xf32> to vector<24x6xf32>
    %43 = arith.subf %39, %42 : vector<24x6xf32>
    %44 = math.exp %43 : vector<24x6xf32>
    %cst_19 = arith.constant dense<0.000000e+00> : vector<24xf32>
    %45 = vector.multi_reduction <add>, %44, %cst_19 [1] : vector<24x6xf32> to vector<24xf32>
    %46 = vector.shape_cast %45 : vector<24xf32> to vector<24x1xf32>
    %47 = vector.broadcast %46 : vector<24x1xf32> to vector<24x6xf32>
    %48 = arith.divf %44, %47 : vector<24x6xf32>
    %49 = vector.extract_strided_slice %48 {offsets = [0, 0], sizes = [6, 6], strides = [1, 1]} : vector<24x6xf32> to vector<6x6xf32>
    %50 = vector.extract_strided_slice %22 {offsets = [0, 0], sizes = [6, 8], strides = [1, 1]} : vector<6x32xf32> to vector<6x8xf32>
    %cst_20 = arith.constant dense<0.000000e+00> : vector<6x8xf32>
    %51 = tpu.matmul %49, %50, %cst_20 {dimension_numbers = #tpu.dot_dimension_numbers<[1], [0], [0], [1], [0, 0, 1, 1], [], []>} : vector<6x6xf32>, vector<6x8xf32>, vector<6x8xf32> -> vector<6x8xf32>
    %52 = vector.extract_strided_slice %48 {offsets = [6, 0], sizes = [6, 6], strides = [1, 1]} : vector<24x6xf32> to vector<6x6xf32>
    %53 = vector.extract_strided_slice %22 {offsets = [0, 8], sizes = [6, 8], strides = [1, 1]} : vector<6x32xf32> to vector<6x8xf32>
    %cst_21 = arith.constant dense<0.000000e+00> : vector<6x8xf32>
    %54 = tpu.matmul %52, %53, %cst_21 {dimension_numbers = #tpu.dot_dimension_numbers<[1], [0], [0], [1], [0, 0, 1, 1], [], []>} : vector<6x6xf32>, vector<6x8xf32>, vector<6x8xf32> -> vector<6x8xf32>
    %55 = vector.extract_strided_slice %48 {offsets = [12, 0], sizes = [6, 6], strides = [1, 1]} : vector<24x6xf32> to vector<6x6xf32>
    %56 = vector.extract_strided_slice %22 {offsets = [0, 16], sizes = [6, 8], strides = [1, 1]} : vector<6x32xf32> to vector<6x8xf32>
    %cst_22 = arith.constant dense<0.000000e+00> : vector<6x8xf32>
    %57 = tpu.matmul %55, %56, %cst_22 {dimension_numbers = #tpu.dot_dimension_numbers<[1], [0], [0], [1], [0, 0, 1, 1], [], []>} : vector<6x6xf32>, vector<6x8xf32>, vector<6x8xf32> -> vector<6x8xf32>
    %58 = vector.extract_strided_slice %48 {offsets = [18, 0], sizes = [6, 6], strides = [1, 1]} : vector<24x6xf32> to vector<6x6xf32>
    %59 = vector.extract_strided_slice %22 {offsets = [0, 24], sizes = [6, 8], strides = [1, 1]} : vector<6x32xf32> to vector<6x8xf32>
    %cst_23 = arith.constant dense<0.000000e+00> : vector<6x8xf32>
    %60 = tpu.matmul %58, %59, %cst_23 {dimension_numbers = #tpu.dot_dimension_numbers<[1], [0], [0], [1], [0, 0, 1, 1], [], []>} : vector<6x6xf32>, vector<6x8xf32>, vector<6x8xf32> -> vector<6x8xf32>
    %61 = tpu.concatenate %51, %54, %57, %60 in 1 : vector<6x8xf32>, vector<6x8xf32>, vector<6x8xf32>, vector<6x8xf32> -> vector<6x32xf32>
    %c64 = arith.constant 64 : index
    %c0_24 = arith.constant 0 : index
    %62 = vector.load %arg3[%c64, %c0_24] : memref<800x96xf32, #tpu.memory_space<vmem>>, vector<32x32xf32>
    %cst_25 = arith.constant dense<0.000000e+00> : vector<6x32xf32>
    %63 = tpu.matmul %61, %62, %cst_25 {dimension_numbers = #tpu.dot_dimension_numbers<[1], [0], [0], [1], [0, 0, 1, 1], [], []>} : vector<6x32xf32>, vector<32x32xf32>, vector<6x32xf32> -> vector<6x32xf32>
    %64 = vector.extract_strided_slice %0 {offsets = [23, 0], sizes = [1, 32], strides = [1, 1]} : vector<72x128xf32> to vector<1x32xf32>
    %65 = vector.broadcast %64 : vector<1x32xf32> to vector<6x32xf32>
    %66 = arith.addf %63, %65 : vector<6x32xf32>
    %67 = arith.addf %14, %66 : vector<6x32xf32>
    %68 = vector.extract_strided_slice %0 {offsets = [42, 0], sizes = [1, 32], strides = [1, 1]} : vector<72x128xf32> to vector<1x32xf32>
    %69 = vector.extract_strided_slice %0 {offsets = [43, 0], sizes = [1, 32], strides = [1, 1]} : vector<72x128xf32> to vector<1x32xf32>
    %cst_26 = arith.constant dense<0.000000e+00> : vector<6xf32>
    %70 = vector.multi_reduction <add>, %67, %cst_26 [1] : vector<6x32xf32> to vector<6xf32>
    %71 = vector.shape_cast %70 : vector<6xf32> to vector<6x1xf32>
    %cst_27 = arith.constant 3.200000e+01 : f32
    %72 = vector.broadcast %cst_27 : f32 to vector<6x1xf32>
    %73 = arith.divf %71, %72 : vector<6x1xf32>
    %74 = vector.broadcast %73 : vector<6x1xf32> to vector<6x32xf32>
    %75 = arith.subf %67, %74 : vector<6x32xf32>
    %76 = arith.mulf %75, %75 : vector<6x32xf32>
    %cst_28 = arith.constant dense<0.000000e+00> : vector<6xf32>
    %77 = vector.multi_reduction <add>, %76, %cst_28 [1] : vector<6x32xf32> to vector<6xf32>
    %78 = vector.shape_cast %77 : vector<6xf32> to vector<6x1xf32>
    %cst_29 = arith.constant 3.200000e+01 : f32
    %79 = vector.broadcast %cst_29 : f32 to vector<6x1xf32>
    %80 = arith.divf %78, %79 : vector<6x1xf32>
    %cst_30 = arith.constant 9.99999974E-6 : f32
    %81 = vector.broadcast %cst_30 : f32 to vector<6x1xf32>
    %82 = arith.addf %80, %81 : vector<6x1xf32>
    %83 = math.rsqrt %82 : vector<6x1xf32>
    %84 = vector.broadcast %83 : vector<6x1xf32> to vector<6x32xf32>
    %85 = arith.mulf %75, %84 : vector<6x32xf32>
    %86 = vector.broadcast %68 : vector<1x32xf32> to vector<6x32xf32>
    %87 = arith.mulf %85, %86 : vector<6x32xf32>
    %88 = vector.broadcast %69 : vector<1x32xf32> to vector<6x32xf32>
    %89 = arith.addf %87, %88 : vector<6x32xf32>
    %c416 = arith.constant 416 : index
    %c0_31 = arith.constant 0 : index
    %90 = vector.load %arg3[%c416, %c0_31] : memref<800x96xf32, #tpu.memory_space<vmem>>, vector<32x64xf32>
    %cst_32 = arith.constant dense<0.000000e+00> : vector<6x64xf32>
    %91 = tpu.matmul %89, %90, %cst_32 {dimension_numbers = #tpu.dot_dimension_numbers<[1], [0], [0], [1], [0, 0, 1, 1], [], []>} : vector<6x32xf32>, vector<32x64xf32>, vector<6x64xf32> -> vector<6x64xf32>
    %92 = vector.extract_strided_slice %0 {offsets = [34, 0], sizes = [1, 64], strides = [1, 1]} : vector<72x128xf32> to vector<1x64xf32>
    %93 = vector.broadcast %92 : vector<1x64xf32> to vector<6x64xf32>
    %94 = arith.addf %91, %93 : vector<6x64xf32>
    %cst_33 = arith.constant 0.000000e+00 : f32
    %95 = vector.broadcast %cst_33 : f32 to vector<6x64xf32>
    %96 = arith.maximumf %94, %95 : vector<6x64xf32>
    %c448 = arith.constant 448 : index
    %c0_34 = arith.constant 0 : index
    %97 = vector.load %arg3[%c448, %c0_34] : memref<800x96xf32, #tpu.memory_space<vmem>>, vector<64x32xf32>
    %cst_35 = arith.constant dense<0.000000e+00> : vector<6x32xf32>
    %98 = tpu.matmul %96, %97, %cst_35 {dimension_numbers = #tpu.dot_dimension_numbers<[1], [0], [0], [1], [0, 0, 1, 1], [], []>} : vector<6x64xf32>, vector<64x32xf32>, vector<6x32xf32> -> vector<6x32xf32>
    %99 = vector.extract_strided_slice %0 {offsets = [35, 0], sizes = [1, 32], strides = [1, 1]} : vector<72x128xf32> to vector<1x32xf32>
    %100 = vector.broadcast %99 : vector<1x32xf32> to vector<6x32xf32>
    %101 = arith.addf %98, %100 : vector<6x32xf32>
    %102 = arith.addf %89, %101 : vector<6x32xf32>
    %103 = vector.extract_strided_slice %0 {offsets = [44, 0], sizes = [1, 32], strides = [1, 1]} : vector<72x128xf32> to vector<1x32xf32>
    %104 = vector.extract_strided_slice %0 {offsets = [45, 0], sizes = [1, 32], strides = [1, 1]} : vector<72x128xf32> to vector<1x32xf32>
    %cst_36 = arith.constant dense<0.000000e+00> : vector<6xf32>
    %105 = vector.multi_reduction <add>, %102, %cst_36 [1] : vector<6x32xf32> to vector<6xf32>
    %106 = vector.shape_cast %105 : vector<6xf32> to vector<6x1xf32>
    %cst_37 = arith.constant 3.200000e+01 : f32
    %107 = vector.broadcast %cst_37 : f32 to vector<6x1xf32>
    %108 = arith.divf %106, %107 : vector<6x1xf32>
    %109 = vector.broadcast %108 : vector<6x1xf32> to vector<6x32xf32>
    %110 = arith.subf %102, %109 : vector<6x32xf32>
    %111 = arith.mulf %110, %110 : vector<6x32xf32>
    %cst_38 = arith.constant dense<0.000000e+00> : vector<6xf32>
    %112 = vector.multi_reduction <add>, %111, %cst_38 [1] : vector<6x32xf32> to vector<6xf32>
    %113 = vector.shape_cast %112 : vector<6xf32> to vector<6x1xf32>
    %cst_39 = arith.constant 3.200000e+01 : f32
    %114 = vector.broadcast %cst_39 : f32 to vector<6x1xf32>
    %115 = arith.divf %113, %114 : vector<6x1xf32>
    %cst_40 = arith.constant 9.99999974E-6 : f32
    %116 = vector.broadcast %cst_40 : f32 to vector<6x1xf32>
    %117 = arith.addf %115, %116 : vector<6x1xf32>
    %118 = math.rsqrt %117 : vector<6x1xf32>
    %119 = vector.broadcast %118 : vector<6x1xf32> to vector<6x32xf32>
    %120 = arith.mulf %110, %119 : vector<6x32xf32>
    %121 = vector.broadcast %103 : vector<1x32xf32> to vector<6x32xf32>
    %122 = arith.mulf %120, %121 : vector<6x32xf32>
    %123 = vector.broadcast %104 : vector<1x32xf32> to vector<6x32xf32>
    %124 = arith.addf %122, %123 : vector<6x32xf32>
    %c96 = arith.constant 96 : index
    %c0_41 = arith.constant 0 : index
    %125 = vector.load %arg3[%c96, %c0_41] : memref<800x96xf32, #tpu.memory_space<vmem>>, vector<32x96xf32>
    %126 = vector.extract_strided_slice %0 {offsets = [24, 0], sizes = [1, 96], strides = [1, 1]} : vector<72x128xf32> to vector<1x96xf32>
    %cst_42 = arith.constant dense<0.000000e+00> : vector<6x96xf32>
    %127 = tpu.matmul %124, %125, %cst_42 {dimension_numbers = #tpu.dot_dimension_numbers<[1], [0], [0], [1], [0, 0, 1, 1], [], []>} : vector<6x32xf32>, vector<32x96xf32>, vector<6x96xf32> -> vector<6x96xf32>
    %128 = vector.broadcast %126 : vector<1x96xf32> to vector<6x96xf32>
    %129 = arith.addf %127, %128 : vector<6x96xf32>
    %130 = vector.extract_strided_slice %129 {offsets = [0, 0], sizes = [6, 32], strides = [1, 1]} : vector<6x96xf32> to vector<6x32xf32>
    %131 = vector.extract_strided_slice %129 {offsets = [0, 32], sizes = [6, 32], strides = [1, 1]} : vector<6x96xf32> to vector<6x32xf32>
    %132 = vector.extract_strided_slice %129 {offsets = [0, 64], sizes = [6, 32], strides = [1, 1]} : vector<6x96xf32> to vector<6x32xf32>
    %133 = vector.extract_strided_slice %130 {offsets = [0, 0], sizes = [6, 8], strides = [1, 1]} : vector<6x32xf32> to vector<6x8xf32>
    %134 = vector.extract_strided_slice %131 {offsets = [0, 0], sizes = [6, 8], strides = [1, 1]} : vector<6x32xf32> to vector<6x8xf32>
    %cst_43 = arith.constant dense<0.000000e+00> : vector<6x6xf32>
    %135 = tpu.matmul %133, %134, %cst_43 {dimension_numbers = #tpu.dot_dimension_numbers<[1], [1], [0], [0], [0, 0, 1, 0], [], []>} : vector<6x8xf32>, vector<6x8xf32>, vector<6x6xf32> -> vector<6x6xf32>
    %136 = vector.extract_strided_slice %130 {offsets = [0, 8], sizes = [6, 8], strides = [1, 1]} : vector<6x32xf32> to vector<6x8xf32>
    %137 = vector.extract_strided_slice %131 {offsets = [0, 8], sizes = [6, 8], strides = [1, 1]} : vector<6x32xf32> to vector<6x8xf32>
    %cst_44 = arith.constant dense<0.000000e+00> : vector<6x6xf32>
    %138 = tpu.matmul %136, %137, %cst_44 {dimension_numbers = #tpu.dot_dimension_numbers<[1], [1], [0], [0], [0, 0, 1, 0], [], []>} : vector<6x8xf32>, vector<6x8xf32>, vector<6x6xf32> -> vector<6x6xf32>
    %139 = vector.extract_strided_slice %130 {offsets = [0, 16], sizes = [6, 8], strides = [1, 1]} : vector<6x32xf32> to vector<6x8xf32>
    %140 = vector.extract_strided_slice %131 {offsets = [0, 16], sizes = [6, 8], strides = [1, 1]} : vector<6x32xf32> to vector<6x8xf32>
    %cst_45 = arith.constant dense<0.000000e+00> : vector<6x6xf32>
    %141 = tpu.matmul %139, %140, %cst_45 {dimension_numbers = #tpu.dot_dimension_numbers<[1], [1], [0], [0], [0, 0, 1, 0], [], []>} : vector<6x8xf32>, vector<6x8xf32>, vector<6x6xf32> -> vector<6x6xf32>
    %142 = vector.extract_strided_slice %130 {offsets = [0, 24], sizes = [6, 8], strides = [1, 1]} : vector<6x32xf32> to vector<6x8xf32>
    %143 = vector.extract_strided_slice %131 {offsets = [0, 24], sizes = [6, 8], strides = [1, 1]} : vector<6x32xf32> to vector<6x8xf32>
    %cst_46 = arith.constant dense<0.000000e+00> : vector<6x6xf32>
    %144 = tpu.matmul %142, %143, %cst_46 {dimension_numbers = #tpu.dot_dimension_numbers<[1], [1], [0], [0], [0, 0, 1, 0], [], []>} : vector<6x8xf32>, vector<6x8xf32>, vector<6x6xf32> -> vector<6x6xf32>
    %145 = tpu.concatenate %135, %138, %141, %144 in 0 : vector<6x6xf32>, vector<6x6xf32>, vector<6x6xf32>, vector<6x6xf32> -> vector<24x6xf32>
    %cst_47 = arith.constant 0.353553385 : f32
    %146 = vector.broadcast %cst_47 : f32 to vector<24x6xf32>
    %147 = arith.mulf %145, %146 : vector<24x6xf32>
    %148 = vector.broadcast %9 : vector<1x6xf32> to vector<24x6xf32>
    %149 = arith.addf %147, %148 : vector<24x6xf32>
    %cst_48 = arith.constant dense<0xFF800000> : vector<24xf32>
    %150 = vector.multi_reduction <maximumf>, %149, %cst_48 [1] : vector<24x6xf32> to vector<24xf32>
    %151 = vector.shape_cast %150 : vector<24xf32> to vector<24x1xf32>
    %152 = vector.broadcast %151 : vector<24x1xf32> to vector<24x6xf32>
    %153 = arith.subf %149, %152 : vector<24x6xf32>
    %154 = math.exp %153 : vector<24x6xf32>
    %cst_49 = arith.constant dense<0.000000e+00> : vector<24xf32>
    %155 = vector.multi_reduction <add>, %154, %cst_49 [1] : vector<24x6xf32> to vector<24xf32>
    %156 = vector.shape_cast %155 : vector<24xf32> to vector<24x1xf32>
    %157 = vector.broadcast %156 : vector<24x1xf32> to vector<24x6xf32>
    %158 = arith.divf %154, %157 : vector<24x6xf32>
    %159 = vector.extract_strided_slice %158 {offsets = [0, 0], sizes = [6, 6], strides = [1, 1]} : vector<24x6xf32> to vector<6x6xf32>
    %160 = vector.extract_strided_slice %132 {offsets = [0, 0], sizes = [6, 8], strides = [1, 1]} : vector<6x32xf32> to vector<6x8xf32>
    %cst_50 = arith.constant dense<0.000000e+00> : vector<6x8xf32>
    %161 = tpu.matmul %159, %160, %cst_50 {dimension_numbers = #tpu.dot_dimension_numbers<[1], [0], [0], [1], [0, 0, 1, 1], [], []>} : vector<6x6xf32>, vector<6x8xf32>, vector<6x8xf32> -> vector<6x8xf32>
    %162 = vector.extract_strided_slice %158 {offsets = [6, 0], sizes = [6, 6], strides = [1, 1]} : vector<24x6xf32> to vector<6x6xf32>
    %163 = vector.extract_strided_slice %132 {offsets = [0, 8], sizes = [6, 8], strides = [1, 1]} : vector<6x32xf32> to vector<6x8xf32>
    %cst_51 = arith.constant dense<0.000000e+00> : vector<6x8xf32>
    %164 = tpu.matmul %162, %163, %cst_51 {dimension_numbers = #tpu.dot_dimension_numbers<[1], [0], [0], [1], [0, 0, 1, 1], [], []>} : vector<6x6xf32>, vector<6x8xf32>, vector<6x8xf32> -> vector<6x8xf32>
    %165 = vector.extract_strided_slice %158 {offsets = [12, 0], sizes = [6, 6], strides = [1, 1]} : vector<24x6xf32> to vector<6x6xf32>
    %166 = vector.extract_strided_slice %132 {offsets = [0, 16], sizes = [6, 8], strides = [1, 1]} : vector<6x32xf32> to vector<6x8xf32>
    %cst_52 = arith.constant dense<0.000000e+00> : vector<6x8xf32>
    %167 = tpu.matmul %165, %166, %cst_52 {dimension_numbers = #tpu.dot_dimension_numbers<[1], [0], [0], [1], [0, 0, 1, 1], [], []>} : vector<6x6xf32>, vector<6x8xf32>, vector<6x8xf32> -> vector<6x8xf32>
    %168 = vector.extract_strided_slice %158 {offsets = [18, 0], sizes = [6, 6], strides = [1, 1]} : vector<24x6xf32> to vector<6x6xf32>
    %169 = vector.extract_strided_slice %132 {offsets = [0, 24], sizes = [6, 8], strides = [1, 1]} : vector<6x32xf32> to vector<6x8xf32>
    %cst_53 = arith.constant dense<0.000000e+00> : vector<6x8xf32>
    %170 = tpu.matmul %168, %169, %cst_53 {dimension_numbers = #tpu.dot_dimension_numbers<[1], [0], [0], [1], [0, 0, 1, 1], [], []>} : vector<6x6xf32>, vector<6x8xf32>, vector<6x8xf32> -> vector<6x8xf32>
    %171 = tpu.concatenate %161, %164, %167, %170 in 1 : vector<6x8xf32>, vector<6x8xf32>, vector<6x8xf32>, vector<6x8xf32> -> vector<6x32xf32>
    %c128 = arith.constant 128 : index
    %c0_54 = arith.constant 0 : index
    %172 = vector.load %arg3[%c128, %c0_54] : memref<800x96xf32, #tpu.memory_space<vmem>>, vector<32x32xf32>
    %cst_55 = arith.constant dense<0.000000e+00> : vector<6x32xf32>
    %173 = tpu.matmul %171, %172, %cst_55 {dimension_numbers = #tpu.dot_dimension_numbers<[1], [0], [0], [1], [0, 0, 1, 1], [], []>} : vector<6x32xf32>, vector<32x32xf32>, vector<6x32xf32> -> vector<6x32xf32>
    %174 = vector.extract_strided_slice %0 {offsets = [25, 0], sizes = [1, 32], strides = [1, 1]} : vector<72x128xf32> to vector<1x32xf32>
    %175 = vector.broadcast %174 : vector<1x32xf32> to vector<6x32xf32>
    %176 = arith.addf %173, %175 : vector<6x32xf32>
    %177 = arith.addf %124, %176 : vector<6x32xf32>
    %178 = vector.extract_strided_slice %0 {offsets = [46, 0], sizes = [1, 32], strides = [1, 1]} : vector<72x128xf32> to vector<1x32xf32>
    %179 = vector.extract_strided_slice %0 {offsets = [47, 0], sizes = [1, 32], strides = [1, 1]} : vector<72x128xf32> to vector<1x32xf32>
    %cst_56 = arith.constant dense<0.000000e+00> : vector<6xf32>
    %180 = vector.multi_reduction <add>, %177, %cst_56 [1] : vector<6x32xf32> to vector<6xf32>
    %181 = vector.shape_cast %180 : vector<6xf32> to vector<6x1xf32>
    %cst_57 = arith.constant 3.200000e+01 : f32
    %182 = vector.broadcast %cst_57 : f32 to vector<6x1xf32>
    %183 = arith.divf %181, %182 : vector<6x1xf32>
    %184 = vector.broadcast %183 : vector<6x1xf32> to vector<6x32xf32>
    %185 = arith.subf %177, %184 : vector<6x32xf32>
    %186 = arith.mulf %185, %185 : vector<6x32xf32>
    %cst_58 = arith.constant dense<0.000000e+00> : vector<6xf32>
    %187 = vector.multi_reduction <add>, %186, %cst_58 [1] : vector<6x32xf32> to vector<6xf32>
    %188 = vector.shape_cast %187 : vector<6xf32> to vector<6x1xf32>
    %cst_59 = arith.constant 3.200000e+01 : f32
    %189 = vector.broadcast %cst_59 : f32 to vector<6x1xf32>
    %190 = arith.divf %188, %189 : vector<6x1xf32>
    %cst_60 = arith.constant 9.99999974E-6 : f32
    %191 = vector.broadcast %cst_60 : f32 to vector<6x1xf32>
    %192 = arith.addf %190, %191 : vector<6x1xf32>
    %193 = math.rsqrt %192 : vector<6x1xf32>
    %194 = vector.broadcast %193 : vector<6x1xf32> to vector<6x32xf32>
    %195 = arith.mulf %185, %194 : vector<6x32xf32>
    %196 = vector.broadcast %178 : vector<1x32xf32> to vector<6x32xf32>
    %197 = arith.mulf %195, %196 : vector<6x32xf32>
    %198 = vector.broadcast %179 : vector<1x32xf32> to vector<6x32xf32>
    %199 = arith.addf %197, %198 : vector<6x32xf32>
    %c512 = arith.constant 512 : index
    %c0_61 = arith.constant 0 : index
    %200 = vector.load %arg3[%c512, %c0_61] : memref<800x96xf32, #tpu.memory_space<vmem>>, vector<32x64xf32>
    %cst_62 = arith.constant dense<0.000000e+00> : vector<6x64xf32>
    %201 = tpu.matmul %199, %200, %cst_62 {dimension_numbers = #tpu.dot_dimension_numbers<[1], [0], [0], [1], [0, 0, 1, 1], [], []>} : vector<6x32xf32>, vector<32x64xf32>, vector<6x64xf32> -> vector<6x64xf32>
    %202 = vector.extract_strided_slice %0 {offsets = [36, 0], sizes = [1, 64], strides = [1, 1]} : vector<72x128xf32> to vector<1x64xf32>
    %203 = vector.broadcast %202 : vector<1x64xf32> to vector<6x64xf32>
    %204 = arith.addf %201, %203 : vector<6x64xf32>
    %cst_63 = arith.constant 0.000000e+00 : f32
    %205 = vector.broadcast %cst_63 : f32 to vector<6x64xf32>
    %206 = arith.maximumf %204, %205 : vector<6x64xf32>
    %c544 = arith.constant 544 : index
    %c0_64 = arith.constant 0 : index
    %207 = vector.load %arg3[%c544, %c0_64] : memref<800x96xf32, #tpu.memory_space<vmem>>, vector<64x32xf32>
    %cst_65 = arith.constant dense<0.000000e+00> : vector<6x32xf32>
    %208 = tpu.matmul %206, %207, %cst_65 {dimension_numbers = #tpu.dot_dimension_numbers<[1], [0], [0], [1], [0, 0, 1, 1], [], []>} : vector<6x64xf32>, vector<64x32xf32>, vector<6x32xf32> -> vector<6x32xf32>
    %209 = vector.extract_strided_slice %0 {offsets = [37, 0], sizes = [1, 32], strides = [1, 1]} : vector<72x128xf32> to vector<1x32xf32>
    %210 = vector.broadcast %209 : vector<1x32xf32> to vector<6x32xf32>
    %211 = arith.addf %208, %210 : vector<6x32xf32>
    %212 = arith.addf %199, %211 : vector<6x32xf32>
    %213 = vector.extract_strided_slice %0 {offsets = [48, 0], sizes = [1, 32], strides = [1, 1]} : vector<72x128xf32> to vector<1x32xf32>
    %214 = vector.extract_strided_slice %0 {offsets = [49, 0], sizes = [1, 32], strides = [1, 1]} : vector<72x128xf32> to vector<1x32xf32>
    %cst_66 = arith.constant dense<0.000000e+00> : vector<6xf32>
    %215 = vector.multi_reduction <add>, %212, %cst_66 [1] : vector<6x32xf32> to vector<6xf32>
    %216 = vector.shape_cast %215 : vector<6xf32> to vector<6x1xf32>
    %cst_67 = arith.constant 3.200000e+01 : f32
    %217 = vector.broadcast %cst_67 : f32 to vector<6x1xf32>
    %218 = arith.divf %216, %217 : vector<6x1xf32>
    %219 = vector.broadcast %218 : vector<6x1xf32> to vector<6x32xf32>
    %220 = arith.subf %212, %219 : vector<6x32xf32>
    %221 = arith.mulf %220, %220 : vector<6x32xf32>
    %cst_68 = arith.constant dense<0.000000e+00> : vector<6xf32>
    %222 = vector.multi_reduction <add>, %221, %cst_68 [1] : vector<6x32xf32> to vector<6xf32>
    %223 = vector.shape_cast %222 : vector<6xf32> to vector<6x1xf32>
    %cst_69 = arith.constant 3.200000e+01 : f32
    %224 = vector.broadcast %cst_69 : f32 to vector<6x1xf32>
    %225 = arith.divf %223, %224 : vector<6x1xf32>
    %cst_70 = arith.constant 9.99999974E-6 : f32
    %226 = vector.broadcast %cst_70 : f32 to vector<6x1xf32>
    %227 = arith.addf %225, %226 : vector<6x1xf32>
    %228 = math.rsqrt %227 : vector<6x1xf32>
    %229 = vector.broadcast %228 : vector<6x1xf32> to vector<6x32xf32>
    %230 = arith.mulf %220, %229 : vector<6x32xf32>
    %231 = vector.broadcast %213 : vector<1x32xf32> to vector<6x32xf32>
    %232 = arith.mulf %230, %231 : vector<6x32xf32>
    %233 = vector.broadcast %214 : vector<1x32xf32> to vector<6x32xf32>
    %234 = arith.addf %232, %233 : vector<6x32xf32>
    %235 = vector.extract_strided_slice %0 {offsets = [50, 0], sizes = [1, 32], strides = [1, 1]} : vector<72x128xf32> to vector<1x32xf32>
    %236 = vector.extract_strided_slice %0 {offsets = [51, 0], sizes = [1, 32], strides = [1, 1]} : vector<72x128xf32> to vector<1x32xf32>
    %cst_71 = arith.constant dense<0.000000e+00> : vector<6xf32>
    %237 = vector.multi_reduction <add>, %234, %cst_71 [1] : vector<6x32xf32> to vector<6xf32>
    %238 = vector.shape_cast %237 : vector<6xf32> to vector<6x1xf32>
    %cst_72 = arith.constant 3.200000e+01 : f32
    %239 = vector.broadcast %cst_72 : f32 to vector<6x1xf32>
    %240 = arith.divf %238, %239 : vector<6x1xf32>
    %241 = vector.broadcast %240 : vector<6x1xf32> to vector<6x32xf32>
    %242 = arith.subf %234, %241 : vector<6x32xf32>
    %243 = arith.mulf %242, %242 : vector<6x32xf32>
    %cst_73 = arith.constant dense<0.000000e+00> : vector<6xf32>
    %244 = vector.multi_reduction <add>, %243, %cst_73 [1] : vector<6x32xf32> to vector<6xf32>
    %245 = vector.shape_cast %244 : vector<6xf32> to vector<6x1xf32>
    %cst_74 = arith.constant 3.200000e+01 : f32
    %246 = vector.broadcast %cst_74 : f32 to vector<6x1xf32>
    %247 = arith.divf %245, %246 : vector<6x1xf32>
    %cst_75 = arith.constant 9.99999974E-6 : f32
    %248 = vector.broadcast %cst_75 : f32 to vector<6x1xf32>
    %249 = arith.addf %247, %248 : vector<6x1xf32>
    %250 = math.rsqrt %249 : vector<6x1xf32>
    %251 = vector.broadcast %250 : vector<6x1xf32> to vector<6x32xf32>
    %252 = arith.mulf %242, %251 : vector<6x32xf32>
    %253 = vector.broadcast %235 : vector<1x32xf32> to vector<6x32xf32>
    %254 = arith.mulf %252, %253 : vector<6x32xf32>
    %255 = vector.broadcast %236 : vector<1x32xf32> to vector<6x32xf32>
    %256 = arith.addf %254, %255 : vector<6x32xf32>
    %c0_76 = arith.constant 0 : index
    %c0_77 = arith.constant 0 : index
    %c0_78 = arith.constant 0 : index
    %257 = vector.load %arg1[%c0_76, %c0_77, %c0_78] : memref<1x4x8xf32, #tpu.memory_space<vmem>>, vector<1x4x8xf32>
    %258 = vector.shape_cast %257 : vector<1x4x8xf32> to vector<4x8xf32>
    %c16 = arith.constant 16 : index
    %c0_79 = arith.constant 0 : index
    %259 = vector.load %arg3[%c16, %c0_79] : memref<800x96xf32, #tpu.memory_space<vmem>>, vector<4x32xf32>
    %cst_80 = arith.constant dense<0.000000e+00> : vector<8x32xf32>
    %260 = tpu.matmul %258, %259, %cst_80 {dimension_numbers = #tpu.dot_dimension_numbers<[0], [0], [1], [1], [0, 1, 1, 1], [], []>} : vector<4x8xf32>, vector<4x32xf32>, vector<8x32xf32> -> vector<8x32xf32>
    %261 = vector.extract_strided_slice %0 {offsets = [17, 0], sizes = [1, 32], strides = [1, 1]} : vector<72x128xf32> to vector<1x32xf32>
    %262 = vector.broadcast %261 : vector<1x32xf32> to vector<8x32xf32>
    %263 = arith.addf %260, %262 : vector<8x32xf32>
    %264 = vector.extract_strided_slice %0 {offsets = [0, 0], sizes = [8, 32], strides = [1, 1]} : vector<72x128xf32> to vector<8x32xf32>
    %265 = arith.addf %263, %264 : vector<8x32xf32>
    %266 = tpu.iota {dimensions = array<i32: 0>} : vector<8x8xi32>
    %267 = tpu.iota {dimensions = array<i32: 1>} : vector<8x8xi32>
    %268 = arith.cmpi sge, %266, %267 : vector<8x8xi32>
    %cst_81 = arith.constant 0.000000e+00 : f32
    %cst_82 = arith.constant -1.000000e+30 : f32
    %269 = vector.broadcast %cst_81 : f32 to vector<8x8xf32>
    %270 = vector.broadcast %cst_82 : f32 to vector<8x8xf32>
    %271 = arith.select %268, %269, %270 : vector<8x8xi1>, vector<8x8xf32>
    %272 = tpu.concatenate %271, %271, %271, %271 in 0 : vector<8x8xf32>, vector<8x8xf32>, vector<8x8xf32>, vector<8x8xf32> -> vector<32x8xf32>
    %c160 = arith.constant 160 : index
    %c0_83 = arith.constant 0 : index
    %273 = vector.load %arg3[%c160, %c0_83] : memref<800x96xf32, #tpu.memory_space<vmem>>, vector<32x96xf32>
    %274 = vector.extract_strided_slice %0 {offsets = [26, 0], sizes = [1, 96], strides = [1, 1]} : vector<72x128xf32> to vector<1x96xf32>
    %cst_84 = arith.constant dense<0.000000e+00> : vector<8x96xf32>
    %275 = tpu.matmul %265, %273, %cst_84 {dimension_numbers = #tpu.dot_dimension_numbers<[1], [0], [0], [1], [0, 0, 1, 1], [], []>} : vector<8x32xf32>, vector<32x96xf32>, vector<8x96xf32> -> vector<8x96xf32>
    %276 = vector.broadcast %274 : vector<1x96xf32> to vector<8x96xf32>
    %277 = arith.addf %275, %276 : vector<8x96xf32>
    %278 = vector.extract_strided_slice %277 {offsets = [0, 0], sizes = [8, 32], strides = [1, 1]} : vector<8x96xf32> to vector<8x32xf32>
    %279 = vector.extract_strided_slice %277 {offsets = [0, 32], sizes = [8, 32], strides = [1, 1]} : vector<8x96xf32> to vector<8x32xf32>
    %280 = vector.extract_strided_slice %277 {offsets = [0, 64], sizes = [8, 32], strides = [1, 1]} : vector<8x96xf32> to vector<8x32xf32>
    %281 = vector.extract_strided_slice %278 {offsets = [0, 0], sizes = [8, 8], strides = [1, 1]} : vector<8x32xf32> to vector<8x8xf32>
    %282 = vector.extract_strided_slice %279 {offsets = [0, 0], sizes = [8, 8], strides = [1, 1]} : vector<8x32xf32> to vector<8x8xf32>
    %cst_85 = arith.constant dense<0.000000e+00> : vector<8x8xf32>
    %283 = tpu.matmul %281, %282, %cst_85 {dimension_numbers = #tpu.dot_dimension_numbers<[1], [1], [0], [0], [0, 0, 1, 0], [], []>} : vector<8x8xf32>, vector<8x8xf32>, vector<8x8xf32> -> vector<8x8xf32>
    %284 = vector.extract_strided_slice %278 {offsets = [0, 8], sizes = [8, 8], strides = [1, 1]} : vector<8x32xf32> to vector<8x8xf32>
    %285 = vector.extract_strided_slice %279 {offsets = [0, 8], sizes = [8, 8], strides = [1, 1]} : vector<8x32xf32> to vector<8x8xf32>
    %cst_86 = arith.constant dense<0.000000e+00> : vector<8x8xf32>
    %286 = tpu.matmul %284, %285, %cst_86 {dimension_numbers = #tpu.dot_dimension_numbers<[1], [1], [0], [0], [0, 0, 1, 0], [], []>} : vector<8x8xf32>, vector<8x8xf32>, vector<8x8xf32> -> vector<8x8xf32>
    %287 = vector.extract_strided_slice %278 {offsets = [0, 16], sizes = [8, 8], strides = [1, 1]} : vector<8x32xf32> to vector<8x8xf32>
    %288 = vector.extract_strided_slice %279 {offsets = [0, 16], sizes = [8, 8], strides = [1, 1]} : vector<8x32xf32> to vector<8x8xf32>
    %cst_87 = arith.constant dense<0.000000e+00> : vector<8x8xf32>
    %289 = tpu.matmul %287, %288, %cst_87 {dimension_numbers = #tpu.dot_dimension_numbers<[1], [1], [0], [0], [0, 0, 1, 0], [], []>} : vector<8x8xf32>, vector<8x8xf32>, vector<8x8xf32> -> vector<8x8xf32>
    %290 = vector.extract_strided_slice %278 {offsets = [0, 24], sizes = [8, 8], strides = [1, 1]} : vector<8x32xf32> to vector<8x8xf32>
    %291 = vector.extract_strided_slice %279 {offsets = [0, 24], sizes = [8, 8], strides = [1, 1]} : vector<8x32xf32> to vector<8x8xf32>
    %cst_88 = arith.constant dense<0.000000e+00> : vector<8x8xf32>
    %292 = tpu.matmul %290, %291, %cst_88 {dimension_numbers = #tpu.dot_dimension_numbers<[1], [1], [0], [0], [0, 0, 1, 0], [], []>} : vector<8x8xf32>, vector<8x8xf32>, vector<8x8xf32> -> vector<8x8xf32>
    %293 = tpu.concatenate %283, %286, %289, %292 in 0 : vector<8x8xf32>, vector<8x8xf32>, vector<8x8xf32>, vector<8x8xf32> -> vector<32x8xf32>
    %cst_89 = arith.constant 0.353553385 : f32
    %294 = vector.broadcast %cst_89 : f32 to vector<32x8xf32>
    %295 = arith.mulf %293, %294 : vector<32x8xf32>
    %296 = arith.addf %295, %272 : vector<32x8xf32>
    %cst_90 = arith.constant dense<0xFF800000> : vector<32xf32>
    %297 = vector.multi_reduction <maximumf>, %296, %cst_90 [1] : vector<32x8xf32> to vector<32xf32>
    %298 = vector.shape_cast %297 : vector<32xf32> to vector<32x1xf32>
    %299 = vector.broadcast %298 : vector<32x1xf32> to vector<32x8xf32>
    %300 = arith.subf %296, %299 : vector<32x8xf32>
    %301 = math.exp %300 : vector<32x8xf32>
    %cst_91 = arith.constant dense<0.000000e+00> : vector<32xf32>
    %302 = vector.multi_reduction <add>, %301, %cst_91 [1] : vector<32x8xf32> to vector<32xf32>
    %303 = vector.shape_cast %302 : vector<32xf32> to vector<32x1xf32>
    %304 = vector.broadcast %303 : vector<32x1xf32> to vector<32x8xf32>
    %305 = arith.divf %301, %304 : vector<32x8xf32>
    %306 = vector.extract_strided_slice %305 {offsets = [0, 0], sizes = [8, 8], strides = [1, 1]} : vector<32x8xf32> to vector<8x8xf32>
    %307 = vector.extract_strided_slice %280 {offsets = [0, 0], sizes = [8, 8], strides = [1, 1]} : vector<8x32xf32> to vector<8x8xf32>
    %cst_92 = arith.constant dense<0.000000e+00> : vector<8x8xf32>
    %308 = tpu.matmul %306, %307, %cst_92 {dimension_numbers = #tpu.dot_dimension_numbers<[1], [0], [0], [1], [0, 0, 1, 1], [], []>} : vector<8x8xf32>, vector<8x8xf32>, vector<8x8xf32> -> vector<8x8xf32>
    %309 = vector.extract_strided_slice %305 {offsets = [8, 0], sizes = [8, 8], strides = [1, 1]} : vector<32x8xf32> to vector<8x8xf32>
    %310 = vector.extract_strided_slice %280 {offsets = [0, 8], sizes = [8, 8], strides = [1, 1]} : vector<8x32xf32> to vector<8x8xf32>
    %cst_93 = arith.constant dense<0.000000e+00> : vector<8x8xf32>
    %311 = tpu.matmul %309, %310, %cst_93 {dimension_numbers = #tpu.dot_dimension_numbers<[1], [0], [0], [1], [0, 0, 1, 1], [], []>} : vector<8x8xf32>, vector<8x8xf32>, vector<8x8xf32> -> vector<8x8xf32>
    %312 = vector.extract_strided_slice %305 {offsets = [16, 0], sizes = [8, 8], strides = [1, 1]} : vector<32x8xf32> to vector<8x8xf32>
    %313 = vector.extract_strided_slice %280 {offsets = [0, 16], sizes = [8, 8], strides = [1, 1]} : vector<8x32xf32> to vector<8x8xf32>
    %cst_94 = arith.constant dense<0.000000e+00> : vector<8x8xf32>
    %314 = tpu.matmul %312, %313, %cst_94 {dimension_numbers = #tpu.dot_dimension_numbers<[1], [0], [0], [1], [0, 0, 1, 1], [], []>} : vector<8x8xf32>, vector<8x8xf32>, vector<8x8xf32> -> vector<8x8xf32>
    %315 = vector.extract_strided_slice %305 {offsets = [24, 0], sizes = [8, 8], strides = [1, 1]} : vector<32x8xf32> to vector<8x8xf32>
    %316 = vector.extract_strided_slice %280 {offsets = [0, 24], sizes = [8, 8], strides = [1, 1]} : vector<8x32xf32> to vector<8x8xf32>
    %cst_95 = arith.constant dense<0.000000e+00> : vector<8x8xf32>
    %317 = tpu.matmul %315, %316, %cst_95 {dimension_numbers = #tpu.dot_dimension_numbers<[1], [0], [0], [1], [0, 0, 1, 1], [], []>} : vector<8x8xf32>, vector<8x8xf32>, vector<8x8xf32> -> vector<8x8xf32>
    %318 = tpu.concatenate %308, %311, %314, %317 in 1 : vector<8x8xf32>, vector<8x8xf32>, vector<8x8xf32>, vector<8x8xf32> -> vector<8x32xf32>
    %c192 = arith.constant 192 : index
    %c0_96 = arith.constant 0 : index
    %319 = vector.load %arg3[%c192, %c0_96] : memref<800x96xf32, #tpu.memory_space<vmem>>, vector<32x32xf32>
    %cst_97 = arith.constant dense<0.000000e+00> : vector<8x32xf32>
    %320 = tpu.matmul %318, %319, %cst_97 {dimension_numbers = #tpu.dot_dimension_numbers<[1], [0], [0], [1], [0, 0, 1, 1], [], []>} : vector<8x32xf32>, vector<32x32xf32>, vector<8x32xf32> -> vector<8x32xf32>
    %321 = vector.extract_strided_slice %0 {offsets = [27, 0], sizes = [1, 32], strides = [1, 1]} : vector<72x128xf32> to vector<1x32xf32>
    %322 = vector.broadcast %321 : vector<1x32xf32> to vector<8x32xf32>
    %323 = arith.addf %320, %322 : vector<8x32xf32>
    %324 = arith.addf %265, %323 : vector<8x32xf32>
    %325 = vector.extract_strided_slice %0 {offsets = [52, 0], sizes = [1, 32], strides = [1, 1]} : vector<72x128xf32> to vector<1x32xf32>
    %326 = vector.extract_strided_slice %0 {offsets = [53, 0], sizes = [1, 32], strides = [1, 1]} : vector<72x128xf32> to vector<1x32xf32>
    %cst_98 = arith.constant dense<0.000000e+00> : vector<8xf32>
    %327 = vector.multi_reduction <add>, %324, %cst_98 [1] : vector<8x32xf32> to vector<8xf32>
    %328 = vector.shape_cast %327 : vector<8xf32> to vector<8x1xf32>
    %cst_99 = arith.constant 3.200000e+01 : f32
    %329 = vector.broadcast %cst_99 : f32 to vector<8x1xf32>
    %330 = arith.divf %328, %329 : vector<8x1xf32>
    %331 = vector.broadcast %330 : vector<8x1xf32> to vector<8x32xf32>
    %332 = arith.subf %324, %331 : vector<8x32xf32>
    %333 = arith.mulf %332, %332 : vector<8x32xf32>
    %cst_100 = arith.constant dense<0.000000e+00> : vector<8xf32>
    %334 = vector.multi_reduction <add>, %333, %cst_100 [1] : vector<8x32xf32> to vector<8xf32>
    %335 = vector.shape_cast %334 : vector<8xf32> to vector<8x1xf32>
    %cst_101 = arith.constant 3.200000e+01 : f32
    %336 = vector.broadcast %cst_101 : f32 to vector<8x1xf32>
    %337 = arith.divf %335, %336 : vector<8x1xf32>
    %cst_102 = arith.constant 9.99999974E-6 : f32
    %338 = vector.broadcast %cst_102 : f32 to vector<8x1xf32>
    %339 = arith.addf %337, %338 : vector<8x1xf32>
    %340 = math.rsqrt %339 : vector<8x1xf32>
    %341 = vector.broadcast %340 : vector<8x1xf32> to vector<8x32xf32>
    %342 = arith.mulf %332, %341 : vector<8x32xf32>
    %343 = vector.broadcast %325 : vector<1x32xf32> to vector<8x32xf32>
    %344 = arith.mulf %342, %343 : vector<8x32xf32>
    %345 = vector.broadcast %326 : vector<1x32xf32> to vector<8x32xf32>
    %346 = arith.addf %344, %345 : vector<8x32xf32>
    %c224 = arith.constant 224 : index
    %c0_103 = arith.constant 0 : index
    %347 = vector.load %arg3[%c224, %c0_103] : memref<800x96xf32, #tpu.memory_space<vmem>>, vector<32x96xf32>
    %348 = vector.extract_strided_slice %0 {offsets = [28, 0], sizes = [1, 96], strides = [1, 1]} : vector<72x128xf32> to vector<1x96xf32>
    %349 = vector.extract_strided_slice %347 {offsets = [0, 0], sizes = [32, 32], strides = [1, 1]} : vector<32x96xf32> to vector<32x32xf32>
    %cst_104 = arith.constant dense<0.000000e+00> : vector<8x32xf32>
    %350 = tpu.matmul %346, %349, %cst_104 {dimension_numbers = #tpu.dot_dimension_numbers<[1], [0], [0], [1], [0, 0, 1, 1], [], []>} : vector<8x32xf32>, vector<32x32xf32>, vector<8x32xf32> -> vector<8x32xf32>
    %351 = vector.extract_strided_slice %348 {offsets = [0, 0], sizes = [1, 32], strides = [1, 1]} : vector<1x96xf32> to vector<1x32xf32>
    %352 = vector.broadcast %351 : vector<1x32xf32> to vector<8x32xf32>
    %353 = arith.addf %350, %352 : vector<8x32xf32>
    %354 = vector.extract_strided_slice %347 {offsets = [0, 32], sizes = [32, 64], strides = [1, 1]} : vector<32x96xf32> to vector<32x64xf32>
    %cst_105 = arith.constant dense<0.000000e+00> : vector<6x64xf32>
    %355 = tpu.matmul %256, %354, %cst_105 {dimension_numbers = #tpu.dot_dimension_numbers<[1], [0], [0], [1], [0, 0, 1, 1], [], []>} : vector<6x32xf32>, vector<32x64xf32>, vector<6x64xf32> -> vector<6x64xf32>
    %356 = vector.extract_strided_slice %348 {offsets = [0, 32], sizes = [1, 64], strides = [1, 1]} : vector<1x96xf32> to vector<1x64xf32>
    %357 = vector.broadcast %356 : vector<1x64xf32> to vector<6x64xf32>
    %358 = arith.addf %355, %357 : vector<6x64xf32>
    %359 = vector.extract_strided_slice %358 {offsets = [0, 0], sizes = [6, 32], strides = [1, 1]} : vector<6x64xf32> to vector<6x32xf32>
    %360 = vector.extract_strided_slice %358 {offsets = [0, 32], sizes = [6, 32], strides = [1, 1]} : vector<6x64xf32> to vector<6x32xf32>
    %361 = vector.extract_strided_slice %353 {offsets = [0, 0], sizes = [8, 8], strides = [1, 1]} : vector<8x32xf32> to vector<8x8xf32>
    %362 = vector.extract_strided_slice %359 {offsets = [0, 0], sizes = [6, 8], strides = [1, 1]} : vector<6x32xf32> to vector<6x8xf32>
    %cst_106 = arith.constant dense<0.000000e+00> : vector<8x6xf32>
    %363 = tpu.matmul %361, %362, %cst_106 {dimension_numbers = #tpu.dot_dimension_numbers<[1], [1], [0], [0], [0, 0, 1, 0], [], []>} : vector<8x8xf32>, vector<6x8xf32>, vector<8x6xf32> -> vector<8x6xf32>
    %364 = vector.extract_strided_slice %353 {offsets = [0, 8], sizes = [8, 8], strides = [1, 1]} : vector<8x32xf32> to vector<8x8xf32>
    %365 = vector.extract_strided_slice %359 {offsets = [0, 8], sizes = [6, 8], strides = [1, 1]} : vector<6x32xf32> to vector<6x8xf32>
    %cst_107 = arith.constant dense<0.000000e+00> : vector<8x6xf32>
    %366 = tpu.matmul %364, %365, %cst_107 {dimension_numbers = #tpu.dot_dimension_numbers<[1], [1], [0], [0], [0, 0, 1, 0], [], []>} : vector<8x8xf32>, vector<6x8xf32>, vector<8x6xf32> -> vector<8x6xf32>
    %367 = vector.extract_strided_slice %353 {offsets = [0, 16], sizes = [8, 8], strides = [1, 1]} : vector<8x32xf32> to vector<8x8xf32>
    %368 = vector.extract_strided_slice %359 {offsets = [0, 16], sizes = [6, 8], strides = [1, 1]} : vector<6x32xf32> to vector<6x8xf32>
    %cst_108 = arith.constant dense<0.000000e+00> : vector<8x6xf32>
    %369 = tpu.matmul %367, %368, %cst_108 {dimension_numbers = #tpu.dot_dimension_numbers<[1], [1], [0], [0], [0, 0, 1, 0], [], []>} : vector<8x8xf32>, vector<6x8xf32>, vector<8x6xf32> -> vector<8x6xf32>
    %370 = vector.extract_strided_slice %353 {offsets = [0, 24], sizes = [8, 8], strides = [1, 1]} : vector<8x32xf32> to vector<8x8xf32>
    %371 = vector.extract_strided_slice %359 {offsets = [0, 24], sizes = [6, 8], strides = [1, 1]} : vector<6x32xf32> to vector<6x8xf32>
    %cst_109 = arith.constant dense<0.000000e+00> : vector<8x6xf32>
    %372 = tpu.matmul %370, %371, %cst_109 {dimension_numbers = #tpu.dot_dimension_numbers<[1], [1], [0], [0], [0, 0, 1, 0], [], []>} : vector<8x8xf32>, vector<6x8xf32>, vector<8x6xf32> -> vector<8x6xf32>
    %373 = tpu.concatenate %363, %366, %369, %372 in 0 : vector<8x6xf32>, vector<8x6xf32>, vector<8x6xf32>, vector<8x6xf32> -> vector<32x6xf32>
    %cst_110 = arith.constant 0.353553385 : f32
    %374 = vector.broadcast %cst_110 : f32 to vector<32x6xf32>
    %375 = arith.mulf %373, %374 : vector<32x6xf32>
    %376 = vector.broadcast %9 : vector<1x6xf32> to vector<32x6xf32>
    %377 = arith.addf %375, %376 : vector<32x6xf32>
    %cst_111 = arith.constant dense<0xFF800000> : vector<32xf32>
    %378 = vector.multi_reduction <maximumf>, %377, %cst_111 [1] : vector<32x6xf32> to vector<32xf32>
    %379 = vector.shape_cast %378 : vector<32xf32> to vector<32x1xf32>
    %380 = vector.broadcast %379 : vector<32x1xf32> to vector<32x6xf32>
    %381 = arith.subf %377, %380 : vector<32x6xf32>
    %382 = math.exp %381 : vector<32x6xf32>
    %cst_112 = arith.constant dense<0.000000e+00> : vector<32xf32>
    %383 = vector.multi_reduction <add>, %382, %cst_112 [1] : vector<32x6xf32> to vector<32xf32>
    %384 = vector.shape_cast %383 : vector<32xf32> to vector<32x1xf32>
    %385 = vector.broadcast %384 : vector<32x1xf32> to vector<32x6xf32>
    %386 = arith.divf %382, %385 : vector<32x6xf32>
    %387 = vector.extract_strided_slice %386 {offsets = [0, 0], sizes = [8, 6], strides = [1, 1]} : vector<32x6xf32> to vector<8x6xf32>
    %388 = vector.extract_strided_slice %360 {offsets = [0, 0], sizes = [6, 8], strides = [1, 1]} : vector<6x32xf32> to vector<6x8xf32>
    %cst_113 = arith.constant dense<0.000000e+00> : vector<8x8xf32>
    %389 = tpu.matmul %387, %388, %cst_113 {dimension_numbers = #tpu.dot_dimension_numbers<[1], [0], [0], [1], [0, 0, 1, 1], [], []>} : vector<8x6xf32>, vector<6x8xf32>, vector<8x8xf32> -> vector<8x8xf32>
    %390 = vector.extract_strided_slice %386 {offsets = [8, 0], sizes = [8, 6], strides = [1, 1]} : vector<32x6xf32> to vector<8x6xf32>
    %391 = vector.extract_strided_slice %360 {offsets = [0, 8], sizes = [6, 8], strides = [1, 1]} : vector<6x32xf32> to vector<6x8xf32>
    %cst_114 = arith.constant dense<0.000000e+00> : vector<8x8xf32>
    %392 = tpu.matmul %390, %391, %cst_114 {dimension_numbers = #tpu.dot_dimension_numbers<[1], [0], [0], [1], [0, 0, 1, 1], [], []>} : vector<8x6xf32>, vector<6x8xf32>, vector<8x8xf32> -> vector<8x8xf32>
    %393 = vector.extract_strided_slice %386 {offsets = [16, 0], sizes = [8, 6], strides = [1, 1]} : vector<32x6xf32> to vector<8x6xf32>
    %394 = vector.extract_strided_slice %360 {offsets = [0, 16], sizes = [6, 8], strides = [1, 1]} : vector<6x32xf32> to vector<6x8xf32>
    %cst_115 = arith.constant dense<0.000000e+00> : vector<8x8xf32>
    %395 = tpu.matmul %393, %394, %cst_115 {dimension_numbers = #tpu.dot_dimension_numbers<[1], [0], [0], [1], [0, 0, 1, 1], [], []>} : vector<8x6xf32>, vector<6x8xf32>, vector<8x8xf32> -> vector<8x8xf32>
    %396 = vector.extract_strided_slice %386 {offsets = [24, 0], sizes = [8, 6], strides = [1, 1]} : vector<32x6xf32> to vector<8x6xf32>
    %397 = vector.extract_strided_slice %360 {offsets = [0, 24], sizes = [6, 8], strides = [1, 1]} : vector<6x32xf32> to vector<6x8xf32>
    %cst_116 = arith.constant dense<0.000000e+00> : vector<8x8xf32>
    %398 = tpu.matmul %396, %397, %cst_116 {dimension_numbers = #tpu.dot_dimension_numbers<[1], [0], [0], [1], [0, 0, 1, 1], [], []>} : vector<8x6xf32>, vector<6x8xf32>, vector<8x8xf32> -> vector<8x8xf32>
    %399 = tpu.concatenate %389, %392, %395, %398 in 1 : vector<8x8xf32>, vector<8x8xf32>, vector<8x8xf32>, vector<8x8xf32> -> vector<8x32xf32>
    %c256 = arith.constant 256 : index
    %c0_117 = arith.constant 0 : index
    %400 = vector.load %arg3[%c256, %c0_117] : memref<800x96xf32, #tpu.memory_space<vmem>>, vector<32x32xf32>
    %cst_118 = arith.constant dense<0.000000e+00> : vector<8x32xf32>
    %401 = tpu.matmul %399, %400, %cst_118 {dimension_numbers = #tpu.dot_dimension_numbers<[1], [0], [0], [1], [0, 0, 1, 1], [], []>} : vector<8x32xf32>, vector<32x32xf32>, vector<8x32xf32> -> vector<8x32xf32>
    %402 = vector.extract_strided_slice %0 {offsets = [29, 0], sizes = [1, 32], strides = [1, 1]} : vector<72x128xf32> to vector<1x32xf32>
    %403 = vector.broadcast %402 : vector<1x32xf32> to vector<8x32xf32>
    %404 = arith.addf %401, %403 : vector<8x32xf32>
    %405 = arith.addf %346, %404 : vector<8x32xf32>
    %406 = vector.extract_strided_slice %0 {offsets = [54, 0], sizes = [1, 32], strides = [1, 1]} : vector<72x128xf32> to vector<1x32xf32>
    %407 = vector.extract_strided_slice %0 {offsets = [55, 0], sizes = [1, 32], strides = [1, 1]} : vector<72x128xf32> to vector<1x32xf32>
    %cst_119 = arith.constant dense<0.000000e+00> : vector<8xf32>
    %408 = vector.multi_reduction <add>, %405, %cst_119 [1] : vector<8x32xf32> to vector<8xf32>
    %409 = vector.shape_cast %408 : vector<8xf32> to vector<8x1xf32>
    %cst_120 = arith.constant 3.200000e+01 : f32
    %410 = vector.broadcast %cst_120 : f32 to vector<8x1xf32>
    %411 = arith.divf %409, %410 : vector<8x1xf32>
    %412 = vector.broadcast %411 : vector<8x1xf32> to vector<8x32xf32>
    %413 = arith.subf %405, %412 : vector<8x32xf32>
    %414 = arith.mulf %413, %413 : vector<8x32xf32>
    %cst_121 = arith.constant dense<0.000000e+00> : vector<8xf32>
    %415 = vector.multi_reduction <add>, %414, %cst_121 [1] : vector<8x32xf32> to vector<8xf32>
    %416 = vector.shape_cast %415 : vector<8xf32> to vector<8x1xf32>
    %cst_122 = arith.constant 3.200000e+01 : f32
    %417 = vector.broadcast %cst_122 : f32 to vector<8x1xf32>
    %418 = arith.divf %416, %417 : vector<8x1xf32>
    %cst_123 = arith.constant 9.99999974E-6 : f32
    %419 = vector.broadcast %cst_123 : f32 to vector<8x1xf32>
    %420 = arith.addf %418, %419 : vector<8x1xf32>
    %421 = math.rsqrt %420 : vector<8x1xf32>
    %422 = vector.broadcast %421 : vector<8x1xf32> to vector<8x32xf32>
    %423 = arith.mulf %413, %422 : vector<8x32xf32>
    %424 = vector.broadcast %406 : vector<1x32xf32> to vector<8x32xf32>
    %425 = arith.mulf %423, %424 : vector<8x32xf32>
    %426 = vector.broadcast %407 : vector<1x32xf32> to vector<8x32xf32>
    %427 = arith.addf %425, %426 : vector<8x32xf32>
    %c608 = arith.constant 608 : index
    %c0_124 = arith.constant 0 : index
    %428 = vector.load %arg3[%c608, %c0_124] : memref<800x96xf32, #tpu.memory_space<vmem>>, vector<32x64xf32>
    %cst_125 = arith.constant dense<0.000000e+00> : vector<8x64xf32>
    %429 = tpu.matmul %427, %428, %cst_125 {dimension_numbers = #tpu.dot_dimension_numbers<[1], [0], [0], [1], [0, 0, 1, 1], [], []>} : vector<8x32xf32>, vector<32x64xf32>, vector<8x64xf32> -> vector<8x64xf32>
    %430 = vector.extract_strided_slice %0 {offsets = [38, 0], sizes = [1, 64], strides = [1, 1]} : vector<72x128xf32> to vector<1x64xf32>
    %431 = vector.broadcast %430 : vector<1x64xf32> to vector<8x64xf32>
    %432 = arith.addf %429, %431 : vector<8x64xf32>
    %cst_126 = arith.constant 0.000000e+00 : f32
    %433 = vector.broadcast %cst_126 : f32 to vector<8x64xf32>
    %434 = arith.maximumf %432, %433 : vector<8x64xf32>
    %c640 = arith.constant 640 : index
    %c0_127 = arith.constant 0 : index
    %435 = vector.load %arg3[%c640, %c0_127] : memref<800x96xf32, #tpu.memory_space<vmem>>, vector<64x32xf32>
    %cst_128 = arith.constant dense<0.000000e+00> : vector<8x32xf32>
    %436 = tpu.matmul %434, %435, %cst_128 {dimension_numbers = #tpu.dot_dimension_numbers<[1], [0], [0], [1], [0, 0, 1, 1], [], []>} : vector<8x64xf32>, vector<64x32xf32>, vector<8x32xf32> -> vector<8x32xf32>
    %437 = vector.extract_strided_slice %0 {offsets = [39, 0], sizes = [1, 32], strides = [1, 1]} : vector<72x128xf32> to vector<1x32xf32>
    %438 = vector.broadcast %437 : vector<1x32xf32> to vector<8x32xf32>
    %439 = arith.addf %436, %438 : vector<8x32xf32>
    %440 = arith.addf %427, %439 : vector<8x32xf32>
    %441 = vector.extract_strided_slice %0 {offsets = [56, 0], sizes = [1, 32], strides = [1, 1]} : vector<72x128xf32> to vector<1x32xf32>
    %442 = vector.extract_strided_slice %0 {offsets = [57, 0], sizes = [1, 32], strides = [1, 1]} : vector<72x128xf32> to vector<1x32xf32>
    %cst_129 = arith.constant dense<0.000000e+00> : vector<8xf32>
    %443 = vector.multi_reduction <add>, %440, %cst_129 [1] : vector<8x32xf32> to vector<8xf32>
    %444 = vector.shape_cast %443 : vector<8xf32> to vector<8x1xf32>
    %cst_130 = arith.constant 3.200000e+01 : f32
    %445 = vector.broadcast %cst_130 : f32 to vector<8x1xf32>
    %446 = arith.divf %444, %445 : vector<8x1xf32>
    %447 = vector.broadcast %446 : vector<8x1xf32> to vector<8x32xf32>
    %448 = arith.subf %440, %447 : vector<8x32xf32>
    %449 = arith.mulf %448, %448 : vector<8x32xf32>
    %cst_131 = arith.constant dense<0.000000e+00> : vector<8xf32>
    %450 = vector.multi_reduction <add>, %449, %cst_131 [1] : vector<8x32xf32> to vector<8xf32>
    %451 = vector.shape_cast %450 : vector<8xf32> to vector<8x1xf32>
    %cst_132 = arith.constant 3.200000e+01 : f32
    %452 = vector.broadcast %cst_132 : f32 to vector<8x1xf32>
    %453 = arith.divf %451, %452 : vector<8x1xf32>
    %cst_133 = arith.constant 9.99999974E-6 : f32
    %454 = vector.broadcast %cst_133 : f32 to vector<8x1xf32>
    %455 = arith.addf %453, %454 : vector<8x1xf32>
    %456 = math.rsqrt %455 : vector<8x1xf32>
    %457 = vector.broadcast %456 : vector<8x1xf32> to vector<8x32xf32>
    %458 = arith.mulf %448, %457 : vector<8x32xf32>
    %459 = vector.broadcast %441 : vector<1x32xf32> to vector<8x32xf32>
    %460 = arith.mulf %458, %459 : vector<8x32xf32>
    %461 = vector.broadcast %442 : vector<1x32xf32> to vector<8x32xf32>
    %462 = arith.addf %460, %461 : vector<8x32xf32>
    %c288 = arith.constant 288 : index
    %c0_134 = arith.constant 0 : index
    %463 = vector.load %arg3[%c288, %c0_134] : memref<800x96xf32, #tpu.memory_space<vmem>>, vector<32x96xf32>
    %464 = vector.extract_strided_slice %0 {offsets = [30, 0], sizes = [1, 96], strides = [1, 1]} : vector<72x128xf32> to vector<1x96xf32>
    %cst_135 = arith.constant dense<0.000000e+00> : vector<8x96xf32>
    %465 = tpu.matmul %462, %463, %cst_135 {dimension_numbers = #tpu.dot_dimension_numbers<[1], [0], [0], [1], [0, 0, 1, 1], [], []>} : vector<8x32xf32>, vector<32x96xf32>, vector<8x96xf32> -> vector<8x96xf32>
    %466 = vector.broadcast %464 : vector<1x96xf32> to vector<8x96xf32>
    %467 = arith.addf %465, %466 : vector<8x96xf32>
    %468 = vector.extract_strided_slice %467 {offsets = [0, 0], sizes = [8, 32], strides = [1, 1]} : vector<8x96xf32> to vector<8x32xf32>
    %469 = vector.extract_strided_slice %467 {offsets = [0, 32], sizes = [8, 32], strides = [1, 1]} : vector<8x96xf32> to vector<8x32xf32>
    %470 = vector.extract_strided_slice %467 {offsets = [0, 64], sizes = [8, 32], strides = [1, 1]} : vector<8x96xf32> to vector<8x32xf32>
    %471 = vector.extract_strided_slice %468 {offsets = [0, 0], sizes = [8, 8], strides = [1, 1]} : vector<8x32xf32> to vector<8x8xf32>
    %472 = vector.extract_strided_slice %469 {offsets = [0, 0], sizes = [8, 8], strides = [1, 1]} : vector<8x32xf32> to vector<8x8xf32>
    %cst_136 = arith.constant dense<0.000000e+00> : vector<8x8xf32>
    %473 = tpu.matmul %471, %472, %cst_136 {dimension_numbers = #tpu.dot_dimension_numbers<[1], [1], [0], [0], [0, 0, 1, 0], [], []>} : vector<8x8xf32>, vector<8x8xf32>, vector<8x8xf32> -> vector<8x8xf32>
    %474 = vector.extract_strided_slice %468 {offsets = [0, 8], sizes = [8, 8], strides = [1, 1]} : vector<8x32xf32> to vector<8x8xf32>
    %475 = vector.extract_strided_slice %469 {offsets = [0, 8], sizes = [8, 8], strides = [1, 1]} : vector<8x32xf32> to vector<8x8xf32>
    %cst_137 = arith.constant dense<0.000000e+00> : vector<8x8xf32>
    %476 = tpu.matmul %474, %475, %cst_137 {dimension_numbers = #tpu.dot_dimension_numbers<[1], [1], [0], [0], [0, 0, 1, 0], [], []>} : vector<8x8xf32>, vector<8x8xf32>, vector<8x8xf32> -> vector<8x8xf32>
    %477 = vector.extract_strided_slice %468 {offsets = [0, 16], sizes = [8, 8], strides = [1, 1]} : vector<8x32xf32> to vector<8x8xf32>
    %478 = vector.extract_strided_slice %469 {offsets = [0, 16], sizes = [8, 8], strides = [1, 1]} : vector<8x32xf32> to vector<8x8xf32>
    %cst_138 = arith.constant dense<0.000000e+00> : vector<8x8xf32>
    %479 = tpu.matmul %477, %478, %cst_138 {dimension_numbers = #tpu.dot_dimension_numbers<[1], [1], [0], [0], [0, 0, 1, 0], [], []>} : vector<8x8xf32>, vector<8x8xf32>, vector<8x8xf32> -> vector<8x8xf32>
    %480 = vector.extract_strided_slice %468 {offsets = [0, 24], sizes = [8, 8], strides = [1, 1]} : vector<8x32xf32> to vector<8x8xf32>
    %481 = vector.extract_strided_slice %469 {offsets = [0, 24], sizes = [8, 8], strides = [1, 1]} : vector<8x32xf32> to vector<8x8xf32>
    %cst_139 = arith.constant dense<0.000000e+00> : vector<8x8xf32>
    %482 = tpu.matmul %480, %481, %cst_139 {dimension_numbers = #tpu.dot_dimension_numbers<[1], [1], [0], [0], [0, 0, 1, 0], [], []>} : vector<8x8xf32>, vector<8x8xf32>, vector<8x8xf32> -> vector<8x8xf32>
    %483 = tpu.concatenate %473, %476, %479, %482 in 0 : vector<8x8xf32>, vector<8x8xf32>, vector<8x8xf32>, vector<8x8xf32> -> vector<32x8xf32>
    %cst_140 = arith.constant 0.353553385 : f32
    %484 = vector.broadcast %cst_140 : f32 to vector<32x8xf32>
    %485 = arith.mulf %483, %484 : vector<32x8xf32>
    %486 = arith.addf %485, %272 : vector<32x8xf32>
    %cst_141 = arith.constant dense<0xFF800000> : vector<32xf32>
    %487 = vector.multi_reduction <maximumf>, %486, %cst_141 [1] : vector<32x8xf32> to vector<32xf32>
    %488 = vector.shape_cast %487 : vector<32xf32> to vector<32x1xf32>
    %489 = vector.broadcast %488 : vector<32x1xf32> to vector<32x8xf32>
    %490 = arith.subf %486, %489 : vector<32x8xf32>
    %491 = math.exp %490 : vector<32x8xf32>
    %cst_142 = arith.constant dense<0.000000e+00> : vector<32xf32>
    %492 = vector.multi_reduction <add>, %491, %cst_142 [1] : vector<32x8xf32> to vector<32xf32>
    %493 = vector.shape_cast %492 : vector<32xf32> to vector<32x1xf32>
    %494 = vector.broadcast %493 : vector<32x1xf32> to vector<32x8xf32>
    %495 = arith.divf %491, %494 : vector<32x8xf32>
    %496 = vector.extract_strided_slice %495 {offsets = [0, 0], sizes = [8, 8], strides = [1, 1]} : vector<32x8xf32> to vector<8x8xf32>
    %497 = vector.extract_strided_slice %470 {offsets = [0, 0], sizes = [8, 8], strides = [1, 1]} : vector<8x32xf32> to vector<8x8xf32>
    %cst_143 = arith.constant dense<0.000000e+00> : vector<8x8xf32>
    %498 = tpu.matmul %496, %497, %cst_143 {dimension_numbers = #tpu.dot_dimension_numbers<[1], [0], [0], [1], [0, 0, 1, 1], [], []>} : vector<8x8xf32>, vector<8x8xf32>, vector<8x8xf32> -> vector<8x8xf32>
    %499 = vector.extract_strided_slice %495 {offsets = [8, 0], sizes = [8, 8], strides = [1, 1]} : vector<32x8xf32> to vector<8x8xf32>
    %500 = vector.extract_strided_slice %470 {offsets = [0, 8], sizes = [8, 8], strides = [1, 1]} : vector<8x32xf32> to vector<8x8xf32>
    %cst_144 = arith.constant dense<0.000000e+00> : vector<8x8xf32>
    %501 = tpu.matmul %499, %500, %cst_144 {dimension_numbers = #tpu.dot_dimension_numbers<[1], [0], [0], [1], [0, 0, 1, 1], [], []>} : vector<8x8xf32>, vector<8x8xf32>, vector<8x8xf32> -> vector<8x8xf32>
    %502 = vector.extract_strided_slice %495 {offsets = [16, 0], sizes = [8, 8], strides = [1, 1]} : vector<32x8xf32> to vector<8x8xf32>
    %503 = vector.extract_strided_slice %470 {offsets = [0, 16], sizes = [8, 8], strides = [1, 1]} : vector<8x32xf32> to vector<8x8xf32>
    %cst_145 = arith.constant dense<0.000000e+00> : vector<8x8xf32>
    %504 = tpu.matmul %502, %503, %cst_145 {dimension_numbers = #tpu.dot_dimension_numbers<[1], [0], [0], [1], [0, 0, 1, 1], [], []>} : vector<8x8xf32>, vector<8x8xf32>, vector<8x8xf32> -> vector<8x8xf32>
    %505 = vector.extract_strided_slice %495 {offsets = [24, 0], sizes = [8, 8], strides = [1, 1]} : vector<32x8xf32> to vector<8x8xf32>
    %506 = vector.extract_strided_slice %470 {offsets = [0, 24], sizes = [8, 8], strides = [1, 1]} : vector<8x32xf32> to vector<8x8xf32>
    %cst_146 = arith.constant dense<0.000000e+00> : vector<8x8xf32>
    %507 = tpu.matmul %505, %506, %cst_146 {dimension_numbers = #tpu.dot_dimension_numbers<[1], [0], [0], [1], [0, 0, 1, 1], [], []>} : vector<8x8xf32>, vector<8x8xf32>, vector<8x8xf32> -> vector<8x8xf32>
    %508 = tpu.concatenate %498, %501, %504, %507 in 1 : vector<8x8xf32>, vector<8x8xf32>, vector<8x8xf32>, vector<8x8xf32> -> vector<8x32xf32>
    %c320 = arith.constant 320 : index
    %c0_147 = arith.constant 0 : index
    %509 = vector.load %arg3[%c320, %c0_147] : memref<800x96xf32, #tpu.memory_space<vmem>>, vector<32x32xf32>
    %cst_148 = arith.constant dense<0.000000e+00> : vector<8x32xf32>
    %510 = tpu.matmul %508, %509, %cst_148 {dimension_numbers = #tpu.dot_dimension_numbers<[1], [0], [0], [1], [0, 0, 1, 1], [], []>} : vector<8x32xf32>, vector<32x32xf32>, vector<8x32xf32> -> vector<8x32xf32>
    %511 = vector.extract_strided_slice %0 {offsets = [31, 0], sizes = [1, 32], strides = [1, 1]} : vector<72x128xf32> to vector<1x32xf32>
    %512 = vector.broadcast %511 : vector<1x32xf32> to vector<8x32xf32>
    %513 = arith.addf %510, %512 : vector<8x32xf32>
    %514 = arith.addf %462, %513 : vector<8x32xf32>
    %515 = vector.extract_strided_slice %0 {offsets = [58, 0], sizes = [1, 32], strides = [1, 1]} : vector<72x128xf32> to vector<1x32xf32>
    %516 = vector.extract_strided_slice %0 {offsets = [59, 0], sizes = [1, 32], strides = [1, 1]} : vector<72x128xf32> to vector<1x32xf32>
    %cst_149 = arith.constant dense<0.000000e+00> : vector<8xf32>
    %517 = vector.multi_reduction <add>, %514, %cst_149 [1] : vector<8x32xf32> to vector<8xf32>
    %518 = vector.shape_cast %517 : vector<8xf32> to vector<8x1xf32>
    %cst_150 = arith.constant 3.200000e+01 : f32
    %519 = vector.broadcast %cst_150 : f32 to vector<8x1xf32>
    %520 = arith.divf %518, %519 : vector<8x1xf32>
    %521 = vector.broadcast %520 : vector<8x1xf32> to vector<8x32xf32>
    %522 = arith.subf %514, %521 : vector<8x32xf32>
    %523 = arith.mulf %522, %522 : vector<8x32xf32>
    %cst_151 = arith.constant dense<0.000000e+00> : vector<8xf32>
    %524 = vector.multi_reduction <add>, %523, %cst_151 [1] : vector<8x32xf32> to vector<8xf32>
    %525 = vector.shape_cast %524 : vector<8xf32> to vector<8x1xf32>
    %cst_152 = arith.constant 3.200000e+01 : f32
    %526 = vector.broadcast %cst_152 : f32 to vector<8x1xf32>
    %527 = arith.divf %525, %526 : vector<8x1xf32>
    %cst_153 = arith.constant 9.99999974E-6 : f32
    %528 = vector.broadcast %cst_153 : f32 to vector<8x1xf32>
    %529 = arith.addf %527, %528 : vector<8x1xf32>
    %530 = math.rsqrt %529 : vector<8x1xf32>
    %531 = vector.broadcast %530 : vector<8x1xf32> to vector<8x32xf32>
    %532 = arith.mulf %522, %531 : vector<8x32xf32>
    %533 = vector.broadcast %515 : vector<1x32xf32> to vector<8x32xf32>
    %534 = arith.mulf %532, %533 : vector<8x32xf32>
    %535 = vector.broadcast %516 : vector<1x32xf32> to vector<8x32xf32>
    %536 = arith.addf %534, %535 : vector<8x32xf32>
    %c352 = arith.constant 352 : index
    %c0_154 = arith.constant 0 : index
    %537 = vector.load %arg3[%c352, %c0_154] : memref<800x96xf32, #tpu.memory_space<vmem>>, vector<32x96xf32>
    %538 = vector.extract_strided_slice %0 {offsets = [32, 0], sizes = [1, 96], strides = [1, 1]} : vector<72x128xf32> to vector<1x96xf32>
    %539 = vector.extract_strided_slice %537 {offsets = [0, 0], sizes = [32, 32], strides = [1, 1]} : vector<32x96xf32> to vector<32x32xf32>
    %cst_155 = arith.constant dense<0.000000e+00> : vector<8x32xf32>
    %540 = tpu.matmul %536, %539, %cst_155 {dimension_numbers = #tpu.dot_dimension_numbers<[1], [0], [0], [1], [0, 0, 1, 1], [], []>} : vector<8x32xf32>, vector<32x32xf32>, vector<8x32xf32> -> vector<8x32xf32>
    %541 = vector.extract_strided_slice %538 {offsets = [0, 0], sizes = [1, 32], strides = [1, 1]} : vector<1x96xf32> to vector<1x32xf32>
    %542 = vector.broadcast %541 : vector<1x32xf32> to vector<8x32xf32>
    %543 = arith.addf %540, %542 : vector<8x32xf32>
    %544 = vector.extract_strided_slice %537 {offsets = [0, 32], sizes = [32, 64], strides = [1, 1]} : vector<32x96xf32> to vector<32x64xf32>
    %cst_156 = arith.constant dense<0.000000e+00> : vector<6x64xf32>
    %545 = tpu.matmul %256, %544, %cst_156 {dimension_numbers = #tpu.dot_dimension_numbers<[1], [0], [0], [1], [0, 0, 1, 1], [], []>} : vector<6x32xf32>, vector<32x64xf32>, vector<6x64xf32> -> vector<6x64xf32>
    %546 = vector.extract_strided_slice %538 {offsets = [0, 32], sizes = [1, 64], strides = [1, 1]} : vector<1x96xf32> to vector<1x64xf32>
    %547 = vector.broadcast %546 : vector<1x64xf32> to vector<6x64xf32>
    %548 = arith.addf %545, %547 : vector<6x64xf32>
    %549 = vector.extract_strided_slice %548 {offsets = [0, 0], sizes = [6, 32], strides = [1, 1]} : vector<6x64xf32> to vector<6x32xf32>
    %550 = vector.extract_strided_slice %548 {offsets = [0, 32], sizes = [6, 32], strides = [1, 1]} : vector<6x64xf32> to vector<6x32xf32>
    %551 = vector.extract_strided_slice %543 {offsets = [0, 0], sizes = [8, 8], strides = [1, 1]} : vector<8x32xf32> to vector<8x8xf32>
    %552 = vector.extract_strided_slice %549 {offsets = [0, 0], sizes = [6, 8], strides = [1, 1]} : vector<6x32xf32> to vector<6x8xf32>
    %cst_157 = arith.constant dense<0.000000e+00> : vector<8x6xf32>
    %553 = tpu.matmul %551, %552, %cst_157 {dimension_numbers = #tpu.dot_dimension_numbers<[1], [1], [0], [0], [0, 0, 1, 0], [], []>} : vector<8x8xf32>, vector<6x8xf32>, vector<8x6xf32> -> vector<8x6xf32>
    %554 = vector.extract_strided_slice %543 {offsets = [0, 8], sizes = [8, 8], strides = [1, 1]} : vector<8x32xf32> to vector<8x8xf32>
    %555 = vector.extract_strided_slice %549 {offsets = [0, 8], sizes = [6, 8], strides = [1, 1]} : vector<6x32xf32> to vector<6x8xf32>
    %cst_158 = arith.constant dense<0.000000e+00> : vector<8x6xf32>
    %556 = tpu.matmul %554, %555, %cst_158 {dimension_numbers = #tpu.dot_dimension_numbers<[1], [1], [0], [0], [0, 0, 1, 0], [], []>} : vector<8x8xf32>, vector<6x8xf32>, vector<8x6xf32> -> vector<8x6xf32>
    %557 = vector.extract_strided_slice %543 {offsets = [0, 16], sizes = [8, 8], strides = [1, 1]} : vector<8x32xf32> to vector<8x8xf32>
    %558 = vector.extract_strided_slice %549 {offsets = [0, 16], sizes = [6, 8], strides = [1, 1]} : vector<6x32xf32> to vector<6x8xf32>
    %cst_159 = arith.constant dense<0.000000e+00> : vector<8x6xf32>
    %559 = tpu.matmul %557, %558, %cst_159 {dimension_numbers = #tpu.dot_dimension_numbers<[1], [1], [0], [0], [0, 0, 1, 0], [], []>} : vector<8x8xf32>, vector<6x8xf32>, vector<8x6xf32> -> vector<8x6xf32>
    %560 = vector.extract_strided_slice %543 {offsets = [0, 24], sizes = [8, 8], strides = [1, 1]} : vector<8x32xf32> to vector<8x8xf32>
    %561 = vector.extract_strided_slice %549 {offsets = [0, 24], sizes = [6, 8], strides = [1, 1]} : vector<6x32xf32> to vector<6x8xf32>
    %cst_160 = arith.constant dense<0.000000e+00> : vector<8x6xf32>
    %562 = tpu.matmul %560, %561, %cst_160 {dimension_numbers = #tpu.dot_dimension_numbers<[1], [1], [0], [0], [0, 0, 1, 0], [], []>} : vector<8x8xf32>, vector<6x8xf32>, vector<8x6xf32> -> vector<8x6xf32>
    %563 = tpu.concatenate %553, %556, %559, %562 in 0 : vector<8x6xf32>, vector<8x6xf32>, vector<8x6xf32>, vector<8x6xf32> -> vector<32x6xf32>
    %cst_161 = arith.constant 0.353553385 : f32
    %564 = vector.broadcast %cst_161 : f32 to vector<32x6xf32>
    %565 = arith.mulf %563, %564 : vector<32x6xf32>
    %566 = vector.broadcast %9 : vector<1x6xf32> to vector<32x6xf32>
    %567 = arith.addf %565, %566 : vector<32x6xf32>
    %cst_162 = arith.constant dense<0xFF800000> : vector<32xf32>
    %568 = vector.multi_reduction <maximumf>, %567, %cst_162 [1] : vector<32x6xf32> to vector<32xf32>
    %569 = vector.shape_cast %568 : vector<32xf32> to vector<32x1xf32>
    %570 = vector.broadcast %569 : vector<32x1xf32> to vector<32x6xf32>
    %571 = arith.subf %567, %570 : vector<32x6xf32>
    %572 = math.exp %571 : vector<32x6xf32>
    %cst_163 = arith.constant dense<0.000000e+00> : vector<32xf32>
    %573 = vector.multi_reduction <add>, %572, %cst_163 [1] : vector<32x6xf32> to vector<32xf32>
    %574 = vector.shape_cast %573 : vector<32xf32> to vector<32x1xf32>
    %575 = vector.broadcast %574 : vector<32x1xf32> to vector<32x6xf32>
    %576 = arith.divf %572, %575 : vector<32x6xf32>
    %577 = vector.extract_strided_slice %576 {offsets = [0, 0], sizes = [8, 6], strides = [1, 1]} : vector<32x6xf32> to vector<8x6xf32>
    %578 = vector.extract_strided_slice %550 {offsets = [0, 0], sizes = [6, 8], strides = [1, 1]} : vector<6x32xf32> to vector<6x8xf32>
    %cst_164 = arith.constant dense<0.000000e+00> : vector<8x8xf32>
    %579 = tpu.matmul %577, %578, %cst_164 {dimension_numbers = #tpu.dot_dimension_numbers<[1], [0], [0], [1], [0, 0, 1, 1], [], []>} : vector<8x6xf32>, vector<6x8xf32>, vector<8x8xf32> -> vector<8x8xf32>
    %580 = vector.extract_strided_slice %576 {offsets = [8, 0], sizes = [8, 6], strides = [1, 1]} : vector<32x6xf32> to vector<8x6xf32>
    %581 = vector.extract_strided_slice %550 {offsets = [0, 8], sizes = [6, 8], strides = [1, 1]} : vector<6x32xf32> to vector<6x8xf32>
    %cst_165 = arith.constant dense<0.000000e+00> : vector<8x8xf32>
    %582 = tpu.matmul %580, %581, %cst_165 {dimension_numbers = #tpu.dot_dimension_numbers<[1], [0], [0], [1], [0, 0, 1, 1], [], []>} : vector<8x6xf32>, vector<6x8xf32>, vector<8x8xf32> -> vector<8x8xf32>
    %583 = vector.extract_strided_slice %576 {offsets = [16, 0], sizes = [8, 6], strides = [1, 1]} : vector<32x6xf32> to vector<8x6xf32>
    %584 = vector.extract_strided_slice %550 {offsets = [0, 16], sizes = [6, 8], strides = [1, 1]} : vector<6x32xf32> to vector<6x8xf32>
    %cst_166 = arith.constant dense<0.000000e+00> : vector<8x8xf32>
    %585 = tpu.matmul %583, %584, %cst_166 {dimension_numbers = #tpu.dot_dimension_numbers<[1], [0], [0], [1], [0, 0, 1, 1], [], []>} : vector<8x6xf32>, vector<6x8xf32>, vector<8x8xf32> -> vector<8x8xf32>
    %586 = vector.extract_strided_slice %576 {offsets = [24, 0], sizes = [8, 6], strides = [1, 1]} : vector<32x6xf32> to vector<8x6xf32>
    %587 = vector.extract_strided_slice %550 {offsets = [0, 24], sizes = [6, 8], strides = [1, 1]} : vector<6x32xf32> to vector<6x8xf32>
    %cst_167 = arith.constant dense<0.000000e+00> : vector<8x8xf32>
    %588 = tpu.matmul %586, %587, %cst_167 {dimension_numbers = #tpu.dot_dimension_numbers<[1], [0], [0], [1], [0, 0, 1, 1], [], []>} : vector<8x6xf32>, vector<6x8xf32>, vector<8x8xf32> -> vector<8x8xf32>
    %589 = tpu.concatenate %579, %582, %585, %588 in 1 : vector<8x8xf32>, vector<8x8xf32>, vector<8x8xf32>, vector<8x8xf32> -> vector<8x32xf32>
    %c384 = arith.constant 384 : index
    %c0_168 = arith.constant 0 : index
    %590 = vector.load %arg3[%c384, %c0_168] : memref<800x96xf32, #tpu.memory_space<vmem>>, vector<32x32xf32>
    %cst_169 = arith.constant dense<0.000000e+00> : vector<8x32xf32>
    %591 = tpu.matmul %589, %590, %cst_169 {dimension_numbers = #tpu.dot_dimension_numbers<[1], [0], [0], [1], [0, 0, 1, 1], [], []>} : vector<8x32xf32>, vector<32x32xf32>, vector<8x32xf32> -> vector<8x32xf32>
    %592 = vector.extract_strided_slice %0 {offsets = [33, 0], sizes = [1, 32], strides = [1, 1]} : vector<72x128xf32> to vector<1x32xf32>
    %593 = vector.broadcast %592 : vector<1x32xf32> to vector<8x32xf32>
    %594 = arith.addf %591, %593 : vector<8x32xf32>
    %595 = arith.addf %536, %594 : vector<8x32xf32>
    %596 = vector.extract_strided_slice %0 {offsets = [60, 0], sizes = [1, 32], strides = [1, 1]} : vector<72x128xf32> to vector<1x32xf32>
    %597 = vector.extract_strided_slice %0 {offsets = [61, 0], sizes = [1, 32], strides = [1, 1]} : vector<72x128xf32> to vector<1x32xf32>
    %cst_170 = arith.constant dense<0.000000e+00> : vector<8xf32>
    %598 = vector.multi_reduction <add>, %595, %cst_170 [1] : vector<8x32xf32> to vector<8xf32>
    %599 = vector.shape_cast %598 : vector<8xf32> to vector<8x1xf32>
    %cst_171 = arith.constant 3.200000e+01 : f32
    %600 = vector.broadcast %cst_171 : f32 to vector<8x1xf32>
    %601 = arith.divf %599, %600 : vector<8x1xf32>
    %602 = vector.broadcast %601 : vector<8x1xf32> to vector<8x32xf32>
    %603 = arith.subf %595, %602 : vector<8x32xf32>
    %604 = arith.mulf %603, %603 : vector<8x32xf32>
    %cst_172 = arith.constant dense<0.000000e+00> : vector<8xf32>
    %605 = vector.multi_reduction <add>, %604, %cst_172 [1] : vector<8x32xf32> to vector<8xf32>
    %606 = vector.shape_cast %605 : vector<8xf32> to vector<8x1xf32>
    %cst_173 = arith.constant 3.200000e+01 : f32
    %607 = vector.broadcast %cst_173 : f32 to vector<8x1xf32>
    %608 = arith.divf %606, %607 : vector<8x1xf32>
    %cst_174 = arith.constant 9.99999974E-6 : f32
    %609 = vector.broadcast %cst_174 : f32 to vector<8x1xf32>
    %610 = arith.addf %608, %609 : vector<8x1xf32>
    %611 = math.rsqrt %610 : vector<8x1xf32>
    %612 = vector.broadcast %611 : vector<8x1xf32> to vector<8x32xf32>
    %613 = arith.mulf %603, %612 : vector<8x32xf32>
    %614 = vector.broadcast %596 : vector<1x32xf32> to vector<8x32xf32>
    %615 = arith.mulf %613, %614 : vector<8x32xf32>
    %616 = vector.broadcast %597 : vector<1x32xf32> to vector<8x32xf32>
    %617 = arith.addf %615, %616 : vector<8x32xf32>
    %c704 = arith.constant 704 : index
    %c0_175 = arith.constant 0 : index
    %618 = vector.load %arg3[%c704, %c0_175] : memref<800x96xf32, #tpu.memory_space<vmem>>, vector<32x64xf32>
    %cst_176 = arith.constant dense<0.000000e+00> : vector<8x64xf32>
    %619 = tpu.matmul %617, %618, %cst_176 {dimension_numbers = #tpu.dot_dimension_numbers<[1], [0], [0], [1], [0, 0, 1, 1], [], []>} : vector<8x32xf32>, vector<32x64xf32>, vector<8x64xf32> -> vector<8x64xf32>
    %620 = vector.extract_strided_slice %0 {offsets = [40, 0], sizes = [1, 64], strides = [1, 1]} : vector<72x128xf32> to vector<1x64xf32>
    %621 = vector.broadcast %620 : vector<1x64xf32> to vector<8x64xf32>
    %622 = arith.addf %619, %621 : vector<8x64xf32>
    %cst_177 = arith.constant 0.000000e+00 : f32
    %623 = vector.broadcast %cst_177 : f32 to vector<8x64xf32>
    %624 = arith.maximumf %622, %623 : vector<8x64xf32>
    %c736 = arith.constant 736 : index
    %c0_178 = arith.constant 0 : index
    %625 = vector.load %arg3[%c736, %c0_178] : memref<800x96xf32, #tpu.memory_space<vmem>>, vector<64x32xf32>
    %cst_179 = arith.constant dense<0.000000e+00> : vector<8x32xf32>
    %626 = tpu.matmul %624, %625, %cst_179 {dimension_numbers = #tpu.dot_dimension_numbers<[1], [0], [0], [1], [0, 0, 1, 1], [], []>} : vector<8x64xf32>, vector<64x32xf32>, vector<8x32xf32> -> vector<8x32xf32>
    %627 = vector.extract_strided_slice %0 {offsets = [41, 0], sizes = [1, 32], strides = [1, 1]} : vector<72x128xf32> to vector<1x32xf32>
    %628 = vector.broadcast %627 : vector<1x32xf32> to vector<8x32xf32>
    %629 = arith.addf %626, %628 : vector<8x32xf32>
    %630 = arith.addf %617, %629 : vector<8x32xf32>
    %631 = vector.extract_strided_slice %0 {offsets = [62, 0], sizes = [1, 32], strides = [1, 1]} : vector<72x128xf32> to vector<1x32xf32>
    %632 = vector.extract_strided_slice %0 {offsets = [63, 0], sizes = [1, 32], strides = [1, 1]} : vector<72x128xf32> to vector<1x32xf32>
    %cst_180 = arith.constant dense<0.000000e+00> : vector<8xf32>
    %633 = vector.multi_reduction <add>, %630, %cst_180 [1] : vector<8x32xf32> to vector<8xf32>
    %634 = vector.shape_cast %633 : vector<8xf32> to vector<8x1xf32>
    %cst_181 = arith.constant 3.200000e+01 : f32
    %635 = vector.broadcast %cst_181 : f32 to vector<8x1xf32>
    %636 = arith.divf %634, %635 : vector<8x1xf32>
    %637 = vector.broadcast %636 : vector<8x1xf32> to vector<8x32xf32>
    %638 = arith.subf %630, %637 : vector<8x32xf32>
    %639 = arith.mulf %638, %638 : vector<8x32xf32>
    %cst_182 = arith.constant dense<0.000000e+00> : vector<8xf32>
    %640 = vector.multi_reduction <add>, %639, %cst_182 [1] : vector<8x32xf32> to vector<8xf32>
    %641 = vector.shape_cast %640 : vector<8xf32> to vector<8x1xf32>
    %cst_183 = arith.constant 3.200000e+01 : f32
    %642 = vector.broadcast %cst_183 : f32 to vector<8x1xf32>
    %643 = arith.divf %641, %642 : vector<8x1xf32>
    %cst_184 = arith.constant 9.99999974E-6 : f32
    %644 = vector.broadcast %cst_184 : f32 to vector<8x1xf32>
    %645 = arith.addf %643, %644 : vector<8x1xf32>
    %646 = math.rsqrt %645 : vector<8x1xf32>
    %647 = vector.broadcast %646 : vector<8x1xf32> to vector<8x32xf32>
    %648 = arith.mulf %638, %647 : vector<8x32xf32>
    %649 = vector.broadcast %631 : vector<1x32xf32> to vector<8x32xf32>
    %650 = arith.mulf %648, %649 : vector<8x32xf32>
    %651 = vector.broadcast %632 : vector<1x32xf32> to vector<8x32xf32>
    %652 = arith.addf %650, %651 : vector<8x32xf32>
    %653 = vector.extract_strided_slice %0 {offsets = [64, 0], sizes = [1, 32], strides = [1, 1]} : vector<72x128xf32> to vector<1x32xf32>
    %654 = vector.extract_strided_slice %0 {offsets = [65, 0], sizes = [1, 32], strides = [1, 1]} : vector<72x128xf32> to vector<1x32xf32>
    %cst_185 = arith.constant dense<0.000000e+00> : vector<8xf32>
    %655 = vector.multi_reduction <add>, %652, %cst_185 [1] : vector<8x32xf32> to vector<8xf32>
    %656 = vector.shape_cast %655 : vector<8xf32> to vector<8x1xf32>
    %cst_186 = arith.constant 3.200000e+01 : f32
    %657 = vector.broadcast %cst_186 : f32 to vector<8x1xf32>
    %658 = arith.divf %656, %657 : vector<8x1xf32>
    %659 = vector.broadcast %658 : vector<8x1xf32> to vector<8x32xf32>
    %660 = arith.subf %652, %659 : vector<8x32xf32>
    %661 = arith.mulf %660, %660 : vector<8x32xf32>
    %cst_187 = arith.constant dense<0.000000e+00> : vector<8xf32>
    %662 = vector.multi_reduction <add>, %661, %cst_187 [1] : vector<8x32xf32> to vector<8xf32>
    %663 = vector.shape_cast %662 : vector<8xf32> to vector<8x1xf32>
    %cst_188 = arith.constant 3.200000e+01 : f32
    %664 = vector.broadcast %cst_188 : f32 to vector<8x1xf32>
    %665 = arith.divf %663, %664 : vector<8x1xf32>
    %cst_189 = arith.constant 9.99999974E-6 : f32
    %666 = vector.broadcast %cst_189 : f32 to vector<8x1xf32>
    %667 = arith.addf %665, %666 : vector<8x1xf32>
    %668 = math.rsqrt %667 : vector<8x1xf32>
    %669 = vector.broadcast %668 : vector<8x1xf32> to vector<8x32xf32>
    %670 = arith.mulf %660, %669 : vector<8x32xf32>
    %671 = vector.broadcast %653 : vector<1x32xf32> to vector<8x32xf32>
    %672 = arith.mulf %670, %671 : vector<8x32xf32>
    %673 = vector.broadcast %654 : vector<1x32xf32> to vector<8x32xf32>
    %674 = arith.addf %672, %673 : vector<8x32xf32>
    %c24 = arith.constant 24 : index
    %c0_190 = arith.constant 0 : index
    %675 = vector.load %arg3[%c24, %c0_190] : memref<800x96xf32, #tpu.memory_space<vmem>>, vector<4x32xf32>
    %cst_191 = arith.constant dense<0.000000e+00> : vector<4x8xf32>
    %676 = tpu.matmul %675, %674, %cst_191 {dimension_numbers = #tpu.dot_dimension_numbers<[1], [1], [0], [0], [0, 0, 1, 0], [], []>} : vector<4x32xf32>, vector<8x32xf32>, vector<4x8xf32> -> vector<4x8xf32>
    %677 = vector.extract_strided_slice %0 {offsets = [18, 0], sizes = [4, 1], strides = [1, 1]} : vector<72x128xf32> to vector<4x1xf32>
    %678 = vector.broadcast %677 : vector<4x1xf32> to vector<4x8xf32>
    %679 = arith.addf %676, %678 : vector<4x8xf32>
    %c0_192 = arith.constant 0 : index
    %c0_193 = arith.constant 0 : index
    %c0_194 = arith.constant 0 : index
    %680 = vector.load %arg5[%c0_192, %c0_193, %c0_194] : memref<1x4x8xf32, #tpu.memory_space<vmem>>, vector<1x4x8xf32>
    %681 = vector.shape_cast %680 : vector<1x4x8xf32> to vector<4x8xf32>
    %682 = vector.shape_cast %679 : vector<4x8xf32> to vector<1x4x8xf32>
    tpu.vector_store %arg5[%c0_192, %c0_193, %c0_194], %682 {strides = array<i32>} : memref<1x4x8xf32, #tpu.memory_space<vmem>>, vector<1x4x8xf32>,
    return
  }
  func.func @transform_0(%arg0: i32) -> (i32, i32, i32) {
    %c0_i32 = arith.constant 0 : i32
    %c0_i32_0 = arith.constant 0 : i32
    %c0_i32_1 = arith.constant 0 : i32
    return %arg0, %c0_i32, %c0_i32_0 : i32, i32, i32
  }
  func.func @transform_1(%arg0: i32) -> (i32, i32, i32) {
    %c0_i32 = arith.constant 0 : i32
    %c0_i32_0 = arith.constant 0 : i32
    %c0_i32_1 = arith.constant 0 : i32
    return %arg0, %c0_i32, %c0_i32_0 : i32, i32, i32
  }
  func.func @transform_2(%arg0: i32) -> (i32, i32) {
    %c0_i32 = arith.constant 0 : i32
    %c0_i32_0 = arith.constant 0 : i32
    %c0_i32_1 = arith.constant 0 : i32
    return %c0_i32, %c0_i32_0 : i32, i32
  }
  func.func @transform_3(%arg0: i32) -> (i32, i32) {
    %c0_i32 = arith.constant 0 : i32
    %c0_i32_0 = arith.constant 0 : i32
    %c0_i32_1 = arith.constant 0 : i32
    return %c0_i32, %c0_i32_0 : i32, i32
  }
  func.func @transform_4(%arg0: i32) -> (i32, i32, i32) {
    %c0_i32 = arith.constant 0 : i32
    %c0_i32_0 = arith.constant 0 : i32
    %c0_i32_1 = arith.constant 0 : i32
    return %arg0, %c0_i32, %c0_i32_0 : i32, i32, i32
  }
}

</mosaic_0001>

<bundles_post_ra>
// kernel: forward.1
= control target key start
LH: loop header
LB: loop body
LE: loop exit
PB: predicated region body
PF: predicated region fallthrough
CT: control target
= control target key end

     0   :  { %s9536_s0 = inlined_call_operand.vmem [shape: f32[2,4,8], index: 0, kind: input, shape index: {}]   ;;  %s9537_s1 = inlined_call_operand.vmem [shape: f32[2,6,16], index: 1, kind: input, shape index: {}]   ;;  %s9538_s2 = inlined_call_operand.vmem [shape: f32[800,96], index: 2, kind: input, shape index: {}]   ;;  %s9539_s3 = inlined_call_operand.vmem [shape: f32[72,128], index: 3, kind: input, shape index: {}]   ;;  %s9540_s4 = inlined_call_operand.hbm [shape: f32[2,4,8], index: 4, kind: output, shape index: {}]  }
   0x1   :  { %9573 = sst [smem:[#allocation9_spill]] %s9536_s0 }
   0x2   :  { %9574 = sst [smem:[#allocation10_spill]] %s9537_s1 }
   0x3   :  { %9 = vsyncpa [#allocation3], 0 }
   0x4   :  { %11 = vsyncpa [#allocation3 + $0x1], 0  ;;  %s8267_s15 = smov 0   ;;  %s8269_s16 = smov 0  }
   0x5   :  { %s8271_s17 = smov 0   ;;  %s8273_s18 = smov 0  }
   0x6 LB: > { %9575 = sst [smem:[#allocation5_spill]] %s8215_s17  ;;  %s8288_s19 = sadd.s32 4294967295, %s8219_s18   ;;  %s8219_s18 = sphi %s8273_s18, %s9598_s18   ;;  %s8215_s17 = sphi %s8271_s17, %s9600_s17   ;;  %s8211_s16 = sphi %s8269_s16, %s9602_s16   ;;  %s8207_s15 = sphi %s8267_s15, %s9601_s15  }
   0x7   : > { %s6905_s20 = sadd.s32 4294967294, %s8219_s18   ;;  %s8292_s21 = sadd.s32 1, %s8219_s18  }
   0x8   : > { %9576 = sst [smem:[#allocation6_spill]] %s8292_s21  ;;  %s118_s22 = sadd.s32 1, %s8215_s17 }
   0x9   : > { %s115_s23 = ssub.s32 %s8219_s18, %s8292_s21  ;;  %p128_p0 = scmp.ne.s32.totalorder %s8215_s17, %s8211_s16 }
   0xa   : > { %p116_p1 = scmp.eq.s32.totalorder %s115_s23, 0  ;;  %p129_p2 = scmp.eq.s32.totalorder %s8288_s19, 1 }
   0xb   : > { %p134_p3 = scmp.ne.s32.totalorder %s8211_s16, %s8207_s15  ;;  %p135_p4 = scmp.eq.s32.totalorder %s6905_s20, 1 }
   0xc   : > { %s8303_s24 = scalar_select %p116_p1, %s8215_s17, %s118_s22  }
   0xd   : > { %p8305_p5 = por %p129_p2, %p128_p0  ;;  %p8309_p6 = por %p135_p4, %p134_p3 }
   0xe   : > { %9577 = sst [smem:[#allocation7_spill]] %s8303_s24  ;;  %p6908_p7 = scmp.ge.s32.totalorder %s8219_s18, 1 }
   0xf   : > { %s9579_s26 = scalar_select %p8309_p6, 1, 0 }
  0x10   : > { %p173_p8 = scmp.lt.s32.totalorder %s8219_s18, 3 }
  0x11   : > { %9580 = sst [smem:[#allocation8_spill]] %s9579_s26 }
  0x12   : > { %p174_p9 = pnand %p6908_p7, %p173_p8 }
  0x13   : > { %p202_p10 = scmp.lt.s32.totalorder (!%p174_p9), %s8288_s19, 1  ;;  %v8221_v0 = vmov (!%p174_p9), 0.0   ;;  %vm8222_vm0 = vmmov (!%p174_p9), 0   ;;  %vm219_vm1 = vcmask (!%p174_p9), 130048   ;;  %v298_v1 = vld [vmem:[%s9538_s2] sm:$0xff] (!%p174_p9)  ;;  %v299_v2 = vld [vmem:[%s9538_s2 + $0x8] sm:$0xff] (!%p174_p9)  ;;  %v300_v13 = vlaneseq (!%p174_p9) }
  0x14   : > { %177 = sbr.rel (%p174_p9) target bundleno = 13878 (0x3636), region = 36  ;;  %7264 = vmatprep.subr.mxu0 (!%p174_p9), %v8221_v0  ;;  %7266 = vmatprep.mubr.msk.f32.mxu0 (!%p174_p9), %vm8222_vm0, %v8221_v0  ;;  %s9581_s1 = sld [smem:[#allocation10_spill]] (!%p174_p9)  ;;  %v7801_v4 = vpack.c.bf16 (!%p174_p9), %v299_v2, %v298_v1  ;;  %v8223_v5 = vmov (!%p174_p9), 0.0|0.0   ;;  %v8224_v6 = vmov (!%p174_p9), 1.0   ;;  %v374_v7 = vld [vmem:[%s9538_s2 + $0x20] sm:$0xff] (!%p174_p9)  ;;  %v375_v8 = vld [vmem:[%s9538_s2 + $0x28] sm:$0xff] (!%p174_p9) }
  0x15   : > { %7287 = vmatprep.subr.mxu1 (!%p174_p9), %v8221_v0  ;;  %7289 = vmatprep.mubr.msk.f32.mxu1 (!%p174_p9), %vm8222_vm0, %v8221_v0  ;;  %v7804_v9 = vpack.c.bf16 (!%p174_p9), %v375_v8, %v374_v7  ;;  %v376_v10 = vld [vmem:[%s9538_s2 + $0x30] sm:$0xff] (!%p174_p9)  ;;  %v377_v11 = vld [vmem:[%s9538_s2 + $0x38] sm:$0xff] (!%p174_p9)  ;;  %v8359_v14 = vshrl.u32 (!%p174_p9), %v300_v13, 7  ;;  %vm382_vm2 = vcmask (!%p174_p9), 261120   ;;  %s9561_s30 = smov (!%p174_p9), 80   ;;  %s9567_s5 = smov (!%p174_p9), 96  }
  0x16   : > { %v7807_v12 = vpack.c.bf16 (!%p174_p9), %v377_v11, %v376_v10  ;;  %v8367_v16 = vld [vmem:[%s9539_s3 + $0x10] sm:$0xff] (!%p174_p9)  ;;  %s9563_s6 = smov (!%p174_p9), 120   ;;  %s9565_s7 = smov (!%p174_p9), 88   ;;  %vm459_vm3 = vcmask (!%p174_p9), 64512   ;;  %vm777_vm5 = vcmask (!%p174_p9), 1045504   ;;  %vm779_vm6 = vcmask (!%p174_p9), 1043456  }
  0x17   : > { %v8362_v15 = vsub.s32 (!%p174_p9), 0, %v8359_v14  ;;  %v8378_v23 = vsub.s32 (!%p174_p9), 6, %v8359_v14  ;;  %s9559_s8 = smov (!%p174_p9), 72   ;;  %s9555_s10 = smov (!%p174_p9), 104   ;;  %vm793_vm7 = vcmask (!%p174_p9), 48128   ;;  %vm781_vm8 = vcmask (!%p174_p9), 1041408  }
  0x18   : > { %s9553_s11 = smov (!%p174_p9), 56   ;;  %s9551_s12 = smov (!%p174_p9), 64   ;;  %vm1155_vm9 = vcmask (!%p174_p9), 195584   ;;  %vm1239_vm10 = vcmask (!%p174_p9), 259072   ;;  %vm1358_vm11 = vcmask (!%p174_p9), 523264   ;;  %vm2585_vm12 = vcmask (!%p174_p9), 31744  }
  0x19   : > { %v303_v19 = vrot.slane (!%p174_p9), %v8367_v16, %v8362_v15  ;;  %v381_v24 = vrot.slane (!%p174_p9), %v8367_v16, %v8378_v23  ;;  %s9543_s13 = smov (!%p174_p9), 40   ;;  %s9541_s14 = smov (!%p174_p9), 48   ;;  %vm6818_vm14 = vcmask (!%p174_p9), 60416  }
  0x1a   : > { %s9549_s29 = smov (!%p174_p9), 8   ;;  %s9547_s23 = smov (!%p174_p9), 24  }
  0x1b   : > { %s8320_s27 = scalar_select %p202_p10, %s8288_s19, 1 }
  0x1c   : > { %s9583_s22 = smov 64   ;;  %s9586_s20 = smov 8  }
  0x1d   : > { %s6911_s28 = sshll.u32 %s8320_s27, 3  ;;  %s9589_s0 = sld [smem:[#allocation9_spill]] }
  0x1e   : > { %s209_s9 = scalar_lea.vmem %s9581_s1, %s6911_s28  ;;  %s9545_s28 = smov 16  }
  0x1f   : > { %v218_v3 = vld [vmem:[%s209_s9] sm:$0x3f]  ;;  %s9557_s9 = smov 112   ;;  %s199_s17 = sand.u32 1, %s8211_s16  }
  0x20   : > { %7265 = vmatpush3.xpose.msk.msra.mxu0 %vm219_vm1, %v218_v3  ;;  %s6909_s21 = sshll.u32 %s199_s17, 2  ;;  %s7030_s24 = sshll.u32 %s8288_s19, 6 }
  0x21   : > { %7800 = vmatprep.subr.bf16.mxu0 %v8223_v5  ;;  %s8241_s19 = smov [#allocation2]  }
  0x23   : > { %7267 = vmatmul.mubr.msk.f32.vlgmr.msra.gmra.mrb[0].mxu0 %vm219_vm1, %v8224_v6 }
  0x24   : > { %7802 = vmatpush3.bf16.msra.mxu0 %v7801_v4  ;;  %7273 = vmatprep.mubr.msk.f32.mxu0 %vm8222_vm0, %v8221_v0 }
  0x25   : > { %7803 = vmatprep.subr.bf16.mxu0 %v8223_v5 }
  0x27   : > { %7274 = vmatmul.mubr.msk.f32.vlgmr.msra.gmra.mrb[2].mxu0 %vm219_vm1, %v218_v3 }
  0x28   : > { %7284 = vmatprep.mubr.msk.f32.mxu0 %vm8222_vm0, %v8221_v0  ;;  %7805 = vmatpush3.bf16.msra.mxu0 %v7804_v9 }
  0x29   : > { %7806 = vmatprep.subr.bf16.mxu0 %v8223_v5 }
  0x2c   : > { %7808 = vmatpush3.bf16.msra.mxu0 %v7807_v12 }
  0x2d   : > { %7297 = vmatprep.subr.mxu0 %v8221_v0 }
  0xf6   : > { %v292_v17 = vpop.f32.mrb[0].mxu0 }
  0xf7   : > { %v7268_v18 = vpop.f32.mrb[1].mxu0  ;;  %vm296_vm4 = vcmp.lt.f32.partialorder %v292_v17, 0.1 }
  0xf8   : > { %v297_v38 = vsel %vm296_vm4, -1e+30, %v8221_v0 }
  0xf9   : > { %v8422_v45 = vrot.slane %v297_v38, %v8362_v15 }
  0xfa   : > { %v370_v20 = vpop.f32.mrb[2].mxu0 }
  0xfb   : > { %v8371_v21 = vadd.f32 %v370_v20, %v303_v19  ;;  %v7275_v22 = vpop.f32.mrb[3].mxu0 }
  0xfd   : > { %7285 = vmatmul.mubr.msk.f32.vlgmr.msra.gmra.mrb[4].mxu0 %vm382_vm2, %v8371_v21 }
  0xfe   : > { %7299 = vmatprep.mubr.msk.f32.mxu0 %vm8222_vm0, %v8221_v0 }
 0x1d0   : > { %v452_v25 = vpop.f32.mrb[4].mxu0 }
 0x1d1   : > { %v8382_v26 = vadd.f32 %v452_v25, %v381_v24  ;;  %v7286_v27 = vpop.f32.mrb[5].mxu0 }
 0x1d3   : > { %614 = vrot.lane.b32.xlu1 %v8382_v26, %s9561_s30  ;;  %457 = vrot.lane.b32.xlu0 %v8382_v26, %s9567_s5 }
 0x1d7   : > { %534 = vrot.lane.b32.xlu1 %v8382_v26, %s9563_s6  ;;  %536 = vrot.lane.b32.xlu0 %v8382_v26, %s9565_s7 }
 0x1db   : > { %692 = vrot.lane.b32.xlu1 %v8382_v26, %s9559_s8  ;;  %612 = vrot.lane.b32.xlu0 %v8382_v26, %s9557_s9 }
 0x1df   : > { %690 = vrot.lane.b32.xlu0 %v8382_v26, %s9555_s10 }
 0x245   : > { %v615_v28 = vpop.permute.xlu1 %614  ;;  %v458_v29 = vpop.permute.xlu0 %457 }
 0x246   : > { %7288 = vmatpush3.xpose.msk.msra.mxu1 %vm459_vm3, %v458_v29  ;;  %7298 = vmatpush3.xpose.msk.msra.mxu0 %vm459_vm3, %v615_v28 }
 0x247   : > { %7292 = vmatprep.subr.mxu1 %v8221_v0  ;;  %7307 = vmatprep.subr.mxu0 %v8221_v0 }
 0x249   : > { %v535_v30 = vpop.permute.xlu1 %534  ;;  %7290 = vmatmul.mubr.msk.f32.vlgmr.msra.gmra.mrb[0].mxu1 %vm459_vm3, %v8382_v26  ;;  %v537_v31 = vpop.permute.xlu0 %536 }
 0x24a   : > { %7293 = vmatpush3.xpose.msk.msra.mxu1 %vm459_vm3, %v537_v31  ;;  %7294 = vmatprep.mubr.msk.f32.mxu1 %vm8222_vm0, %v8221_v0 }
 0x24b   : > { %7302 = vmatprep.subr.mxu1 %v8221_v0 }
 0x24d   : > { %v693_v32 = vpop.permute.xlu1 %692  ;;  %7295 = vmatmul.mubr.msk.f32.vlgmr.msra.gmra.mrb[2].mxu1 %vm459_vm3, %v535_v30  ;;  %v613_v33 = vpop.permute.xlu0 %612 }
 0x24e   : > { %7300 = vmatmul.mubr.msk.f32.vlgmr.msra.gmra.mrb[6].mxu0 %vm459_vm3, %v613_v33  ;;  %7303 = vmatpush3.xpose.msk.msra.mxu1 %vm459_vm3, %v693_v32 }
 0x24f   : > { %7304 = vmatprep.mubr.msk.f32.mxu1 %vm8222_vm0, %v8221_v0  ;;  %7312 = vmatprep.subr.mxu1 %v8221_v0 }
 0x250   : > { %7309 = vmatprep.mubr.msk.f32.mxu0 %vm8222_vm0, %v8221_v0 }
 0x251   : > { %v691_v34 = vpop.permute.xlu0 %690 }
 0x252   : > { %7305 = vmatmul.mubr.msk.f32.vlgmr.msra.gmra.mrb[4].mxu1 %vm459_vm3, %v691_v34 }
 0x253   : > { %7314 = vmatprep.mubr.msk.f32.mxu1 %vm8222_vm0, %v8221_v0 }
 0x31c   : > { %v530_v35 = vpop.f32.mrb[0].mxu1 }
 0x31d   : > { %v7291_v36 = vpop.f32.mrb[1].mxu1 }
 0x320   : > { %v608_v37 = vpop.f32.mrb[2].mxu1 }
 0x321   : > { %v769_v39 = vrot.slane %v608_v37, 2  ;;  %v7296_v40 = vpop.f32.mrb[3].mxu1  ;;  %v686_v41 = vpop.f32.mrb[6].mxu0 }
 0x322   : > { %v772_v42 = vrot.slane %v686_v41, 4  ;;  %v7301_v43 = vpop.f32.mrb[7].mxu0  ;;  %v1158_v40 = vld [vmem:[%s9538_s2 + $0x48] sm:$0xff] }
 0x323   : > { %v778_v44 = vsel %vm777_vm5, %v530_v35, %v769_v39 }
 0x324   : > { %v783_v46 = vmul.f32 0.35355338, %v778_v44  ;;  %v780_v47 = vsel %vm779_vm6, %v769_v39, %v772_v42  ;;  %v1157_v39 = vld [vmem:[%s9538_s2 + $0x40] sm:$0xff] }
 0x325   : > { %v764_v48 = vpop.f32.mrb[4].mxu1  ;;  %v784_v49 = vmul.f32 0.35355338, %v780_v47  ;;  %v7810_v41 = vpack.c.bf16 %v1158_v40, %v1157_v39  ;;  %v1159_v47 = vld [vmem:[%s9538_s2 + $0x50] sm:$0xff] }
 0x326   : > { %v775_v50 = vrot.slane %v764_v48, 6  ;;  %v7306_v51 = vpop.f32.mrb[5].mxu1  ;;  %v790_v52 = vadd.f32 %v8422_v45, %v783_v46  ;;  %v1160_v48 = vld [vmem:[%s9538_s2 + $0x58] sm:$0xff] }
 0x327   : > { %v791_v53 = vadd.f32 %v8422_v45, %v784_v49  ;;  %v7813_v49 = vpack.c.bf16 %v1160_v48, %v1159_v47 }
 0x328   : > { %v794_v54 = vsel %vm793_vm7, %v790_v52, -inf  ;;  %v782_v55 = vsel %vm781_vm8, %v772_v42, %v775_v50 }
 0x329   : > { %795 = vmax.xlane.f32.xlu1 %v794_v54  ;;  %v797_v56 = vsel %vm793_vm7, %v791_v53, -inf  ;;  %v785_v57 = vmul.f32 0.35355338, %v782_v55 }
 0x32a   : > { %798 = vmax.xlane.f32.xlu0 %v797_v56 }
 0x32b   : > { %v792_v58 = vadd.f32 %v8422_v45, %v785_v57 }
 0x32d   : > { %v800_v59 = vsel %vm793_vm7, %v792_v58, -inf }
 0x32e   : > { %801 = vmax.xlane.f32.xlu0 %v800_v59 }
 0x3b6   : > { %v796_v60 = vpop.xlane.xlu1 %795 }
 0x3b7   : > { %v803_v61 = vsub.f32 %v790_v52, %v796_v60  ;;  %v799_v62 = vpop.xlane.xlu0 %798  ;;  %v8489_v60 = vsub.s32 7, %v8359_v14 }
 0x3b8   : > { %v804_v63 = vsub.f32 %v791_v53, %v799_v62 }
 0x3b9   : > { %v806_v1 = vmul.f32 1.442695, %v803_v61  ;;  %v1164_v61 = vrot.slane %v8367_v16, %v8489_v60  ;;  %v1264_v16 = vld [vmem:[%s9538_s2 + $0x1a0] sm:$0xff] }
 0x3ba   : > { %v808_v2 = vmul.f32 1.442695, %v804_v63 }
 0x3bb   : > { %8040 = vpow2.f32 %v806_v1  ;;  %v802_v8 = vpop.xlane.xlu0 %801 }
 0x3bc   : > { %8042 = vpow2.f32 %v808_v2  ;;  %v805_v9 = vsub.f32 %v792_v58, %v802_v8 }
 0x3be   : > { %v810_v10 = vmul.f32 1.442695, %v805_v9 }
 0x3c0   : > { %8044 = vpow2.f32 %v810_v10  ;;  %v1265_v10 = vld [vmem:[%s9538_s2 + $0x1a8] sm:$0xff] }
 0x3c5   : > { %v8041_v3 = vpop.eup %8040 }
 0x3c6   : > { %v8043_v4 = vpop.eup %8042  ;;  %v812_v6 = vsel %vm793_vm7, %v8041_v3, 0.0 }
 0x3c7   : > { %813 = vadd.xlane.f32.xlu1 %v812_v6  ;;  %v815_v7 = vsel %vm793_vm7, %v8043_v4, 0.0 }
 0x3c8   : > { %816 = vadd.xlane.f32.xlu0 %v815_v7 }
 0x3ca   : > { %v8045_v11 = vpop.eup %8044 }
 0x3cb   : > { %v818_v12 = vsel %vm793_vm7, %v8045_v11, 0.0 }
 0x3d8   : > { %908 = vrot.lane.b32.xlu1 %v8382_v26, %s9553_s11  ;;  %s9582_s11 = smov 56  }
 0x3de   : > { %827 = vrot.lane.b32.xlu0 %v8382_v26, %s9551_s12 }
 0x3e2   : > { %1065 = vrot.lane.b32.xlu0 %v8382_v26, %s9543_s13  ;;  %s9587_s13 = smov 24  }
 0x3fc   : > { %819 = vadd.xlane.f32.xlu1 %v818_v12  ;;  %v1267_v12 = vld [vmem:[%s9538_s2 + $0x1b8] sm:$0xff] }
 0x40d   : > { %988 = vrot.lane.b32.xlu1 %v8382_v26, %s9541_s14  ;;  %s9588_s14 = smov 16  }
 0x454   : > { %v814_v17 = vpop.xlane.xlu1 %813 }
 0x455   : > { %8046 = vrcp.f32 %v814_v17  ;;  %v817_v18 = vpop.xlane.xlu0 %816 }
 0x456   : > { %8048 = vrcp.f32 %v817_v18  ;;  %v1346_v18 = vld [vmem:[%s9538_s2 + $0x1c0] sm:$0xff] }
 0x458   : > { %v909_v19 = vpop.permute.xlu1 %908 }
 0x459   : > { %7313 = vmatpush3.msk.msra.mxu1 %vm777_vm5, %v909_v19  ;;  %v828_v20 = vpop.permute.xlu0 %827  ;;  %v1347_v19 = vld [vmem:[%s9538_s2 + $0x1c8] sm:$0xff] }
 0x45a   : > { %7308 = vmatpush3.msk.msra.mxu0 %vm777_vm5, %v828_v20  ;;  %7322 = vmatprep.subr.mxu1 %v8221_v0  ;;  %v1348_v20 = vld [vmem:[%s9538_s2 + $0x1d0] sm:$0xff] }
 0x45b   : > { %7317 = vmatprep.subr.mxu0 %v8221_v0 }
 0x45d   : > { %v1066_v30 = vpop.permute.xlu0 %1065 }
 0x45f   : > { %v8047_v22 = vpop.eup %8046 }
 0x460   : > { %v8049_v24 = vpop.eup %8048  ;;  %v822_v25 = vmul.f32 %v8047_v22, %v8041_v3  ;;  %v7822_v22 = vpack.c.bf16 %v1347_v19, %v1346_v18 }
 0x461   : > { %v824_v27 = vmul.f32 %v8049_v24, %v8043_v4  ;;  %v1349_v24 = vld [vmem:[%s9538_s2 + $0x1d8] sm:$0xff] }
 0x462   : > { %7310 = vmatmul.mubr.msk.f32.vlgmr.msra.gmra.mrb[8].mxu0 %vm793_vm7, %v822_v25  ;;  %v905_v26 = vrot.slane %v822_v25, 6  ;;  %v7825_v25 = vpack.c.bf16 %v1349_v24, %v1348_v20  ;;  %v8603_v20 = vld [vmem:[%s9539_s3 + $0x18] sm:$0xff] }
 0x463   : > { %v906_v28 = vrot.slane %v824_v27, 6  ;;  %7319 = vmatprep.mubr.msk.f32.mxu0 %vm8222_vm0, %v8221_v0  ;;  %v985_v36 = vrot.slane %v824_v27, 4  ;;  %v1350_v27 = vld [vmem:[%s9538_s2 + $0x1e0] sm:$0xff] }
 0x465   : > { %v907_v29 = vsel %vm781_vm8, %v905_v26, %v906_v28  ;;  %v1351_v26 = vld [vmem:[%s9538_s2 + $0x1e8] sm:$0xff] }
 0x466   : > { %7315 = vmatmul.mubr.msk.f32.vlgmr.msra.gmra.mrb[6].mxu1 %vm793_vm7, %v907_v29  ;;  %v7828_v28 = vpack.c.bf16 %v1351_v26, %v1350_v27 }
 0x467   : > { %7323 = vmatpush3.msk.msra.mxu1 %vm777_vm5, %v1066_v30  ;;  %7324 = vmatprep.mubr.msk.f32.mxu1 %vm8222_vm0, %v8221_v0 }
 0x468   : > { %7815 = vmatprep.subr.bf16.mxu1 %v8223_v5 }
 0x489   : > { %v820_v31 = vpop.xlane.xlu1 %819 }
 0x48a   : > { %8050 = vrcp.f32 %v820_v31 }
 0x48d   : > { %v989_v32 = vpop.permute.xlu1 %988 }
 0x48e   : > { %7318 = vmatpush3.msk.msra.mxu0 %vm777_vm5, %v989_v32  ;;  %v8532_v32 = vsub.s32 2, %v8359_v14 }
 0x48f   : > { %7809 = vmatprep.subr.bf16.mxu0 %v8223_v5 }
 0x494   : > { %v8051_v33 = vpop.eup %8050 }
 0x495   : > { %v826_v34 = vmul.f32 %v8051_v33, %v8045_v11  ;;  %v7816_v11 = vpack.c.bf16 %v1265_v10, %v1264_v16  ;;  %v8537_v33 = vld [vmem:[%s9539_s3 + $0x28] sm:$0xff]  ;;  %v8585_v16 = vsub.s32 4, %v8359_v14  ;;  %v8588_v10 = vsub.s32 5, %v8359_v14 }
 0x497   : > { %v1064_v35 = vrot.slane %v826_v34, 2  ;;  %v986_v37 = vrot.slane %v826_v34, 4  ;;  %v8540_v34 = vsub.s32 3, %v8359_v14 }
 0x499   : > { %7325 = vmatmul.mubr.msk.f32.vlgmr.msra.gmra.mrb[8].mxu1 %vm793_vm7, %v1064_v35  ;;  %v987_v38 = vsel %vm779_vm6, %v985_v36, %v986_v37  ;;  %v1257_v35 = vrot.slane %v8537_v33, %v8532_v32 }
 0x49a   : > { %7320 = vmatmul.mubr.msk.f32.vlgmr.msra.gmra.mrb[10].mxu0 %vm793_vm7, %v987_v38  ;;  %7346 = vmatprep.mubr.msk.f32.mxu1 %vm8222_vm0, %v8221_v0  ;;  %v1262_v38 = vrot.slane %v8537_v33, %v8540_v34 }
 0x49b   : > { %7335 = vmatprep.mubr.msk.f32.mxu0 %vm8222_vm0, %v8221_v0  ;;  %7811 = vmatpush3.bf16.msra.mxu0 %v7810_v41  ;;  %v1352_v41 = vld [vmem:[%s9538_s2 + $0x1f0] sm:$0xff] }
 0x49c   : > { %7812 = vmatprep.subr.bf16.mxu0 %v8223_v5  ;;  %7817 = vmatpush3.bf16.msra.mxu1 %v7816_v11  ;;  %v1449_v11 = vrot.slane %v8537_v33, %v8585_v16 }
 0x49d   : > { %7818 = vmatprep.subr.bf16.mxu1 %v8223_v5 }
 0x49f   : > { %7814 = vmatpush3.bf16.msra.mxu0 %v7813_v49 }
 0x4a0   : > { %7821 = vmatprep.subr.bf16.mxu0 %v8223_v5 }
 0x535   : > { %v900_v42 = vpop.f32.mrb[8].mxu0 }
 0x536   : > { %v7311_v43 = vpop.f32.mrb[9].mxu0 }
 0x539   : > { %v980_v44 = vpop.f32.mrb[6].mxu1 }
 0x53a   : > { %1142 = vrot.lane.b32.xlu1 %v980_v44, %s9549_s29  ;;  %v7316_v46 = vpop.f32.mrb[7].mxu1  ;;  %v8559_v44 = vld [vmem:[%s9539_s3 + $0x20] sm:$0xff] }
 0x53b   : > { %v1271_v46 = vrot.slane %v8559_v44, %v8532_v32 }
 0x56c   : > { %v1137_v50 = vpop.f32.mrb[8].mxu1 }
 0x56d   : > { %1150 = vrot.lane.b32.xlu1 %v1137_v50, %s9547_s23  ;;  %v1060_v51 = vpop.f32.mrb[10].mxu0  ;;  %v7326_v52 = vpop.f32.mrb[9].mxu1  ;;  %s9584_s23 = smov 40  }
 0x56e   : > { %1146 = vrot.lane.b32.xlu0 %v1060_v51, %s9545_s28  ;;  %v7321_v53 = vpop.f32.mrb[11].mxu0  ;;  %v1357_v51 = vrot.slane %v8559_v44, %v8540_v34  ;;  %s9585_s28 = smov 48  }
 0x5ac   : > { %v1143_v54 = vpop.permute.xlu1 %1142 }
 0x5ad   : > { %v1153_v55 = vsel %vm459_vm3, %v900_v42, %v1143_v54  ;;  %v1353_v42 = vld [vmem:[%s9538_s2 + $0x1f8] sm:$0xff] }
 0x5ae   : > { %v7831_v43 = vpack.c.bf16 %v1353_v42, %v1352_v41 }
 0x5df   : > { %v1151_v57 = vpop.permute.xlu1 %1150 }
 0x5e0   : > { %v1147_v56 = vpop.permute.xlu0 %1146 }
 0x5e1   : > { %v1154_v58 = vsel %vm219_vm1, %v1153_v55, %v1147_v56 }
 0x5e2   : > { %v1156_v59 = vsel %vm1155_vm9, %v1154_v58, %v1151_v57 }
 0x5e3   : > { %7336 = vmatmul.mubr.msk.f32.vlgmr.msra.gmra.mrb[12].mxu0 %vm382_vm2, %v1156_v59 }
 0x5e4   : > { %7365 = vmatprep.mubr.msk.f32.mxu0 %vm8222_vm0, %v8221_v0  ;;  %7823 = vmatpush3.bf16.msra.mxu0 %v7822_v22  ;;  %v1463_v22 = vrot.slane %v8603_v20, %v8362_v15 }
 0x5e5   : > { %7824 = vmatprep.subr.bf16.mxu0 %v8223_v5 }
 0x5e8   : > { %7826 = vmatpush3.bf16.msra.mxu0 %v7825_v25 }
 0x5e9   : > { %7827 = vmatprep.subr.bf16.mxu0 %v8223_v5 }
 0x5ec   : > { %7829 = vmatpush3.bf16.msra.mxu0 %v7828_v28 }
 0x5ed   : > { %7830 = vmatprep.subr.bf16.mxu0 %v8223_v5 }
 0x5f0   : > { %7832 = vmatpush3.bf16.msra.mxu0 %v7831_v43 }
 0x5f1   : > { %7389 = vmatprep.subr.mxu0 %v8221_v0 }
 0x6b6   : > { %v1234_v62 = vpop.f32.mrb[12].mxu0 }
 0x6b7   : > { %v1235_v63 = vadd.f32 %v1234_v62, %v1164_v61  ;;  %v7337_v1 = vpop.f32.mrb[13].mxu0 }
 0x6b8   : > { %v1457_v1 = vld [vmem:[%s9538_s2 + $0x68] sm:$0xff] }
 0x6b9   : > { %v1238_v2 = vadd.f32 %v1235_v63, %v8371_v21  ;;  %v1266_v21 = vld [vmem:[%s9538_s2 + $0x1b0] sm:$0xff]  ;;  %v1456_v63 = vld [vmem:[%s9538_s2 + $0x60] sm:$0xff] }
 0x6ba   : > { %v7819_v17 = vpack.c.bf16 %v1267_v12, %v1266_v21 }
 0x6bb   : > { %v1240_v3 = vsel %vm1239_vm10, %v1238_v2, 0.0 }
 0x6bc   : > { %1241 = vadd.xlane.f32.xlu0 %v1240_v3  ;;  %7820 = vmatpush3.bf16.msra.mxu1 %v7819_v17  ;;  %v1458_v3 = vld [vmem:[%s9538_s2 + $0x70] sm:$0xff]  ;;  %v1454_v17 = vrot.slane %v8537_v33, %v8588_v10 }
 0x6bd   : > { %7833 = vmatprep.subr.bf16.mxu1 %v8223_v5 }
 0x749   : > { %v1242_v4 = vpop.xlane.xlu0 %1241 }
 0x74a   : > { %v1244_v6 = vmul.f32 0.03125, %v1242_v4  ;;  %v1459_v4 = vld [vmem:[%s9538_s2 + $0x78] sm:$0xff] }
 0x74c   : > { %v1245_v7 = vsub.f32 %v1238_v2, %v1244_v6  ;;  %v7834_v2 = vpack.c.bf16 %v1457_v1, %v1456_v63  ;;  %v7837_v6 = vpack.c.bf16 %v1459_v4, %v1458_v3 }
 0x74e   : > { %v1246_v8 = vmul.f32 %v1245_v7, %v1245_v7 }
 0x750   : > { %v1247_v9 = vsel %vm1239_vm10, %v1246_v8, 0.0 }
 0x751   : > { %1248 = vadd.xlane.f32.xlu1 %v1247_v9 }
 0x7de   : > { %v1249_v29 = vpop.xlane.xlu1 %1248 }
 0x7df   : > { %v1250_v30 = vmul.f32 0.03125, %v1249_v29 }
 0x7e1   : > { %v1251_v31 = vadd.f32 1e-05, %v1250_v30 }
 0x7e3   : > { %8052 = vrsqrt.f32 %v1251_v31 }
 0x7ed   : > { %v8053_v36 = vpop.eup %8052 }
 0x7ee   : > { %v1253_v37 = vmul.f32 %v8053_v36, %v1245_v7 }
 0x7f0   : > { %v1258_v39 = vmul.f32 %v1257_v35, %v1253_v37 }
 0x7f2   : > { %v1263_v40 = vadd.f32 %v1262_v38, %v1258_v39 }
 0x7f4   : > { %7347 = vmatmul.mubr.msk.f32.vlgmr.msra.gmra.mrb[10].mxu1 %vm382_vm2, %v1263_v40 }
 0x7f5   : > { %7376 = vmatprep.mubr.msk.f32.mxu1 %vm8222_vm0, %v8221_v0  ;;  %7835 = vmatpush3.bf16.msra.mxu1 %v7834_v2 }
 0x7f6   : > { %7836 = vmatprep.subr.bf16.mxu1 %v8223_v5 }
 0x7f9   : > { %7838 = vmatpush3.bf16.msra.mxu1 %v7837_v6 }
 0x7fa   : > { %7379 = vmatprep.subr.mxu1 %v8221_v0 }
 0x8c7   : > { %v1341_v47 = vpop.f32.mrb[10].mxu1 }
 0x8c8   : > { %v1342_v48 = vadd.f32 %v1341_v47, %v1271_v46  ;;  %v7348_v49 = vpop.f32.mrb[11].mxu1 }
 0x8ca   : > { %v1345_v50 = vmax.f32 %v1342_v48, 0.0 }
 0x8cc   : > { %7366 = vmatmul.mubr.msk.f32.vlgmr.msra.gmra.mrb[14].mxu0 %vm1358_vm11, %v1345_v50 }
 0x8cd   : > { %7391 = vmatprep.mubr.msk.f32.mxu0 %vm8222_vm0, %v8221_v0 }
 0x99f   : > { %v1428_v52 = vpop.f32.mrb[14].mxu0 }
 0x9a0   : > { %v1429_v53 = vadd.f32 %v1428_v52, %v1357_v51  ;;  %v7367_v54 = vpop.f32.mrb[15].mxu0 }
 0x9a2   : > { %v1432_v55 = vadd.f32 %v1429_v53, %v1263_v40 }
 0x9a4   : > { %v1433_v56 = vsel %vm1239_vm10, %v1432_v55, 0.0 }
 0x9a5   : > { %1434 = vadd.xlane.f32.xlu0 %v1433_v56 }
 0xa32   : > { %v1435_v57 = vpop.xlane.xlu0 %1434 }
 0xa33   : > { %v1436_v58 = vmul.f32 0.03125, %v1435_v57 }
 0xa35   : > { %v1437_v59 = vsub.f32 %v1432_v55, %v1436_v58 }
 0xa37   : > { %v1438_v61 = vmul.f32 %v1437_v59, %v1437_v59 }
 0xa39   : > { %v1439_v62 = vsel %vm1239_vm10, %v1438_v61, 0.0 }
 0xa3a   : > { %1440 = vadd.xlane.f32.xlu0 %v1439_v62 }
 0xac7   : > { %v1441_v7 = vpop.xlane.xlu0 %1440 }
 0xac8   : > { %v1442_v8 = vmul.f32 0.03125, %v1441_v7 }
 0xaca   : > { %v1443_v9 = vadd.f32 1e-05, %v1442_v8 }
 0xacc   : > { %8054 = vrsqrt.f32 %v1443_v9 }
 0xad6   : > { %v8055_v21 = vpop.eup %8054 }
 0xad7   : > { %v1445_v12 = vmul.f32 %v8055_v21, %v1437_v59 }
 0xad9   : > { %v1450_v18 = vmul.f32 %v1449_v11, %v1445_v12 }
 0xadb   : > { %v8594_v19 = vadd.f32 %v1454_v17, %v1450_v18 }
 0xadd   : > { %7377 = vmatmul.mubr.msk.f32.vlgmr.msra.gmra.mrb[12].mxu1 %vm382_vm2, %v8594_v19 }
 0xade   : > { %7381 = vmatprep.mubr.msk.f32.mxu1 %vm8222_vm0, %v8221_v0 }
 0xbb0   : > { %v1533_v24 = vpop.f32.mrb[12].mxu1 }
 0xbb1   : > { %v8607_v25 = vadd.f32 %v1533_v24, %v1463_v22  ;;  %v7378_v27 = vpop.f32.mrb[13].mxu1 }
 0xbb3   : > { %1616 = vrot.lane.b32.xlu0 %v8607_v25, %s9565_s7  ;;  %1538 = vrot.lane.b32.xlu1 %v8607_v25, %s9567_s5  ;;  %s9592_s7 = smov 120   ;;  %s9596_s5 = smov 104  }
 0xbb7   : > { %1692 = vrot.lane.b32.xlu0 %v8607_v25, %s9557_s9  ;;  %1694 = vrot.lane.b32.xlu1 %v8607_v25, %s9561_s30  ;;  %s6910_s9 = sshll.u32 %s8320_s27, 2  ;;  %s9594_s27 = smov 72  }
 0xbb8   : > { %s205_s29 = scalar_lea.vmem %s9589_s0, %s6910_s9  ;;  %s9595_s9 = smov 112  }
 0xbbb   : > { %1770 = vrot.lane.b32.xlu0 %v8607_v25, %s9555_s10  ;;  %1614 = vrot.lane.b32.xlu1 %v8607_v25, %s9563_s6  ;;  %s9591_s6 = smov 88  }
 0xbbf   : > { %1772 = vrot.lane.b32.xlu1 %v8607_v25, %s9559_s8  ;;  %s9590_s8 = smov 96  }
 0xc25   : > { %v1539_v26 = vpop.permute.xlu1 %1538  ;;  %v1617_v28 = vpop.permute.xlu0 %1616 }
 0xc26   : > { %7380 = vmatpush3.xpose.msk.msra.mxu1 %vm459_vm3, %v1539_v26 }
 0xc27   : > { %7384 = vmatprep.subr.mxu1 %v8221_v0 }
 0xc29   : > { %7382 = vmatmul.mubr.msk.f32.vlgmr.msra.gmra.mrb[14].mxu1 %vm459_vm3, %v8607_v25  ;;  %v1695_v29 = vpop.permute.xlu1 %1694  ;;  %v1693_v30 = vpop.permute.xlu0 %1692 }
 0xc2a   : > { %7385 = vmatpush3.xpose.msk.msra.mxu1 %vm459_vm3, %v1617_v28  ;;  %7390 = vmatpush3.xpose.msk.msra.mxu0 %vm459_vm3, %v1695_v29 }
 0xc2b   : > { %7386 = vmatprep.mubr.msk.f32.mxu1 %vm8222_vm0, %v8221_v0  ;;  %7394 = vmatprep.subr.mxu1 %v8221_v0 }
 0xc2c   : > { %7399 = vmatprep.subr.mxu0 %v8221_v0 }
 0xc2d   : > { %7392 = vmatmul.mubr.msk.f32.vlgmr.msra.gmra.mrb[16].mxu0 %vm459_vm3, %v1693_v30  ;;  %v1615_v31 = vpop.permute.xlu1 %1614  ;;  %v1771_v36 = vpop.permute.xlu0 %1770 }
 0xc2e   : > { %7387 = vmatmul.mubr.msk.f32.vlgmr.msra.gmra.mrb[16].mxu1 %vm459_vm3, %v1615_v31  ;;  %7401 = vmatprep.mubr.msk.f32.mxu0 %vm8222_vm0, %v8221_v0 }
 0xc2f   : > { %7396 = vmatprep.mubr.msk.f32.mxu1 %vm8222_vm0, %v8221_v0 }
 0xc31   : > { %v1773_v35 = vpop.permute.xlu1 %1772 }
 0xc32   : > { %7395 = vmatpush3.xpose.msk.msra.mxu1 %vm459_vm3, %v1773_v35 }
 0xc33   : > { %7404 = vmatprep.subr.mxu1 %v8221_v0 }
 0xc35   : > { %7397 = vmatmul.mubr.msk.f32.vlgmr.msra.gmra.mrb[18].mxu1 %vm459_vm3, %v1771_v36 }
 0xc36   : > { %7406 = vmatprep.mubr.msk.f32.mxu1 %vm8222_vm0, %v8221_v0 }
 0xcfc   : > { %v1610_v37 = vpop.f32.mrb[14].mxu1 }
 0xcfd   : > { %v7383_v38 = vpop.f32.mrb[15].mxu1 }
 0xd00   : > { %v1766_v39 = vpop.f32.mrb[16].mxu0 }
 0xd01   : > { %v1852_v40 = vrot.slane %v1766_v39, 4  ;;  %v1688_v41 = vpop.f32.mrb[16].mxu1  ;;  %v7393_v42 = vpop.f32.mrb[17].mxu0 }
 0xd02   : > { %v1849_v43 = vrot.slane %v1688_v41, 2  ;;  %v7388_v46 = vpop.f32.mrb[17].mxu1 }
 0xd04   : > { %v1857_v47 = vsel %vm777_vm5, %v1610_v37, %v1849_v43  ;;  %v1858_v48 = vsel %vm779_vm6, %v1849_v43, %v1852_v40 }
 0xd05   : > { %v1860_v49 = vmul.f32 0.35355338, %v1857_v47  ;;  %v1861_v50 = vmul.f32 0.35355338, %v1858_v48 }
 0xd07   : > { %v1863_v51 = vadd.f32 %v1860_v49, %v8422_v45  ;;  %v1864_v52 = vadd.f32 %v1861_v50, %v8422_v45  ;;  %v2228_v49 = vld [vmem:[%s9538_s2 + $0x80] sm:$0xff]  ;;  %v2229_v50 = vld [vmem:[%s9538_s2 + $0x88] sm:$0xff] }
 0xd08   : > { %v1844_v53 = vpop.f32.mrb[18].mxu1 }
 0xd09   : > { %v1855_v54 = vrot.slane %v1844_v53, 6  ;;  %v7398_v55 = vpop.f32.mrb[19].mxu1  ;;  %v1866_v56 = vsel %vm793_vm7, %v1863_v51, -inf  ;;  %v1869_v57 = vsel %vm793_vm7, %v1864_v52, -inf }
 0xd0a   : > { %1867 = vmax.xlane.f32.xlu1 %v1866_v56  ;;  %1870 = vmax.xlane.f32.xlu0 %v1869_v57  ;;  %v2230_v56 = vld [vmem:[%s9538_s2 + $0x90] sm:$0xff]  ;;  %v2231_v57 = vld [vmem:[%s9538_s2 + $0x98] sm:$0xff] }
 0xd0b   : > { %v1859_v58 = vsel %vm781_vm8, %v1852_v40, %v1855_v54 }
 0xd0c   : > { %v1862_v59 = vmul.f32 0.35355338, %v1859_v58  ;;  %v7843_v58 = vpack.c.bf16 %v2231_v57, %v2230_v56  ;;  %v2548_v57 = vld [vmem:[%s9538_s2 + $0x10] sm:$0xf] }
 0xd0e   : > { %v1865_v61 = vadd.f32 %v1862_v59, %v8422_v45 }
 0xd10   : > { %v1872_v62 = vsel %vm793_vm7, %v1865_v61, -inf }
 0xd11   : > { %1873 = vmax.xlane.f32.xlu0 %v1872_v62 }
 0xd97   : > { %v1868_v63 = vpop.xlane.xlu1 %1867  ;;  %v1871_v1 = vpop.xlane.xlu0 %1870 }
 0xd98   : > { %v1875_v2 = vsub.f32 %v1863_v51, %v1868_v63  ;;  %v1876_v3 = vsub.f32 %v1864_v52, %v1871_v1  ;;  %v7840_v51 = vpack.c.bf16 %v2229_v50, %v2228_v49 }
 0xd9a   : > { %v1878_v4 = vmul.f32 1.442695, %v1875_v2  ;;  %v1880_v6 = vmul.f32 1.442695, %v1876_v3 }
 0xd9c   : > { %8056 = vpow2.f32 %v1878_v4 }
 0xd9d   : > { %8058 = vpow2.f32 %v1880_v6 }
 0xd9e   : > { %v1874_v21 = vpop.xlane.xlu0 %1873 }
 0xd9f   : > { %v1877_v12 = vsub.f32 %v1865_v61, %v1874_v21 }
 0xda1   : > { %v1882_v17 = vmul.f32 1.442695, %v1877_v12 }
 0xda3   : > { %8060 = vpow2.f32 %v1882_v17 }
 0xda6   : > { %v8057_v7 = vpop.eup %8056 }
 0xda7   : > { %v8059_v8 = vpop.eup %8058  ;;  %v1884_v9 = vsel %vm793_vm7, %v8057_v7, 0.0 }
 0xda8   : > { %1885 = vadd.xlane.f32.xlu1 %v1884_v9  ;;  %v1887_v11 = vsel %vm793_vm7, %v8059_v8, 0.0 }
 0xda9   : > { %1888 = vadd.xlane.f32.xlu0 %v1887_v11 }
 0xdad   : > { %v8061_v18 = vpop.eup %8060 }
 0xdae   : > { %v1890_v22 = vsel %vm793_vm7, %v8061_v18, 0.0 }
 0xdb9   : > { %1980 = vrot.lane.b32.xlu1 %v8607_v25, %s9582_s11 }
 0xdbf   : > { %1899 = vrot.lane.b32.xlu0 %v8607_v25, %s9583_s22 }
 0xdc3   : > { %2137 = vrot.lane.b32.xlu0 %v8607_v25, %s9584_s23 }
 0xddd   : > { %1891 = vadd.xlane.f32.xlu1 %v1890_v22  ;;  %v2547_v22 = vld [vmem:[%s205_s29] sm:$0xf]  ;;  %s9593_s29 = smov 80  }
 0xdee   : > { %2060 = vrot.lane.b32.xlu1 %v8607_v25, %s9585_s28 }
 0xe35   : > { %v1886_v24 = vpop.xlane.xlu1 %1885 }
 0xe36   : > { %8062 = vrcp.f32 %v1886_v24  ;;  %v1889_v27 = vpop.xlane.xlu0 %1888 }
 0xe37   : > { %8064 = vrcp.f32 %v1889_v27 }
 0xe39   : > { %v1981_v26 = vpop.permute.xlu1 %1980 }
 0xe3a   : > { %v1900_v28 = vpop.permute.xlu0 %1899  ;;  %7405 = vmatpush3.msk.msra.mxu1 %vm777_vm5, %v1981_v26 }
 0xe3b   : > { %7400 = vmatpush3.msk.msra.mxu0 %vm777_vm5, %v1900_v28  ;;  %7414 = vmatprep.subr.mxu1 %v8221_v0 }
 0xe3c   : > { %7409 = vmatprep.subr.mxu0 %v8221_v0 }
 0xe3e   : > { %v2138_v38 = vpop.permute.xlu0 %2137 }
 0xe40   : > { %v8063_v29 = vpop.eup %8062 }
 0xe41   : > { %v8065_v30 = vpop.eup %8064  ;;  %v1894_v31 = vmul.f32 %v8063_v29, %v8057_v7 }
 0xe42   : > { %v1896_v35 = vmul.f32 %v8065_v30, %v8059_v8  ;;  %v8710_v8 = vsub.s32 1, %v8359_v14  ;;  %v2334_v30 = vld [vmem:[%s9538_s2 + $0x208] sm:$0xff] }
 0xe43   : > { %7402 = vmatmul.mubr.msk.f32.vlgmr.msra.gmra.mrb[18].mxu0 %vm793_vm7, %v1894_v31  ;;  %v1977_v25 = vrot.slane %v1894_v31, 6 }
 0xe44   : > { %v1978_v36 = vrot.slane %v1896_v35, 6  ;;  %7411 = vmatprep.mubr.msk.f32.mxu0 %vm8222_vm0, %v8221_v0  ;;  %v2057_v46 = vrot.slane %v1896_v35, 4  ;;  %v2235_v9 = vrot.slane %v8603_v20, %v8710_v8  ;;  %v2335_v35 = vld [vmem:[%s9538_s2 + $0x210] sm:$0xff] }
 0xe46   : > { %v1979_v37 = vsel %vm781_vm8, %v1977_v25, %v1978_v36  ;;  %v2336_v25 = vld [vmem:[%s9538_s2 + $0x218] sm:$0xff] }
 0xe47   : > { %7407 = vmatmul.mubr.msk.f32.vlgmr.msra.gmra.mrb[20].mxu1 %vm793_vm7, %v1979_v37  ;;  %v7849_v36 = vpack.c.bf16 %v2336_v25, %v2335_v35  ;;  %v2415_v37 = vld [vmem:[%s9538_s2 + $0x220] sm:$0xff] }
 0xe48   : > { %7415 = vmatpush3.msk.msra.mxu1 %vm777_vm5, %v2138_v38  ;;  %7416 = vmatprep.mubr.msk.f32.mxu1 %vm8222_vm0, %v8221_v0  ;;  %v2416_v38 = vld [vmem:[%s9538_s2 + $0x228] sm:$0xff] }
 0xe49   : > { %7845 = vmatprep.subr.bf16.mxu1 %v8223_v5 }
 0xe6a   : > { %v1892_v39 = vpop.xlane.xlu1 %1891 }
 0xe6b   : > { %8066 = vrcp.f32 %v1892_v39  ;;  %v2417_v39 = vld [vmem:[%s9538_s2 + $0x230] sm:$0xff] }
 0xe6e   : > { %v2061_v40 = vpop.permute.xlu1 %2060 }
 0xe6f   : > { %7410 = vmatpush3.msk.msra.mxu0 %vm777_vm5, %v2061_v40  ;;  %v7852_v40 = vpack.c.bf16 %v2416_v38, %v2415_v37 }
 0xe70   : > { %7839 = vmatprep.subr.bf16.mxu0 %v8223_v5 }
 0xe75   : > { %v8067_v41 = vpop.eup %8066 }
 0xe76   : > { %v1898_v42 = vmul.f32 %v8067_v41, %v8061_v18  ;;  %v2418_v41 = vld [vmem:[%s9538_s2 + $0x238] sm:$0xff] }
 0xe78   : > { %v2136_v43 = vrot.slane %v1898_v42, 2  ;;  %v2058_v47 = vrot.slane %v1898_v42, 4  ;;  %v7855_v42 = vpack.c.bf16 %v2418_v41, %v2417_v39 }
 0xe7a   : > { %7417 = vmatmul.mubr.msk.f32.vlgmr.msra.gmra.mrb[22].mxu1 %vm793_vm7, %v2136_v43  ;;  %v2059_v48 = vsel %vm779_vm6, %v2057_v46, %v2058_v47  ;;  %v2419_v43 = vld [vmem:[%s9538_s2 + $0x240] sm:$0xff]  ;;  %v2420_v46 = vld [vmem:[%s9538_s2 + $0x248] sm:$0xff] }
 0xe7b   : > { %7412 = vmatmul.mubr.msk.f32.vlgmr.msra.gmra.mrb[20].mxu0 %vm793_vm7, %v2059_v48  ;;  %7438 = vmatprep.mubr.msk.f32.mxu1 %vm8222_vm0, %v8221_v0  ;;  %v7858_v47 = vpack.c.bf16 %v2420_v46, %v2419_v43  ;;  %v8239_v46 = vmov -1e+30  }
 0xe7c   : > { %7427 = vmatprep.mubr.msk.f32.mxu0 %vm8222_vm0, %v8221_v0  ;;  %7841 = vmatpush3.bf16.msra.mxu0 %v7840_v51  ;;  %v2326_v51 = vrot.slane %v8537_v33, %v8378_v23 }
 0xe7d   : > { %7842 = vmatprep.subr.bf16.mxu0 %v8223_v5 }
 0xe80   : > { %7844 = vmatpush3.bf16.msra.mxu0 %v7843_v58 }
 0xe81   : > { %7851 = vmatprep.subr.bf16.mxu0 %v8223_v5 }
 0xf16   : > { %v1972_v52 = vpop.f32.mrb[18].mxu0 }
 0xf17   : > { %v7403_v53 = vpop.f32.mrb[19].mxu0 }
 0xf1a   : > { %v2052_v54 = vpop.f32.mrb[20].mxu1 }
 0xf1b   : > { %2214 = vrot.lane.b32.xlu1 %v2052_v54, %s9586_s20  ;;  %v7408_v55 = vpop.f32.mrb[21].mxu1  ;;  %v2331_v54 = vrot.slane %v8537_v33, %v8489_v60  ;;  %v2421_v33 = vld [vmem:[%s9538_s2 + $0x250] sm:$0xff] }
 0xf4d   : > { %v2209_v59 = vpop.f32.mrb[22].mxu1 }
 0xf4e   : > { %2222 = vrot.lane.b32.xlu1 %v2209_v59, %s9587_s13  ;;  %v2132_v61 = vpop.f32.mrb[20].mxu0  ;;  %v7418_v62 = vpop.f32.mrb[23].mxu1  ;;  %v2422_v59 = vld [vmem:[%s9538_s2 + $0x258] sm:$0xff] }
 0xf4f   : > { %2218 = vrot.lane.b32.xlu0 %v2132_v61, %s9588_s14  ;;  %v7413_v63 = vpop.f32.mrb[21].mxu0  ;;  %v2669_v61 = vld [vmem:[%s9538_s2 + $0xa0] sm:$0xff]  ;;  %v7861_v62 = vpack.c.bf16 %v2422_v59, %v2421_v33 }
 0xf50   : > { %v2670_v63 = vld [vmem:[%s9538_s2 + $0xa8] sm:$0xff] }
 0xf8d   : > { %v2215_v1 = vpop.permute.xlu1 %2214 }
 0xf8e   : > { %v2225_v2 = vsel %vm459_vm3, %v1972_v52, %v2215_v1  ;;  %v7864_v1 = vpack.c.bf16 %v2670_v63, %v2669_v61 }
 0xfc0   : > { %v2223_v4 = vpop.permute.xlu1 %2222 }
 0xfc1   : > { %v2219_v3 = vpop.permute.xlu0 %2218 }
 0xfc2   : > { %v2226_v6 = vsel %vm219_vm1, %v2225_v2, %v2219_v3  ;;  %v2671_v2 = vld [vmem:[%s9538_s2 + $0xb0] sm:$0xff]  ;;  %v2672_v3 = vld [vmem:[%s9538_s2 + $0xb8] sm:$0xff] }
 0xfc3   : > { %v2227_v7 = vsel %vm1155_vm9, %v2226_v6, %v2223_v4  ;;  %v7867_v4 = vpack.c.bf16 %v2672_v3, %v2671_v2  ;;  %v2340_v6 = vrot.slane %v8559_v44, %v8585_v16 }
 0xfc4   : > { %7428 = vmatmul.mubr.msk.f32.vlgmr.msra.gmra.mrb[22].mxu0 %vm382_vm2, %v2227_v7 }
 0xfc5   : > { %7457 = vmatprep.mubr.msk.f32.mxu0 %vm8222_vm0, %v8221_v0  ;;  %7853 = vmatpush3.bf16.msra.mxu0 %v7852_v40 }
 0xfc6   : > { %7854 = vmatprep.subr.bf16.mxu0 %v8223_v5 }
 0xfc9   : > { %7856 = vmatpush3.bf16.msra.mxu0 %v7855_v42  ;;  %v2666_v42 = vand.u32 127, %v300_v13 }
 0xfca   : > { %7857 = vmatprep.subr.bf16.mxu0 %v8223_v5 }
 0xfcb   : > { %vm2667_vm13 = vcmp.ge.s32.totalorder %v8359_v14, %v2666_v42 }
 0xfcd   : > { %7859 = vmatpush3.bf16.msra.mxu0 %v7858_v47  ;;  %v8855_v47 = vsel %vm2667_vm13, 0.0, %v8239_v46 }
 0xfce   : > { %7860 = vmatprep.subr.bf16.mxu0 %v8223_v5 }
 0xfd1   : > { %7862 = vmatpush3.bf16.msra.mxu0 %v7861_v62 }
 0xfd2   : > { %7481 = vmatprep.subr.mxu0 %v8221_v0 }
0x1097   : > { %v2305_v11 = vpop.f32.mrb[22].mxu0 }
0x1098   : > { %v2306_v21 = vadd.f32 %v2305_v11, %v2235_v9  ;;  %v7429_v12 = vpop.f32.mrb[23].mxu0 }
0x109a   : > { %v2309_v17 = vadd.f32 %v2306_v21, %v8594_v19  ;;  %v2333_v19 = vld [vmem:[%s9538_s2 + $0x200] sm:$0xff]  ;;  %v8152_v21 = vld [vmem:[%s9539_s3 + $0x10] sm:$0xff] }
0x109b   : > { %v7846_v31 = vpack.c.bf16 %v2334_v30, %v2333_v19  ;;  %v2552_v12 = vrot.slane %v8152_v21, %v8710_v8  ;;  %v2676_v19 = vrot.slane %v8603_v20, %v8532_v32 }
0x109c   : > { %v2310_v18 = vsel %vm1239_vm10, %v2309_v17, 0.0 }
0x109d   : > { %2311 = vadd.xlane.f32.xlu0 %v2310_v18  ;;  %7847 = vmatpush3.bf16.msra.mxu1 %v7846_v31  ;;  %v210_v18 = vld [vmem:[%s9539_s3] sm:$0xff] }
0x109e   : > { %7848 = vmatprep.subr.bf16.mxu1 %v8223_v5 }
0x10a1   : > { %7850 = vmatpush3.bf16.msra.mxu1 %v7849_v36 }
0x10a2   : > { %7460 = vmatprep.subr.mxu1 %v8221_v0 }
0x10ca   : > { %2553 = vxpose.xlu0.b32.start.end [1/1] (short) (narrow) %v2547_v22, 8 }
0x112a   : > { %v2312_v24 = vpop.xlane.xlu0 %2311 }
0x112b   : > { %v2313_v27 = vmul.f32 0.03125, %v2312_v24 }
0x112d   : > { %v2314_v26 = vsub.f32 %v2309_v17, %v2313_v27 }
0x112f   : > { %v2315_v28 = vmul.f32 %v2314_v26, %v2314_v26 }
0x1131   : > { %v2316_v29 = vsel %vm1239_vm10, %v2315_v28, 0.0 }
0x1132   : > { %2317 = vadd.xlane.f32.xlu1 %v2316_v29 }
0x114a   : > { %v2569_v58 = vpop.trf.xlu0 }
0x11bf   : > { %v2318_v48 = vpop.xlane.xlu1 %2317 }
0x11c0   : > { %v2319_v49 = vmul.f32 0.03125, %v2318_v48 }
0x11c2   : > { %v2320_v50 = vadd.f32 1e-05, %v2319_v49 }
0x11c4   : > { %8068 = vrsqrt.f32 %v2320_v50 }
0x11ce   : > { %v8069_v52 = vpop.eup %8068 }
0x11cf   : > { %v2322_v53 = vmul.f32 %v8069_v52, %v2314_v26 }
0x11d1   : > { %v2327_v55 = vmul.f32 %v2326_v51, %v2322_v53 }
0x11d3   : > { %v8760_v56 = vadd.f32 %v2331_v54, %v2327_v55 }
0x11d5   : > { %7439 = vmatmul.mubr.msk.f32.vlgmr.msra.gmra.mrb[24].mxu1 %vm382_vm2, %v8760_v56 }
0x11d6   : > { %7461 = vmatpush3.msk.msra.mxu1 %vm779_vm6, %v2548_v57  ;;  %7462 = vmatprep.mubr.msk.f32.mxu1 %vm8222_vm0, %v8221_v0 }
0x11d7   : > { %7863 = vmatprep.subr.bf16.mxu1 %v8223_v5 }
0x11d9   : > { %7463 = vmatmul.mubr.msk.f32.vlgmr.msra.gmra.mrb[26].mxu1 %vm2585_vm12, %v2569_v58 }
0x11da   : > { %7473 = vmatprep.mubr.msk.f32.mxu1 %vm8222_vm0, %v8221_v0  ;;  %7865 = vmatpush3.bf16.msra.mxu1 %v7864_v1 }
0x11db   : > { %7866 = vmatprep.subr.bf16.mxu1 %v8223_v5 }
0x11de   : > { %7868 = vmatpush3.bf16.msra.mxu1 %v7867_v4 }
0x11df   : > { %7476 = vmatprep.subr.mxu1 %v8221_v0 }
0x12a8   : > { %v2410_v7 = vpop.f32.mrb[24].mxu1 }
0x12a9   : > { %v2411_v9 = vadd.f32 %v2410_v7, %v2340_v6  ;;  %v7440_v11 = vpop.f32.mrb[25].mxu1 }
0x12ab   : > { %v2414_v17 = vmax.f32 %v2411_v9, 0.0 }
0x12ac   : > { %v2658_v22 = vpop.f32.mrb[26].mxu1 }
0x12ad   : > { %v2659_v24 = vadd.f32 %v2658_v22, %v2552_v12  ;;  %7458 = vmatmul.mubr.msk.f32.vlgmr.msra.gmra.mrb[24].mxu0 %vm1358_vm11, %v2414_v17  ;;  %v7464_v27 = vpop.f32.mrb[27].mxu1 }
0x12ae   : > { %7483 = vmatprep.mubr.msk.f32.mxu0 %vm8222_vm0, %v8221_v0 }
0x12af   : > { %v8806_v26 = vadd.f32 %v2659_v24, %v210_v18 }
0x12b1   : > { %7474 = vmatmul.mubr.msk.f32.vlgmr.msra.gmra.mrb[28].mxu1 %vm382_vm2, %v8806_v26 }
0x12b2   : > { %7478 = vmatprep.mubr.msk.f32.mxu1 %vm8222_vm0, %v8221_v0 }
0x1380   : > { %v8812_v28 = vpop.f32.mrb[24].mxu0 }
0x1381   : > { %v7459_v29 = vpop.f32.mrb[25].mxu0 }
0x1384   : > { %v2746_v30 = vpop.f32.mrb[28].mxu1 }
0x1385   : > { %v8816_v31 = vadd.f32 %v2746_v30, %v2676_v19  ;;  %v7475_v35 = vpop.f32.mrb[29].mxu1 }
0x1387   : > { %2751 = vrot.lane.b32.xlu1 %v8816_v31, %s9590_s8 }
0x138b   : > { %2829 = vrot.lane.b32.xlu1 %v8816_v31, %s9591_s6 }
0x138f   : > { %2827 = vrot.lane.b32.xlu1 %v8816_v31, %s9592_s7 }
0x1393   : > { %2907 = vrot.lane.b32.xlu1 %v8816_v31, %s9593_s29 }
0x1397   : > { %2985 = vrot.lane.b32.xlu1 %v8816_v31, %s9594_s27 }
0x139b   : > { %2905 = vrot.lane.b32.xlu1 %v8816_v31, %s9595_s9 }
0x139f   : > { %2983 = vrot.lane.b32.xlu1 %v8816_v31, %s9596_s5 }
0x13f9   : > { %v2752_v25 = vpop.permute.xlu1 %2751 }
0x13fa   : > { %7477 = vmatpush3.xpose.msk.msra.mxu1 %vm459_vm3, %v2752_v25 }
0x13fb   : > { %7486 = vmatprep.subr.mxu1 %v8221_v0 }
0x13fd   : > { %7479 = vmatmul.mubr.msk.f32.vlgmr.msra.gmra.mrb[30].mxu1 %vm459_vm3, %v8816_v31  ;;  %v2830_v36 = vpop.permute.xlu1 %2829 }
0x13fe   : > { %7482 = vmatpush3.xpose.msk.msra.mxu0 %vm459_vm3, %v2830_v36  ;;  %7488 = vmatprep.mubr.msk.f32.mxu1 %vm8222_vm0, %v8221_v0 }
0x13ff   : > { %7491 = vmatprep.subr.mxu0 %v8221_v0 }
0x1401   : > { %v2828_v37 = vpop.permute.xlu1 %2827 }
0x1402   : > { %7484 = vmatmul.mubr.msk.f32.vlgmr.msra.gmra.mrb[26].mxu0 %vm459_vm3, %v2828_v37 }
0x1403   : > { %7493 = vmatprep.mubr.msk.f32.mxu0 %vm8222_vm0, %v8221_v0 }
0x1405   : > { %v2908_v38 = vpop.permute.xlu1 %2907 }
0x1406   : > { %7487 = vmatpush3.xpose.msk.msra.mxu1 %vm459_vm3, %v2908_v38 }
0x1407   : > { %7496 = vmatprep.subr.mxu1 %v8221_v0 }
0x1409   : > { %v2986_v39 = vpop.permute.xlu1 %2985 }
0x140a   : > { %7492 = vmatpush3.xpose.msk.msra.mxu0 %vm459_vm3, %v2986_v39 }
0x140b   : > { %7501 = vmatprep.subr.mxu0 %v8221_v0 }
0x140d   : > { %v2906_v40 = vpop.permute.xlu1 %2905 }
0x140e   : > { %7489 = vmatmul.mubr.msk.f32.vlgmr.msra.gmra.mrb[32].mxu1 %vm459_vm3, %v2906_v40 }
0x140f   : > { %7498 = vmatprep.mubr.msk.f32.mxu1 %vm8222_vm0, %v8221_v0 }
0x1411   : > { %v2984_v41 = vpop.permute.xlu1 %2983 }
0x1412   : > { %7494 = vmatmul.mubr.msk.f32.vlgmr.msra.gmra.mrb[28].mxu0 %vm459_vm3, %v2984_v41 }
0x1413   : > { %7503 = vmatprep.mubr.msk.f32.mxu0 %vm8222_vm0, %v8221_v0 }
0x14d0   : > { %v2823_v43 = vpop.f32.mrb[30].mxu1 }
0x14d1   : > { %v3061_v48 = vmul.f32 0.35355338, %v2823_v43  ;;  %v7480_v49 = vpop.f32.mrb[31].mxu1 }
0x14d3   : > { %v3065_v50 = vadd.f32 %v3061_v48, %v8855_v47 }
0x14d5   : > { %v2901_v51 = vpop.f32.mrb[26].mxu0  ;;  %v3069_v52 = vsel %vm459_vm3, %v3065_v50, -inf }
0x14d6   : > { %v3062_v53 = vmul.f32 0.35355338, %v2901_v51  ;;  %v7485_v54 = vpop.f32.mrb[27].mxu0  ;;  %3070 = vmax.xlane.f32.xlu0 %v3069_v52 }
0x14d8   : > { %v3066_v55 = vadd.f32 %v3062_v53, %v8855_v47 }
0x14da   : > { %v3072_v13 = vsel %vm459_vm3, %v3066_v55, -inf }
0x14db   : > { %3073 = vmax.xlane.f32.xlu1 %v3072_v13 }
0x14e1   : > { %v2979_v14 = vpop.f32.mrb[32].mxu1 }
0x14e2   : > { %v3063_v57 = vmul.f32 0.35355338, %v2979_v14  ;;  %v7490_v58 = vpop.f32.mrb[33].mxu1  ;;  %v3432_v14 = vld [vmem:[%s9538_s2 + $0xc0] sm:$0xff] }
0x14e3   : > { %v3434_v58 = vld [vmem:[%s9538_s2 + $0xd0] sm:$0xff] }
0x14e4   : > { %v3067_v33 = vadd.f32 %v3063_v57, %v8855_v47  ;;  %v3433_v57 = vld [vmem:[%s9538_s2 + $0xc8] sm:$0xff] }
0x14e5   : > { %v3057_v59 = vpop.f32.mrb[28].mxu0 }
0x14e6   : > { %v3064_v61 = vmul.f32 0.35355338, %v3057_v59  ;;  %v7495_v62 = vpop.f32.mrb[29].mxu0  ;;  %v3075_v63 = vsel %vm459_vm3, %v3067_v33, -inf  ;;  %v7870_v59 = vpack.c.bf16 %v3433_v57, %v3432_v14 }
0x14e7   : > { %3076 = vmax.xlane.f32.xlu1 %v3075_v63 }
0x14e8   : > { %v3068_v1 = vadd.f32 %v3064_v61, %v8855_v47  ;;  %v3435_v61 = vld [vmem:[%s9538_s2 + $0xd8] sm:$0xff] }
0x14e9   : > { %v7873_v62 = vpack.c.bf16 %v3435_v61, %v3434_v58 }
0x14ea   : > { %v3078_v2 = vsel %vm459_vm3, %v3068_v1, -inf }
0x14eb   : > { %3079 = vmax.xlane.f32.xlu1 %v3078_v2 }
0x1563   : > { %v3071_v3 = vpop.xlane.xlu0 %3070 }
0x1564   : > { %v3081_v4 = vsub.f32 %v3065_v50, %v3071_v3 }
0x1566   : > { %v3085_v6 = vmul.f32 1.442695, %v3081_v4  ;;  %v2426_v4 = vrot.slane %v8559_v44, %v8588_v10 }
0x1568   : > { %8070 = vpow2.f32 %v3085_v6  ;;  %v3074_v7 = vpop.xlane.xlu1 %3073  ;;  %v2497_v6 = vadd.f32 %v8812_v28, %v2426_v4 }
0x1569   : > { %v3082_v9 = vsub.f32 %v3066_v55, %v3074_v7 }
0x156a   : > { %v2500_v7 = vadd.f32 %v2497_v6, %v8760_v56  ;;  %v3544_v6 = vrot.slane %v8603_v20, %v8585_v16 }
0x156b   : > { %v3087_v11 = vmul.f32 1.442695, %v3082_v9 }
0x156c   : > { %v2501_v9 = vsel %vm1239_vm10, %v2500_v7, 0.0 }
0x156d   : > { %8072 = vpow2.f32 %v3087_v11 }
0x1572   : > { %v8071_v21 = vpop.eup %8070 }
0x1573   : > { %v3093_v12 = vsel %vm459_vm3, %v8071_v21, 0.0 }
0x1574   : > { %3094 = vadd.xlane.f32.xlu0 %v3093_v12  ;;  %v3077_v17 = vpop.xlane.xlu1 %3076 }
0x1575   : > { %v3083_v18 = vsub.f32 %v3067_v33, %v3077_v17 }
0x1577   : > { %v8073_v22 = vpop.eup %8072  ;;  %v3089_v24 = vmul.f32 1.442695, %v3083_v18 }
0x1578   : > { %v3096_v27 = vsel %vm459_vm3, %v8073_v22, 0.0  ;;  %v3080_v30 = vpop.xlane.xlu1 %3079 }
0x1579   : > { %8074 = vpow2.f32 %v3089_v24  ;;  %3097 = vadd.xlane.f32.xlu1 %v3096_v27  ;;  %v3084_v35 = vsub.f32 %v3068_v1, %v3080_v30 }
0x157b   : > { %v3091_v25 = vmul.f32 1.442695, %v3084_v35 }
0x157d   : > { %8076 = vpow2.f32 %v3091_v25 }
0x1583   : > { %v8075_v29 = vpop.eup %8074 }
0x1584   : > { %v3099_v19 = vsel %vm459_vm3, %v8075_v29, 0.0 }
0x1585   : > { %3100 = vadd.xlane.f32.xlu0 %v3099_v19 }
0x1587   : > { %v8077_v36 = vpop.eup %8076 }
0x1588   : > { %v3102_v37 = vsel %vm459_vm3, %v8077_v36, 0.0 }
0x158a   : > { %3189 = vrot.lane.b32.xlu1 %v8816_v31, %s9582_s11 }
0x158e   : > { %3265 = vrot.lane.b32.xlu1 %v8816_v31, %s9585_s28 }
0x159b   : > { %3113 = vrot.lane.b32.xlu0 %v8816_v31, %s9583_s22 }
0x15b2   : > { %3103 = vadd.xlane.f32.xlu1 %v3102_v37 }
0x15c3   : > { %3341 = vrot.lane.b32.xlu1 %v8816_v31, %s9584_s23 }
0x1601   : > { %v3095_v38 = vpop.xlane.xlu0 %3094 }
0x1606   : > { %v3098_v39 = vpop.xlane.xlu1 %3097 }
0x1607   : > { %8078 = vrcp.f32 %v3098_v39 }
0x1608   : > { %8080 = vrcp.f32 %v3095_v38 }
0x160a   : > { %v3190_v40 = vpop.permute.xlu1 %3189 }
0x160b   : > { %7502 = vmatpush3.msra.mxu0 %v3190_v40 }
0x160c   : > { %7511 = vmatprep.subr.mxu0 %v8221_v0 }
0x160e   : > { %v3266_v49 = vpop.permute.xlu1 %3265 }
0x1611   : > { %v8079_v41 = vpop.eup %8078 }
0x1612   : > { %v3101_v42 = vpop.xlane.xlu0 %3100  ;;  %v3108_v43 = vmul.f32 %v8079_v41, %v8073_v22  ;;  %v8081_v46 = vpop.eup %8080 }
0x1613   : > { %8082 = vrcp.f32 %v3101_v42  ;;  %v3106_v31 = vmul.f32 %v8081_v46, %v8071_v21  ;;  %v3439_v46 = vrot.slane %v8603_v20, %v8540_v34 }
0x1614   : > { %7504 = vmatmul.mubr.msk.f32.vlgmr.msra.gmra.mrb[30].mxu0 %vm459_vm3, %v3108_v43 }
0x1615   : > { %7513 = vmatprep.mubr.msk.f32.mxu0 %vm8222_vm0, %v8221_v0 }
0x1616   : > { %v3114_v48 = vpop.permute.xlu0 %3113 }
0x1617   : > { %7497 = vmatpush3.msra.mxu1 %v3114_v48 }
0x1618   : > { %7499 = vmatmul.mubr.msk.f32.vlgmr.msra.gmra.mrb[34].mxu1 %vm459_vm3, %v3106_v31  ;;  %7506 = vmatprep.subr.mxu1 %v8221_v0 }
0x1619   : > { %7507 = vmatpush3.msra.mxu1 %v3266_v49  ;;  %7508 = vmatprep.mubr.msk.f32.mxu1 %vm8222_vm0, %v8221_v0 }
0x161a   : > { %7869 = vmatprep.subr.bf16.mxu1 %v8223_v5 }
0x161d   : > { %v8083_v50 = vpop.eup %8082 }
0x161e   : > { %v3110_v51 = vmul.f32 %v8083_v50, %v8075_v29 }
0x1620   : > { %7509 = vmatmul.mubr.msk.f32.vlgmr.msra.gmra.mrb[36].mxu1 %vm459_vm3, %v3110_v51 }
0x1621   : > { %7524 = vmatprep.mubr.msk.f32.mxu1 %vm8222_vm0, %v8221_v0  ;;  %7871 = vmatpush3.bf16.msra.mxu1 %v7870_v59 }
0x1622   : > { %7872 = vmatprep.subr.bf16.mxu1 %v8223_v5 }
0x1625   : > { %7874 = vmatpush3.bf16.msra.mxu1 %v7873_v62 }
0x1626   : > { %7881 = vmatprep.subr.bf16.mxu1 %v8223_v5 }
0x163f   : > { %v3104_v52 = vpop.xlane.xlu1 %3103 }
0x1640   : > { %8084 = vrcp.f32 %v3104_v52  ;;  %v3537_v52 = vld [vmem:[%s9538_s2 + $0xe0] sm:$0xff] }
0x1643   : > { %v3342_v53 = vpop.permute.xlu1 %3341 }
0x1644   : > { %7512 = vmatpush3.msra.mxu0 %v3342_v53  ;;  %v3538_v53 = vld [vmem:[%s9538_s2 + $0xe8] sm:$0xff] }
0x1645   : > { %7875 = vmatprep.subr.bf16.mxu0 %v8223_v5 }
0x164a   : > { %v8085_v54 = vpop.eup %8084 }
0x164b   : > { %v3112_v55 = vmul.f32 %v8085_v54, %v8077_v36  ;;  %v8925_v36 = vld [vmem:[%s9539_s3 + $0x30] sm:$0xff] }
0x164c   : > { %v2517_v37 = vrot.slane %v8925_v36, %v8362_v15  ;;  %v2522_v40 = vrot.slane %v8925_v36, %v8710_v8  ;;  %v3539_v54 = vld [vmem:[%s9538_s2 + $0xf0] sm:$0xff]  ;;  %v2540_v20 = vrot.slane %v8925_v36, %v8532_v32 }
0x164d   : > { %7514 = vmatmul.mubr.msk.f32.vlgmr.msra.gmra.mrb[32].mxu0 %vm459_vm3, %v3112_v55  ;;  %v8018_v55 = vpack.i.bf16 %v3538_v53, %v3537_v52 }
0x164e   : > { %7535 = vmatprep.mubr.msk.f32.mxu0 %vm8222_vm0, %v8221_v0 }
0x16e7   : > { %v3261_v13 = vpop.f32.mrb[30].mxu0 }
0x16e8   : > { %3418 = vrot.lane.b32.xlu0 %v3261_v13, %s9586_s20  ;;  %v7505_v33 = vpop.f32.mrb[31].mxu0  ;;  %v7876_v13 = vpack.c.bf16 %v3538_v53, %v3537_v52 }
0x16ea   : > { %7877 = vmatpush3.bf16.msra.mxu0 %v7876_v13 }
0x16eb   : > { %v3185_v63 = vpop.f32.mrb[34].mxu1  ;;  %7878 = vmatprep.subr.bf16.mxu0 %v8223_v5 }
0x16ec   : > { %v7500_v1 = vpop.f32.mrb[35].mxu1 }
0x16f3   : > { %v3337_v2 = vpop.f32.mrb[36].mxu1 }
0x16f4   : > { %3422 = vrot.lane.b32.xlu1 %v3337_v2, %s9588_s14  ;;  %v7510_v3 = vpop.f32.mrb[37].mxu1 }
0x1718   : > { %2502 = vadd.xlane.f32.xlu1 %v2501_v9 }
0x1720   : > { %v3413_v11 = vpop.f32.mrb[32].mxu0 }
0x1721   : > { %3426 = vrot.lane.b32.xlu0 %v3413_v11, %s9587_s13  ;;  %v7515_v21 = vpop.f32.mrb[33].mxu0 }
0x175a   : > { %v3419_v12 = vpop.permute.xlu0 %3418 }
0x175b   : > { %v3429_v18 = vsel %vm459_vm3, %v3185_v63, %v3419_v12 }
0x1766   : > { %v3423_v17 = vpop.permute.xlu1 %3422 }
0x1767   : > { %v3430_v22 = vsel %vm219_vm1, %v3429_v18, %v3423_v17 }
0x1793   : > { %v3427_v24 = vpop.permute.xlu0 %3426 }
0x1794   : > { %v3431_v44 = vsel %vm1155_vm9, %v3430_v22, %v3427_v24 }
0x1795   : > { %7525 = vmatmul.mubr.msk.f32.vlgmr.msra.gmra.mrb[38].mxu1 %vm382_vm2, %v3431_v44 }
0x1796   : > { %7546 = vmatprep.mubr.msk.f32.mxu1 %vm8222_vm0, %v8221_v0 }
0x17a5   : > { %v2503_v56 = vpop.xlane.xlu1 %2502 }
0x17a6   : > { %v2504_v28 = vmul.f32 0.03125, %v2503_v56 }
0x17a8   : > { %v2505_v27 = vsub.f32 %v2500_v7, %v2504_v28 }
0x17aa   : > { %v2506_v29 = vmul.f32 %v2505_v27, %v2505_v27 }
0x17ac   : > { %v2507_v19 = vsel %vm1239_vm10, %v2506_v29, 0.0 }
0x17ad   : > { %2508 = vadd.xlane.f32.xlu0 %v2507_v19 }
0x183a   : > { %v2509_v30 = vpop.xlane.xlu0 %2508 }
0x183b   : > { %v2510_v35 = vmul.f32 0.03125, %v2509_v30 }
0x183d   : > { %v2511_v25 = vadd.f32 1e-05, %v2510_v35  ;;  %v2545_v35 = vrot.slane %v8925_v36, %v8540_v34 }
0x183f   : > { %8086 = vrsqrt.f32 %v2511_v25 }
0x1849   : > { %v8087_v38 = vpop.eup %8086 }
0x184a   : > { %v2513_v39 = vmul.f32 %v8087_v38, %v2505_v27  ;;  %v3530_v38 = vrot.slane %v8925_v36, %v8585_v16 }
0x184c   : > { %v2518_v41 = vmul.f32 %v2517_v37, %v2513_v39 }
0x184e   : > { %v2523_v42 = vadd.f32 %v2522_v40, %v2518_v41  ;;  %v3535_v41 = vrot.slane %v8925_v36, %v8588_v10 }
0x1850   : > { %v2524_v43 = vsel %vm1239_vm10, %v2523_v42, 0.0 }
0x1851   : > { %2525 = vadd.xlane.f32.xlu0 %v2524_v43 }
0x1868   : > { %v3509_v48 = vpop.f32.mrb[38].mxu1 }
0x1869   : > { %v3510_v31 = vadd.f32 %v3509_v48, %v3439_v46  ;;  %v7526_v49 = vpop.f32.mrb[39].mxu1 }
0x186b   : > { %v3513_v50 = vadd.f32 %v3510_v31, %v8806_v26  ;;  %v3540_v26 = vld [vmem:[%s9538_s2 + $0xf8] sm:$0xff] }
0x186c   : > { %v8023_v14 = vpack.i.bf16 %v3540_v26, %v3539_v54  ;;  %v7879_v57 = vpack.c.bf16 %v3540_v26, %v3539_v54 }
0x186d   : > { %v3514_v51 = vsel %vm382_vm2, %v3513_v50, 0.0 }
0x186e   : > { %3515 = vadd.xlane.f32.xlu0 %v3514_v51  ;;  %7880 = vmatpush3.bf16.msra.mxu0 %v7879_v57 }
0x186f   : > { %7549 = vmatprep.subr.mxu0 %v8221_v0 }
0x18de   : > { %v2526_v58 = vpop.xlane.xlu0 %2525 }
0x18df   : > { %v2527_v33 = vmul.f32 0.03125, %v2526_v58 }
0x18e1   : > { %v2528_v59 = vsub.f32 %v2523_v42, %v2527_v33 }
0x18e3   : > { %v2529_v61 = vmul.f32 %v2528_v59, %v2528_v59 }
0x18e5   : > { %v2530_v62 = vsel %vm1239_vm10, %v2529_v61, 0.0 }
0x18e6   : > { %2531 = vadd.xlane.f32.xlu1 %v2530_v62 }
0x18f7   : > { %8019 = vrot.lane.b32.xlu1 %v8018_v55, %s9590_s8 }
0x18fb   : > { %v3516_v63 = vpop.xlane.xlu0 %3515  ;;  %3635 = vrot.lane.b32.xlu1 %v3544_v6, %s9590_s8 }
0x18fc   : > { %v3517_v1 = vmul.f32 0.03125, %v3516_v63 }
0x18fe   : > { %v3518_v2 = vsub.f32 %v3513_v50, %v3517_v1 }
0x1900   : > { %v3519_v3 = vmul.f32 %v3518_v2, %v3518_v2 }
0x1902   : > { %v3520_v4 = vsel %vm382_vm2, %v3519_v3, 0.0 }
0x1903   : > { %3521 = vadd.xlane.f32.xlu0 %v3520_v4 }
0x1919   : > { %8024 = vrot.lane.b32.xlu0 %v8023_v14, %s9590_s8 }
0x1973   : > { %v2532_v7 = vpop.xlane.xlu1 %2531 }
0x1974   : > { %v2533_v17 = vmul.f32 0.03125, %v2532_v7 }
0x1976   : > { %v2534_v18 = vadd.f32 1e-05, %v2533_v17 }
0x1977   : > { %v8020_v9 = vpop.permute.xlu1 %8019 }
0x1978   : > { %v8022_v11 = vunpack.i.h.bf16 %v8020_v9  ;;  %v8021_v21 = vunpack.i.l.bf16 %v8020_v9  ;;  %8088 = vrsqrt.f32 %v2534_v18 }
0x197a   : > { %v7882_v12 = vpack.c.bf16 %v8022_v11, %v8021_v21 }
0x197b   : > { %v3636_v46 = vpop.permute.xlu1 %3635 }
0x197c   : > { %7883 = vmatpush3.bf16.msra.mxu1 %v7882_v12 }
0x197d   : > { %7884 = vmatprep.subr.bf16.mxu1 %v8223_v5 }
0x1982   : > { %v8089_v22 = vpop.eup %8088 }
0x1983   : > { %v2536_v56 = vmul.f32 %v8089_v22, %v2528_v59 }
0x1985   : > { %v2541_v30 = vmul.f32 %v2540_v20, %v2536_v56 }
0x1987   : > { %v8962_v37 = vadd.f32 %v2545_v35, %v2541_v30 }
0x1990   : > { %v3522_v24 = vpop.xlane.xlu0 %3521 }
0x1991   : > { %v3523_v44 = vmul.f32 0.03125, %v3522_v24 }
0x1993   : > { %v3524_v28 = vadd.f32 1e-05, %v3523_v44 }
0x1994   : > { %v8025_v27 = vpop.permute.xlu0 %8024 }
0x1995   : > { %8090 = vrsqrt.f32 %v3524_v28  ;;  %v8027_v29 = vunpack.i.h.bf16 %v8025_v27  ;;  %v8026_v19 = vunpack.i.l.bf16 %v8025_v27 }
0x1997   : > { %v7885_v25 = vpack.c.bf16 %v8027_v29, %v8026_v19 }
0x1999   : > { %7886 = vmatpush3.bf16.msra.mxu1 %v7885_v25 }
0x199a   : > { %7559 = vmatprep.subr.mxu1 %v8221_v0 }
0x199c   : > { %7547 = vmatmul.mubr.msk.f32.vlgmr.msra.gmra.mrb[40].mxu1 %vm382_vm2, %v8962_v37 }
0x199d   : > { %7561 = vmatprep.mubr.msk.f32.mxu1 %vm8222_vm0, %v8221_v0 }
0x199f   : > { %v8091_v39 = vpop.eup %8090 }
0x19a0   : > { %v3526_v40 = vmul.f32 %v8091_v39, %v3518_v2 }
0x19a2   : > { %v3531_v42 = vmul.f32 %v3530_v38, %v3526_v40 }
0x19a4   : > { %v8973_v43 = vadd.f32 %v3535_v41, %v3531_v42 }
0x19a6   : > { %7536 = vmatmul.mubr.msk.f32.vlgmr.msra.gmra.mrb[34].mxu0 %vm382_vm2, %v8973_v43 }
0x19a7   : > { %7551 = vmatprep.mubr.msk.f32.mxu0 %vm8222_vm0, %v8221_v0 }
0x1a6f   : > { %v3707_v48 = vpop.f32.mrb[40].mxu1 }
0x1a70   : > { %v8979_v31 = vadd.f32 %v3707_v48, %v3636_v46  ;;  %v7548_v49 = vpop.f32.mrb[41].mxu1 }
0x1a72   : > { %3867 = vrot.lane.b32.xlu0 %v8979_v31, %s9595_s9  ;;  %3789 = vrot.lane.b32.xlu1 %v8979_v31, %s9592_s7 }
0x1a73   : > { %7550 = vmatpush3.xpose.msk.msra.mxu0 %vm459_vm3, %v8979_v31 }
0x1a74   : > { %7554 = vmatprep.subr.mxu0 %v8221_v0 }
0x1a76   : > { %3945 = vrot.lane.b32.xlu1 %v8979_v31, %s9596_s5 }
0x1a79   : > { %v3614_v50 = vpop.f32.mrb[34].mxu0 }
0x1a7a   : > { %v3615_v51 = vadd.f32 %v3614_v50, %v3544_v6  ;;  %v7537_v52 = vpop.f32.mrb[35].mxu0 }
0x1a7c   : > { %3865 = vrot.lane.b32.xlu0 %v3615_v51, %s9595_s9  ;;  %3787 = vrot.lane.b32.xlu1 %v3615_v51, %s9592_s7 }
0x1a7d   : > { %7552 = vmatmul.mubr.msk.f32.vlgmr.msra.gmra.mrb[36].mxu0 %vm459_vm3, %v3615_v51 }
0x1a7e   : > { %7556 = vmatprep.mubr.msk.f32.mxu0 %vm8222_vm0, %v8221_v0 }
0x1a80   : > { %3943 = vrot.lane.b32.xlu1 %v3615_v51, %s9596_s5 }
0x1ae4   : > { %v3868_v53 = vpop.permute.xlu0 %3867  ;;  %v3790_v54 = vpop.permute.xlu1 %3789 }
0x1ae5   : > { %7555 = vmatpush3.xpose.msk.msra.mxu0 %vm459_vm3, %v3790_v54  ;;  %7560 = vmatpush3.xpose.msk.msra.mxu1 %vm459_vm3, %v3868_v53 }
0x1ae6   : > { %7564 = vmatprep.subr.mxu0 %v8221_v0  ;;  %7569 = vmatprep.subr.mxu1 %v8221_v0 }
0x1ae8   : > { %v3946_v55 = vpop.permute.xlu1 %3945 }
0x1aee   : > { %v3866_v13 = vpop.permute.xlu0 %3865  ;;  %v3788_v26 = vpop.permute.xlu1 %3787 }
0x1aef   : > { %7557 = vmatmul.mubr.msk.f32.vlgmr.msra.gmra.mrb[38].mxu0 %vm459_vm3, %v3788_v26  ;;  %7562 = vmatmul.mubr.msk.f32.vlgmr.msra.gmra.mrb[42].mxu1 %vm459_vm3, %v3866_v13 }
0x1af0   : > { %7565 = vmatpush3.xpose.msk.msra.mxu0 %vm459_vm3, %v3946_v55  ;;  %7566 = vmatprep.mubr.msk.f32.mxu0 %vm8222_vm0, %v8221_v0 }
0x1af1   : > { %7574 = vmatprep.subr.mxu0 %v8221_v0  ;;  %7571 = vmatprep.mubr.msk.f32.mxu1 %vm8222_vm0, %v8221_v0 }
0x1af2   : > { %v3944_v14 = vpop.permute.xlu1 %3943 }
0x1af3   : > { %7567 = vmatmul.mubr.msk.f32.vlgmr.msra.gmra.mrb[40].mxu0 %vm459_vm3, %v3944_v14 }
0x1af4   : > { %7576 = vmatprep.mubr.msk.f32.mxu0 %vm8222_vm0, %v8221_v0 }
0x1b50   : > { %v3783_v57 = vpop.f32.mrb[36].mxu0 }
0x1b51   : > { %v4021_v58 = vmul.f32 0.35355338, %v3783_v57  ;;  %v7553_v33 = vpop.f32.mrb[37].mxu0 }
0x1b53   : > { %v4025_v59 = vadd.f32 %v4021_v58, %v8422_v45 }
0x1b55   : > { %v4029_v61 = vsel %vm793_vm7, %v4025_v59, -inf }
0x1b56   : > { %4030 = vmax.xlane.f32.xlu0 %v4029_v61 }
0x1bc2   : > { %v3861_v62 = vpop.f32.mrb[38].mxu0  ;;  %v3939_v63 = vpop.f32.mrb[42].mxu1 }
0x1bc3   : > { %v4022_v1 = vmul.f32 0.35355338, %v3861_v62  ;;  %v4023_v2 = vmul.f32 0.35355338, %v3939_v63  ;;  %v7558_v3 = vpop.f32.mrb[39].mxu0  ;;  %v7563_v4 = vpop.f32.mrb[43].mxu1 }
0x1bc4   : > { %v4398_v3 = vld [vmem:[%s9538_s2 + $0x110] sm:$0xff] }
0x1bc5   : > { %v4026_v6 = vadd.f32 %v4022_v1, %v8422_v45  ;;  %v4027_v7 = vadd.f32 %v4023_v2, %v8422_v45  ;;  %v4396_v1 = vld [vmem:[%s9538_s2 + $0x100] sm:$0xff]  ;;  %v4397_v2 = vld [vmem:[%s9538_s2 + $0x108] sm:$0xff] }
0x1bc6   : > { %v4017_v9 = vpop.f32.mrb[40].mxu0  ;;  %v7888_v4 = vpack.c.bf16 %v4397_v2, %v4396_v1  ;;  %v4494_v1 = vrot.slane %v8925_v36, %v8378_v23 }
0x1bc7   : > { %v4024_v11 = vmul.f32 0.35355338, %v4017_v9  ;;  %v7568_v21 = vpop.f32.mrb[41].mxu0  ;;  %v4032_v12 = vsel %vm793_vm7, %v4026_v6, -inf  ;;  %v4035_v17 = vsel %vm793_vm7, %v4027_v7, -inf }
0x1bc8   : > { %4033 = vmax.xlane.f32.xlu1 %v4032_v12  ;;  %4036 = vmax.xlane.f32.xlu0 %v4035_v17 }
0x1bc9   : > { %v4028_v18 = vadd.f32 %v4024_v11, %v8422_v45 }
0x1bcb   : > { %v4038_v22 = vsel %vm793_vm7, %v4028_v18, -inf }
0x1bcc   : > { %4039 = vmax.xlane.f32.xlu0 %v4038_v22 }
0x1be3   : > { %v4031_v24 = vpop.xlane.xlu0 %4030 }
0x1be4   : > { %v4041_v44 = vsub.f32 %v4025_v59, %v4031_v24 }
0x1be6   : > { %v4045_v56 = vmul.f32 1.442695, %v4041_v44 }
0x1be8   : > { %8092 = vpow2.f32 %v4045_v56 }
0x1bf2   : > { %v8093_v20 = vpop.eup %8092 }
0x1bf3   : > { %v4053_v28 = vsel %vm793_vm7, %v8093_v20, 0.0 }
0x1bf4   : > { %4054 = vadd.xlane.f32.xlu0 %v4053_v28 }
0x1c55   : > { %v4034_v27 = vpop.xlane.xlu1 %4033  ;;  %v4037_v29 = vpop.xlane.xlu0 %4036 }
0x1c56   : > { %v4042_v19 = vsub.f32 %v4026_v6, %v4034_v27  ;;  %v4043_v30 = vsub.f32 %v4027_v7, %v4037_v29  ;;  %v4399_v6 = vld [vmem:[%s9538_s2 + $0x118] sm:$0xff] }
0x1c57   : > { %v7891_v7 = vpack.c.bf16 %v4399_v6, %v4398_v3 }
0x1c58   : > { %v4047_v35 = vmul.f32 1.442695, %v4042_v19  ;;  %v4049_v25 = vmul.f32 1.442695, %v4043_v30  ;;  %v9077_v19 = vld [vmem:[%s9539_s3 + $0x18] sm:$0xff] }
0x1c59   : > { %v4040_v42 = vpop.xlane.xlu0 %4039  ;;  %v4403_v30 = vrot.slane %v9077_v19, %v8588_v10 }
0x1c5a   : > { %8094 = vpow2.f32 %v4047_v35  ;;  %v4044_v46 = vsub.f32 %v4028_v18, %v4040_v42 }
0x1c5b   : > { %8096 = vpow2.f32 %v4049_v25 }
0x1c5c   : > { %v4051_v48 = vmul.f32 1.442695, %v4044_v46 }
0x1c5e   : > { %8098 = vpow2.f32 %v4051_v48 }
0x1c64   : > { %v8095_v38 = vpop.eup %8094 }
0x1c65   : > { %v8097_v39 = vpop.eup %8096  ;;  %v4056_v40 = vsel %vm793_vm7, %v8095_v38, 0.0 }
0x1c66   : > { %4057 = vadd.xlane.f32.xlu1 %v4056_v40  ;;  %v4059_v41 = vsel %vm793_vm7, %v8097_v39, 0.0 }
0x1c67   : > { %4060 = vadd.xlane.f32.xlu0 %v4059_v41 }
0x1c68   : > { %v8099_v49 = vpop.eup %8098 }
0x1c69   : > { %v4062_v50 = vsel %vm793_vm7, %v8099_v49, 0.0 }
0x1c77   : > { %4150 = vrot.lane.b32.xlu1 %v8979_v31, %s9591_s6 }
0x1c7b   : > { %4227 = vrot.lane.b32.xlu1 %v8979_v31, %s9593_s29 }
0x1c7d   : > { %4073 = vrot.lane.b32.xlu0 %v8979_v31, %s9590_s8 }
0x1c81   : > { %v4055_v51 = vpop.xlane.xlu0 %4054 }
0x1c82   : > { %8100 = vrcp.f32 %v4055_v51  ;;  %v4502_v51 = vld [vmem:[%s9538_s2 + $0x268] sm:$0xff] }
0x1c8c   : > { %v8101_v54 = vpop.eup %8100 }
0x1c8d   : > { %v4066_v13 = vmul.f32 %v8101_v54, %v8093_v20 }
0x1c9f   : > { %4063 = vadd.xlane.f32.xlu1 %v4062_v50  ;;  %v4501_v50 = vld [vmem:[%s9538_s2 + $0x260] sm:$0xff] }
0x1cb0   : > { %4304 = vrot.lane.b32.xlu1 %v8979_v31, %s9594_s27 }
0x1cf3   : > { %v4058_v52 = vpop.xlane.xlu1 %4057 }
0x1cf4   : > { %8102 = vrcp.f32 %v4058_v52  ;;  %v4061_v53 = vpop.xlane.xlu0 %4060  ;;  %v7894_v52 = vpack.c.bf16 %v4502_v51, %v4501_v50 }
0x1cf5   : > { %8104 = vrcp.f32 %v4061_v53  ;;  %v4504_v53 = vld [vmem:[%s9538_s2 + $0x278] sm:$0xff] }
0x1cf7   : > { %v4151_v55 = vpop.permute.xlu1 %4150 }
0x1cf8   : > { %v4074_v26 = vpop.permute.xlu0 %4073  ;;  %7575 = vmatpush3.msk.msra.mxu0 %vm777_vm5, %v4151_v55  ;;  %v4583_v55 = vld [vmem:[%s9538_s2 + $0x280] sm:$0xff] }
0x1cf9   : > { %7570 = vmatpush3.msk.msra.mxu1 %vm777_vm5, %v4074_v26  ;;  %7584 = vmatprep.subr.mxu0 %v8221_v0  ;;  %v4585_v26 = vld [vmem:[%s9538_s2 + $0x290] sm:$0xff] }
0x1cfa   : > { %7572 = vmatmul.mubr.msk.f32.vlgmr.msra.gmra.mrb[44].mxu1 %vm793_vm7, %v4066_v13  ;;  %7579 = vmatprep.subr.mxu1 %v8221_v0  ;;  %v4584_v13 = vld [vmem:[%s9538_s2 + $0x288] sm:$0xff] }
0x1cfb   : > { %v4228_v31 = vpop.permute.xlu1 %4227  ;;  %7581 = vmatprep.mubr.msk.f32.mxu1 %vm8222_vm0, %v8221_v0 }
0x1cfc   : > { %7580 = vmatpush3.msk.msra.mxu1 %vm777_vm5, %v4228_v31  ;;  %v7900_v31 = vpack.c.bf16 %v4584_v13, %v4583_v55 }
0x1cfd   : > { %7887 = vmatprep.subr.bf16.mxu1 %v8223_v5 }
0x1cfe   : > { %v8103_v14 = vpop.eup %8102 }
0x1cff   : > { %v8105_v57 = vpop.eup %8104  ;;  %v4068_v58 = vmul.f32 %v8103_v14, %v8095_v38  ;;  %v4586_v14 = vld [vmem:[%s9538_s2 + $0x298] sm:$0xff] }
0x1d00   : > { %v4070_v33 = vmul.f32 %v8105_v57, %v8097_v39  ;;  %v7903_v57 = vpack.c.bf16 %v4586_v14, %v4585_v26  ;;  %v4699_v14 = vrot.slane %v9077_v19, %v8378_v23 }
0x1d01   : > { %7577 = vmatmul.mubr.msk.f32.vlgmr.msra.gmra.mrb[42].mxu0 %vm793_vm7, %v4068_v58  ;;  %v4587_v58 = vld [vmem:[%s9538_s2 + $0x2a0] sm:$0xff] }
0x1d02   : > { %7582 = vmatmul.mubr.msk.f32.vlgmr.msra.gmra.mrb[46].mxu1 %vm793_vm7, %v4070_v33  ;;  %7586 = vmatprep.mubr.msk.f32.mxu0 %vm8222_vm0, %v8221_v0  ;;  %v4588_v33 = vld [vmem:[%s9538_s2 + $0x2a8] sm:$0xff] }
0x1d03   : > { %7597 = vmatprep.mubr.msk.f32.mxu1 %vm8222_vm0, %v8221_v0  ;;  %7889 = vmatpush3.bf16.msra.mxu1 %v7888_v4  ;;  %v4499_v4 = vrot.slane %v8925_v36, %v8489_v60  ;;  %v9136_v36 = vld [vmem:[%s9539_s3 + $0x20] sm:$0xff] }
0x1d04   : > { %7890 = vmatprep.subr.bf16.mxu1 %v8223_v5 }
0x1d07   : > { %7892 = vmatpush3.bf16.msra.mxu1 %v7891_v7 }
0x1d08   : > { %7899 = vmatprep.subr.bf16.mxu1 %v8223_v5 }
0x1d2c   : > { %v4064_v59 = vpop.xlane.xlu1 %4063 }
0x1d2d   : > { %8106 = vrcp.f32 %v4064_v59  ;;  %v7906_v59 = vpack.c.bf16 %v4588_v33, %v4587_v58 }
0x1d30   : > { %v4305_v61 = vpop.permute.xlu1 %4304 }
0x1d31   : > { %7585 = vmatpush3.msk.msra.mxu0 %vm777_vm5, %v4305_v61 }
0x1d32   : > { %7893 = vmatprep.subr.bf16.mxu0 %v8223_v5 }
0x1d37   : > { %v8107_v62 = vpop.eup %8106 }
0x1d38   : > { %v4072_v63 = vmul.f32 %v8107_v62, %v8099_v49 }
0x1d3a   : > { %7587 = vmatmul.mubr.msk.f32.vlgmr.msra.gmra.mrb[44].mxu0 %vm793_vm7, %v4072_v63 }
0x1d3b   : > { %7608 = vmatprep.mubr.msk.f32.mxu0 %vm8222_vm0, %v8221_v0  ;;  %7895 = vmatpush3.bf16.msra.mxu0 %v7894_v52 }
0x1d3c   : > { %7896 = vmatprep.subr.bf16.mxu0 %v8223_v5 }
0x1dcd   : > { %v4146_v9 = vpop.f32.mrb[44].mxu1 }
0x1dce   : > { %v7573_v11 = vpop.f32.mrb[45].mxu1 }
0x1dcf   : > { %v4590_v11 = vld [vmem:[%s9538_s2 + $0x2b8] sm:$0xff] }
0x1dd4   : > { %v4223_v21 = vpop.f32.mrb[42].mxu0 }
0x1dd5   : > { %v4300_v12 = vpop.f32.mrb[46].mxu1  ;;  %v7578_v17 = vpop.f32.mrb[43].mxu0  ;;  %4382 = vrot.lane.b32.xlu0 %v4223_v21, %s9586_s20 }
0x1dd6   : > { %4386 = vrot.lane.b32.xlu1 %v4300_v12, %s9588_s14  ;;  %v7583_v18 = vpop.f32.mrb[47].mxu1  ;;  %v4508_v12 = vrot.slane %v9136_v36, %v8378_v23 }
0x1e0d   : > { %v4377_v22 = vpop.f32.mrb[44].mxu0 }
0x1e0e   : > { %4390 = vrot.lane.b32.xlu0 %v4377_v22, %s9587_s13  ;;  %v7588_v24 = vpop.f32.mrb[45].mxu0 }
0x1e47   : > { %v4383_v44 = vpop.permute.xlu0 %4382 }
0x1e48   : > { %v4393_v56 = vsel %vm459_vm3, %v4146_v9, %v4383_v44  ;;  %v4387_v20 = vpop.permute.xlu1 %4386  ;;  %v4589_v9 = vld [vmem:[%s9538_s2 + $0x2b0] sm:$0xff]  ;;  %v4594_v44 = vrot.slane %v9136_v36, %v8489_v60 }
0x1e49   : > { %v4394_v28 = vsel %vm219_vm1, %v4393_v56, %v4387_v20  ;;  %v7909_v21 = vpack.c.bf16 %v4590_v11, %v4589_v9 }
0x1e80   : > { %v4391_v27 = vpop.permute.xlu0 %4390 }
0x1e81   : > { %v4395_v29 = vsel %vm1155_vm9, %v4394_v28, %v4391_v27 }
0x1e82   : > { %7598 = vmatmul.mubr.msk.f32.vlgmr.msra.gmra.mrb[48].mxu1 %vm382_vm2, %v4395_v29 }
0x1e83   : > { %7627 = vmatprep.mubr.msk.f32.mxu1 %vm8222_vm0, %v8221_v0  ;;  %7901 = vmatpush3.bf16.msra.mxu1 %v7900_v31 }
0x1e84   : > { %7902 = vmatprep.subr.bf16.mxu1 %v8223_v5 }
0x1e87   : > { %7904 = vmatpush3.bf16.msra.mxu1 %v7903_v57 }
0x1e88   : > { %7905 = vmatprep.subr.bf16.mxu1 %v8223_v5 }
0x1e8b   : > { %7907 = vmatpush3.bf16.msra.mxu1 %v7906_v59 }
0x1e8c   : > { %7908 = vmatprep.subr.bf16.mxu1 %v8223_v5 }
0x1e8f   : > { %7910 = vmatpush3.bf16.msra.mxu1 %v7909_v21 }
0x1e90   : > { %7651 = vmatprep.subr.mxu1 %v8221_v0 }
0x1f55   : > { %v4473_v35 = vpop.f32.mrb[48].mxu1 }
0x1f56   : > { %v4474_v25 = vadd.f32 %v4473_v35, %v4403_v30  ;;  %v7599_v38 = vpop.f32.mrb[49].mxu1 }
0x1f58   : > { %v4477_v39 = vadd.f32 %v4474_v25, %v8973_v43  ;;  %v4503_v43 = vld [vmem:[%s9538_s2 + $0x270] sm:$0xff] }
0x1f59   : > { %v7897_v54 = vpack.c.bf16 %v4504_v53, %v4503_v43  ;;  %v9164_v43 = vld [vmem:[%s9539_s3 + $0x38] sm:$0xff] }
0x1f5a   : > { %v4478_v40 = vsel %vm382_vm2, %v4477_v39, 0.0  ;;  %v4685_v53 = vrot.slane %v9164_v43, %v8362_v15  ;;  %v4690_v13 = vrot.slane %v9164_v43, %v8710_v8 }
0x1f5b   : > { %4479 = vadd.xlane.f32.xlu1 %v4478_v40  ;;  %7898 = vmatpush3.bf16.msra.mxu0 %v7897_v54  ;;  %v4692_v40 = vld [vmem:[%s9538_s2 + $0x120] sm:$0xff] }
0x1f5c   : > { %7911 = vmatprep.subr.bf16.mxu0 %v8223_v5 }
0x1fe8   : > { %v4480_v41 = vpop.xlane.xlu1 %4479 }
0x1fe9   : > { %v4481_v42 = vmul.f32 0.03125, %v4480_v41  ;;  %v4693_v41 = vld [vmem:[%s9538_s2 + $0x128] sm:$0xff] }
0x1feb   : > { %v4482_v46 = vsub.f32 %v4477_v39, %v4481_v42  ;;  %v7912_v42 = vpack.c.bf16 %v4693_v41, %v4692_v40 }
0x1fed   : > { %v4483_v48 = vmul.f32 %v4482_v46, %v4482_v46 }
0x1fef   : > { %v4484_v49 = vsel %vm382_vm2, %v4483_v48, 0.0  ;;  %v4695_v48 = vld [vmem:[%s9538_s2 + $0x138] sm:$0xff] }
0x1ff0   : > { %4485 = vadd.xlane.f32.xlu0 %v4484_v49 }
0x207d   : > { %v4486_v61 = vpop.xlane.xlu0 %4485 }
0x207e   : > { %v4487_v62 = vmul.f32 0.03125, %v4486_v61 }
0x2080   : > { %v4488_v63 = vadd.f32 1e-05, %v4487_v62 }
0x2082   : > { %8108 = vrsqrt.f32 %v4488_v63 }
0x208c   : > { %v8109_v2 = vpop.eup %8108 }
0x208d   : > { %v4490_v3 = vmul.f32 %v8109_v2, %v4482_v46  ;;  %v4694_v46 = vld [vmem:[%s9538_s2 + $0x130] sm:$0xff] }
0x208e   : > { %v7915_v49 = vpack.c.bf16 %v4695_v48, %v4694_v46 }
0x208f   : > { %v4495_v6 = vmul.f32 %v4494_v1, %v4490_v3 }
0x2091   : > { %v4500_v7 = vadd.f32 %v4499_v4, %v4495_v6 }
0x2093   : > { %7609 = vmatmul.mubr.msk.f32.vlgmr.msra.gmra.mrb[46].mxu0 %vm382_vm2, %v4500_v7 }
0x2094   : > { %7638 = vmatprep.mubr.msk.f32.mxu0 %vm8222_vm0, %v8221_v0  ;;  %7913 = vmatpush3.bf16.msra.mxu0 %v7912_v42 }
0x2095   : > { %7914 = vmatprep.subr.bf16.mxu0 %v8223_v5 }
0x2098   : > { %7916 = vmatpush3.bf16.msra.mxu0 %v7915_v49 }
0x2099   : > { %7641 = vmatprep.subr.mxu0 %v8221_v0 }
0x2166   : > { %v4578_v17 = vpop.f32.mrb[46].mxu0 }
0x2167   : > { %v4579_v18 = vadd.f32 %v4578_v17, %v4508_v12  ;;  %v7610_v22 = vpop.f32.mrb[47].mxu0 }
0x2169   : > { %v4582_v24 = vmax.f32 %v4579_v18, 0.0 }
0x216b   : > { %7628 = vmatmul.mubr.msk.f32.vlgmr.msra.gmra.mrb[50].mxu1 %vm1358_vm11, %v4582_v24 }
0x216c   : > { %7653 = vmatprep.mubr.msk.f32.mxu1 %vm8222_vm0, %v8221_v0 }
0x223e   : > { %v4664_v56 = vpop.f32.mrb[50].mxu1 }
0x223f   : > { %v4665_v20 = vadd.f32 %v4664_v56, %v4594_v44  ;;  %v7629_v28 = vpop.f32.mrb[51].mxu1 }
0x2241   : > { %v4668_v27 = vadd.f32 %v4665_v20, %v4500_v7 }
0x2243   : > { %v4669_v29 = vsel %vm382_vm2, %v4668_v27, 0.0 }
0x2244   : > { %4670 = vadd.xlane.f32.xlu0 %v4669_v29 }
0x22d1   : > { %v4671_v30 = vpop.xlane.xlu0 %4670 }
0x22d2   : > { %v4672_v35 = vmul.f32 0.03125, %v4671_v30 }
0x22d4   : > { %v4673_v25 = vsub.f32 %v4668_v27, %v4672_v35 }
0x22d6   : > { %v4674_v38 = vmul.f32 %v4673_v25, %v4673_v25 }
0x22d8   : > { %v4675_v39 = vsel %vm382_vm2, %v4674_v38, 0.0 }
0x22d9   : > { %4676 = vadd.xlane.f32.xlu0 %v4675_v39 }
0x2366   : > { %v4677_v50 = vpop.xlane.xlu0 %4676 }
0x2367   : > { %v4678_v51 = vmul.f32 0.03125, %v4677_v50 }
0x2369   : > { %v4679_v52 = vadd.f32 1e-05, %v4678_v51 }
0x236b   : > { %8110 = vrsqrt.f32 %v4679_v52 }
0x2375   : > { %v8111_v54 = vpop.eup %8110 }
0x2376   : > { %v4681_v55 = vmul.f32 %v8111_v54, %v4673_v25 }
0x2378   : > { %v4686_v26 = vmul.f32 %v4685_v53, %v4681_v55 }
0x237a   : > { %v9170_v31 = vadd.f32 %v4690_v13, %v4686_v26 }
0x237c   : > { %7639 = vmatmul.mubr.msk.f32.vlgmr.msra.gmra.mrb[48].mxu0 %vm382_vm2, %v9170_v31 }
0x237d   : > { %7643 = vmatprep.mubr.msk.f32.mxu0 %vm8222_vm0, %v8221_v0 }
0x244f   : > { %v4769_v57 = vpop.f32.mrb[48].mxu0 }
0x2450   : > { %v9178_v58 = vadd.f32 %v4769_v57, %v4699_v14  ;;  %v7640_v33 = vpop.f32.mrb[49].mxu0 }
0x2452   : > { %4852 = vrot.lane.b32.xlu0 %v9178_v58, %s9591_s6  ;;  %4774 = vrot.lane.b32.xlu1 %v9178_v58, %s9590_s8 }
0x2456   : > { %4928 = vrot.lane.b32.xlu0 %v9178_v58, %s9595_s9  ;;  %4850 = vrot.lane.b32.xlu1 %v9178_v58, %s9592_s7 }
0x245a   : > { %4930 = vrot.lane.b32.xlu1 %v9178_v58, %s9593_s29 }
0x245e   : > { %5008 = vrot.lane.b32.xlu1 %v9178_v58, %s9594_s27 }
0x2462   : > { %5006 = vrot.lane.b32.xlu1 %v9178_v58, %s9596_s5 }
0x24c4   : > { %v4775_v59 = vpop.permute.xlu1 %4774  ;;  %v4853_v61 = vpop.permute.xlu0 %4852 }
0x24c5   : > { %7642 = vmatpush3.xpose.msk.msra.mxu0 %vm459_vm3, %v4775_v59 }
0x24c6   : > { %7646 = vmatprep.subr.mxu0 %v8221_v0 }
0x24c8   : > { %7644 = vmatmul.mubr.msk.f32.vlgmr.msra.gmra.mrb[50].mxu0 %vm459_vm3, %v9178_v58  ;;  %v4851_v62 = vpop.permute.xlu1 %4850  ;;  %v4929_v1 = vpop.permute.xlu0 %4928 }
0x24c9   : > { %7647 = vmatpush3.xpose.msk.msra.mxu0 %vm459_vm3, %v4853_v61  ;;  %7648 = vmatprep.mubr.msk.f32.mxu0 %vm8222_vm0, %v8221_v0 }
0x24ca   : > { %7656 = vmatprep.subr.mxu0 %v8221_v0 }
0x24cc   : > { %7649 = vmatmul.mubr.msk.f32.vlgmr.msra.gmra.mrb[52].mxu0 %vm459_vm3, %v4851_v62  ;;  %v4931_v63 = vpop.permute.xlu1 %4930 }
0x24cd   : > { %7652 = vmatpush3.xpose.msk.msra.mxu1 %vm459_vm3, %v4931_v63  ;;  %7658 = vmatprep.mubr.msk.f32.mxu0 %vm8222_vm0, %v8221_v0 }
0x24ce   : > { %7661 = vmatprep.subr.mxu1 %v8221_v0 }
0x24d0   : > { %7654 = vmatmul.mubr.msk.f32.vlgmr.msra.gmra.mrb[52].mxu1 %vm459_vm3, %v4929_v1  ;;  %v5009_v2 = vpop.permute.xlu1 %5008 }
0x24d1   : > { %7657 = vmatpush3.xpose.msk.msra.mxu0 %vm459_vm3, %v5009_v2  ;;  %7663 = vmatprep.mubr.msk.f32.mxu1 %vm8222_vm0, %v8221_v0 }
0x24d2   : > { %7666 = vmatprep.subr.mxu0 %v8221_v0 }
0x24d4   : > { %v5007_v3 = vpop.permute.xlu1 %5006 }
0x24d5   : > { %7659 = vmatmul.mubr.msk.f32.vlgmr.msra.gmra.mrb[54].mxu0 %vm459_vm3, %v5007_v3 }
0x24d6   : > { %7668 = vmatprep.mubr.msk.f32.mxu0 %vm8222_vm0, %v8221_v0 }
0x259b   : > { %v4846_v4 = vpop.f32.mrb[50].mxu0 }
0x259c   : > { %v5084_v6 = vmul.f32 0.35355338, %v4846_v4  ;;  %v7645_v7 = vpop.f32.mrb[51].mxu0 }
0x259e   : > { %v5088_v9 = vadd.f32 %v5084_v6, %v8855_v47 }
0x259f   : > { %v4924_v11 = vpop.f32.mrb[52].mxu0 }
0x25a0   : > { %v5085_v21 = vmul.f32 0.35355338, %v4924_v11  ;;  %v7650_v12 = vpop.f32.mrb[53].mxu0  ;;  %v5092_v17 = vsel %vm459_vm3, %v5088_v9, -inf }
0x25a1   : > { %5093 = vmax.xlane.f32.xlu0 %v5092_v17 }
0x25a2   : > { %v5089_v18 = vadd.f32 %v5085_v21, %v8855_v47 }
0x25a3   : > { %v5002_v22 = vpop.f32.mrb[52].mxu1 }
0x25a4   : > { %v5086_v24 = vmul.f32 0.35355338, %v5002_v22  ;;  %v7655_v44 = vpop.f32.mrb[53].mxu1  ;;  %v5095_v56 = vsel %vm459_vm3, %v5089_v18, -inf  ;;  %v5456_v22 = vld [vmem:[%s9538_s2 + $0x148] sm:$0xff] }
0x25a5   : > { %5096 = vmax.xlane.f32.xlu1 %v5095_v56  ;;  %v5457_v44 = vld [vmem:[%s9538_s2 + $0x150] sm:$0xff]  ;;  %v5458_v56 = vld [vmem:[%s9538_s2 + $0x158] sm:$0xff] }
0x25a6   : > { %v5090_v20 = vadd.f32 %v5086_v24, %v8855_v47 }
0x25a8   : > { %v5080_v28 = vpop.f32.mrb[54].mxu0  ;;  %v5098_v27 = vsel %vm459_vm3, %v5090_v20, -inf }
0x25a9   : > { %v5087_v29 = vmul.f32 0.35355338, %v5080_v28  ;;  %v7660_v30 = vpop.f32.mrb[55].mxu0  ;;  %5099 = vmax.xlane.f32.xlu0 %v5098_v27 }
0x25ab   : > { %v5091_v35 = vadd.f32 %v5087_v29, %v8855_v47 }
0x25ad   : > { %v5101_v25 = vsel %vm459_vm3, %v5091_v35, -inf }
0x25ae   : > { %5102 = vmax.xlane.f32.xlu0 %v5101_v25 }
0x25b6   : > { %5212 = vrot.lane.b32.xlu1 %v9178_v58, %s9582_s11  ;;  %s201_s11 = scalar_lea.vmem [#allocation2], %s6909_s21 }
0x25ba   : > { %5288 = vrot.lane.b32.xlu1 %v9178_v58, %s9585_s28 }
0x262e   : > { %v5094_v38 = vpop.xlane.xlu0 %5093 }
0x262f   : > { %v5104_v39 = vsub.f32 %v5088_v9, %v5094_v38 }
0x2631   : > { %v5108_v40 = vmul.f32 1.442695, %v5104_v39 }
0x2632   : > { %v5097_v41 = vpop.xlane.xlu1 %5096 }
0x2633   : > { %8112 = vpow2.f32 %v5108_v40  ;;  %v5105_v42 = vsub.f32 %v5089_v18, %v5097_v41  ;;  %v5455_v18 = vld [vmem:[%s9538_s2 + $0x140] sm:$0xff] }
0x2634   : > { %v7918_v24 = vpack.c.bf16 %v5456_v22, %v5455_v18  ;;  %v5553_v22 = vrot.slane %v9164_v43, %v8532_v32 }
0x2635   : > { %v5110_v46 = vmul.f32 1.442695, %v5105_v42 }
0x2636   : > { %v5213_v48 = vpop.permute.xlu1 %5212  ;;  %v5100_v49 = vpop.xlane.xlu0 %5099 }
0x2637   : > { %8114 = vpow2.f32 %v5110_v46  ;;  %v5106_v47 = vsub.f32 %v5090_v20, %v5100_v49  ;;  %7667 = vmatpush3.msra.mxu0 %v5213_v48  ;;  %v7921_v20 = vpack.c.bf16 %v5458_v56, %v5457_v44  ;;  %v5558_v56 = vrot.slane %v9164_v43, %v8540_v34 }
0x2638   : > { %7676 = vmatprep.subr.mxu0 %v8221_v0 }
0x2639   : > { %v5112_v50 = vmul.f32 1.442695, %v5106_v47  ;;  %v5462_v47 = vrot.slane %v9077_v19, %v8489_v60 }
0x263a   : > { %v5289_v61 = vpop.permute.xlu1 %5288 }
0x263b   : > { %8116 = vpow2.f32 %v5112_v50  ;;  %v5103_v51 = vpop.xlane.xlu0 %5102 }
0x263c   : > { %v5107_v52 = vsub.f32 %v5091_v35, %v5103_v51 }
0x263d   : > { %v8113_v53 = vpop.eup %8112 }
0x263e   : > { %v5114_v54 = vmul.f32 1.442695, %v5107_v52  ;;  %v5116_v55 = vsel %vm459_vm3, %v8113_v53, 0.0 }
0x263f   : > { %5117 = vadd.xlane.f32.xlu0 %v5116_v55  ;;  %v5562_v55 = vld [vmem:[%s9538_s2 + $0x170] sm:$0xff] }
0x2640   : > { %8118 = vpow2.f32 %v5114_v54 }
0x2641   : > { %v8115_v13 = vpop.eup %8114 }
0x2642   : > { %v5119_v26 = vsel %vm459_vm3, %v8115_v13, 0.0 }
0x2643   : > { %5120 = vadd.xlane.f32.xlu1 %v5119_v26 }
0x2645   : > { %v8117_v14 = vpop.eup %8116 }
0x2646   : > { %v5122_v57 = vsel %vm459_vm3, %v8117_v14, 0.0 }
0x2647   : > { %5123 = vadd.xlane.f32.xlu0 %v5122_v57 }
0x264a   : > { %v8119_v33 = vpop.eup %8118 }
0x264b   : > { %v5125_v59 = vsel %vm459_vm3, %v8119_v33, 0.0 }
0x264c   : > { %5126 = vadd.xlane.f32.xlu1 %v5125_v59  ;;  %v5560_v59 = vld [vmem:[%s9538_s2 + $0x160] sm:$0xff] }
0x265d   : > { %5136 = vrot.lane.b32.xlu0 %v9178_v58, %s9583_s22  ;;  %5364 = vrot.lane.b32.xlu1 %v9178_v58, %s9584_s23  ;;  %s6834_s22 = sshll.u32 %s201_s11, 4  ;;  %s9496_s22 = int_to_ptr.vmem [resolvable:$true] %s6834_s22 }
0x26cc   : > { %v5118_v62 = vpop.xlane.xlu0 %5117 }
0x26cd   : > { %8120 = vrcp.f32 %v5118_v62 }
0x26d0   : > { %v5121_v63 = vpop.xlane.xlu1 %5120 }
0x26d1   : > { %8122 = vrcp.f32 %v5121_v63 }
0x26d4   : > { %v5124_v1 = vpop.xlane.xlu0 %5123 }
0x26d5   : > { %8124 = vrcp.f32 %v5124_v1 }
0x26d7   : > { %v8121_v2 = vpop.eup %8120 }
0x26d8   : > { %v5129_v3 = vmul.f32 %v8121_v2, %v8113_v53  ;;  %v5137_v4 = vpop.permute.xlu0 %5136  ;;  %v5567_v2 = vrot.slane %v9136_v36, %v8362_v15 }
0x26d9   : > { %v5127_v6 = vpop.xlane.xlu1 %5126  ;;  %7662 = vmatpush3.msra.mxu1 %v5137_v4 }
0x26da   : > { %8126 = vrcp.f32 %v5127_v6  ;;  %7664 = vmatmul.mubr.msk.f32.vlgmr.msra.gmra.mrb[54].mxu1 %vm459_vm3, %v5129_v3  ;;  %7671 = vmatprep.subr.mxu1 %v8221_v0 }
0x26db   : > { %v8123_v7 = vpop.eup %8122  ;;  %7672 = vmatpush3.msra.mxu1 %v5289_v61  ;;  %7673 = vmatprep.mubr.msk.f32.mxu1 %vm8222_vm0, %v8221_v0  ;;  %v5561_v61 = vld [vmem:[%s9538_s2 + $0x168] sm:$0xff] }
0x26dc   : > { %v5131_v58 = vmul.f32 %v8123_v7, %v8115_v13  ;;  %7917 = vmatprep.subr.bf16.mxu1 %v8223_v5  ;;  %v5563_v13 = vld [vmem:[%s9538_s2 + $0x178] sm:$0xff]  ;;  %v8028_v62 = vpack.i.bf16 %v5561_v61, %v5560_v59  ;;  %v7924_v63 = vpack.c.bf16 %v5561_v61, %v5560_v59 }
0x26dd   : > { %v5365_v9 = vpop.permute.xlu1 %5364  ;;  %v8033_v26 = vpack.i.bf16 %v5563_v13, %v5562_v55  ;;  %v7927_v1 = vpack.c.bf16 %v5563_v13, %v5562_v55 }
0x26de   : > { %7669 = vmatmul.mubr.msk.f32.vlgmr.msra.gmra.mrb[56].mxu0 %vm459_vm3, %v5131_v58 }
0x26df   : > { %v8125_v11 = vpop.eup %8124  ;;  %7677 = vmatpush3.msra.mxu0 %v5365_v9  ;;  %7678 = vmatprep.mubr.msk.f32.mxu0 %vm8222_vm0, %v8221_v0 }
0x26e0   : > { %v5133_v21 = vmul.f32 %v8125_v11, %v8117_v14  ;;  %7923 = vmatprep.subr.bf16.mxu0 %v8223_v5 }
0x26e2   : > { %7674 = vmatmul.mubr.msk.f32.vlgmr.msra.gmra.mrb[56].mxu1 %vm459_vm3, %v5133_v21 }
0x26e3   : > { %7689 = vmatprep.mubr.msk.f32.mxu1 %vm8222_vm0, %v8221_v0  ;;  %7919 = vmatpush3.bf16.msra.mxu1 %v7918_v24 }
0x26e4   : > { %v8127_v12 = vpop.eup %8126  ;;  %7920 = vmatprep.subr.bf16.mxu1 %v8223_v5 }
0x26e5   : > { %v5135_v17 = vmul.f32 %v8127_v12, %v8119_v33 }
0x26e7   : > { %7679 = vmatmul.mubr.msk.f32.vlgmr.msra.gmra.mrb[58].mxu0 %vm459_vm3, %v5135_v17  ;;  %7922 = vmatpush3.bf16.msra.mxu1 %v7921_v20 }
0x26e8   : > { %7700 = vmatprep.mubr.msk.f32.mxu0 %vm8222_vm0, %v8221_v0  ;;  %7929 = vmatprep.subr.bf16.mxu1 %v8223_v5 }
0x26e9   : > { %7925 = vmatpush3.bf16.msra.mxu0 %v7924_v63 }
0x26ea   : > { %7926 = vmatprep.subr.bf16.mxu0 %v8223_v5 }
0x26ed   : > { %7928 = vmatpush3.bf16.msra.mxu0 %v7927_v1 }
0x26ee   : > { %7714 = vmatprep.subr.mxu0 %v8221_v0 }
0x27ad   : > { %v5208_v28 = vpop.f32.mrb[54].mxu1 }
0x27ae   : > { %v7665_v27 = vpop.f32.mrb[55].mxu1 }
0x27b1   : > { %v5284_v29 = vpop.f32.mrb[56].mxu0 }
0x27b2   : > { %v7670_v30 = vpop.f32.mrb[57].mxu0  ;;  %5441 = vrot.lane.b32.xlu0 %v5284_v29, %s9586_s20 }
0x27b5   : > { %v5360_v35 = vpop.f32.mrb[56].mxu1 }
0x27b6   : > { %5445 = vrot.lane.b32.xlu1 %v5360_v35, %s9588_s14  ;;  %v7675_v25 = vpop.f32.mrb[57].mxu1 }
0x27ba   : > { %v5436_v38 = vpop.f32.mrb[58].mxu0 }
0x27bb   : > { %5449 = vrot.lane.b32.xlu0 %v5436_v38, %s9587_s13  ;;  %v7680_v39 = vpop.f32.mrb[59].mxu0 }
0x2824   : > { %v5442_v40 = vpop.permute.xlu0 %5441 }
0x2825   : > { %v5452_v42 = vsel %vm459_vm3, %v5208_v28, %v5442_v40 }
0x2828   : > { %v5446_v41 = vpop.permute.xlu1 %5445 }
0x2829   : > { %v5453_v46 = vsel %vm219_vm1, %v5452_v42, %v5446_v41 }
0x282d   : > { %v5450_v48 = vpop.permute.xlu0 %5449 }
0x282e   : > { %v5454_v49 = vsel %vm1155_vm9, %v5453_v46, %v5450_v48 }
0x282f   : > { %7690 = vmatmul.mubr.msk.f32.vlgmr.msra.gmra.mrb[58].mxu1 %vm382_vm2, %v5454_v49 }
0x2830   : > { %7711 = vmatprep.mubr.msk.f32.mxu1 %vm8222_vm0, %v8221_v0 }
0x2902   : > { %v5532_v50 = vpop.f32.mrb[58].mxu1 }
0x2903   : > { %v5533_v51 = vadd.f32 %v5532_v50, %v5462_v47  ;;  %v7691_v52 = vpop.f32.mrb[59].mxu1 }
0x2905   : > { %v5536_v53 = vadd.f32 %v5533_v51, %v9170_v31 }
0x2907   : > { %v5537_v54 = vsel %vm382_vm2, %v5536_v53, 0.0 }
0x2908   : > { %5538 = vadd.xlane.f32.xlu1 %v5537_v54 }
0x2919   : > { %8034 = vrot.lane.b32.xlu1 %v8033_v26, %s9590_s8 }
0x291d   : > { %5658 = vrot.lane.b32.xlu1 %v5567_v2, %s9590_s8 }
0x2995   : > { %v5539_v19 = vpop.xlane.xlu1 %5538 }
0x2996   : > { %v5540_v14 = vmul.f32 0.03125, %v5539_v19 }
0x2998   : > { %v5541_v57 = vsub.f32 %v5536_v53, %v5540_v14 }
0x2999   : > { %v8035_v6 = vpop.permute.xlu1 %8034 }
0x299a   : > { %v5542_v33 = vmul.f32 %v5541_v57, %v5541_v57  ;;  %v8037_v9 = vunpack.i.h.bf16 %v8035_v6  ;;  %v8036_v12 = vunpack.i.l.bf16 %v8035_v6 }
0x299c   : > { %v5543_v31 = vsel %vm382_vm2, %v5542_v33, 0.0  ;;  %v7933_v18 = vpack.c.bf16 %v8037_v9, %v8036_v12 }
0x299d   : > { %5544 = vadd.xlane.f32.xlu0 %v5543_v31  ;;  %v5659_v32 = vpop.permute.xlu1 %5658 }
0x29b3   : > { %8029 = vrot.lane.b32.xlu0 %v8028_v62, %s9590_s8 }
0x2a2a   : > { %v5545_v3 = vpop.xlane.xlu0 %5544 }
0x2a2b   : > { %v5546_v4 = vmul.f32 0.03125, %v5545_v3 }
0x2a2d   : > { %v5547_v7 = vadd.f32 1e-05, %v5546_v4 }
0x2a2e   : > { %v8030_v58 = vpop.permute.xlu0 %8029 }
0x2a2f   : > { %8128 = vrsqrt.f32 %v5547_v7  ;;  %v8032_v11 = vunpack.i.h.bf16 %v8030_v58  ;;  %v8031_v21 = vunpack.i.l.bf16 %v8030_v58 }
0x2a31   : > { %v7930_v17 = vpack.c.bf16 %v8032_v11, %v8031_v21 }
0x2a33   : > { %7931 = vmatpush3.bf16.msra.mxu1 %v7930_v17 }
0x2a34   : > { %7932 = vmatprep.subr.bf16.mxu1 %v8223_v5 }
0x2a37   : > { %7934 = vmatpush3.bf16.msra.mxu1 %v7933_v18 }
0x2a38   : > { %7724 = vmatprep.subr.mxu1 %v8221_v0 }
0x2a39   : > { %v8129_v24 = vpop.eup %8128 }
0x2a3a   : > { %v5549_v44 = vmul.f32 %v8129_v24, %v5541_v57  ;;  %7712 = vmatmul.mubr.msk.f32.vlgmr.msra.gmra.mrb[60].mxu1 %vm382_vm2, %v8962_v37 }
0x2a3b   : > { %7726 = vmatprep.mubr.msk.f32.mxu1 %vm8222_vm0, %v8221_v0 }
0x2a3c   : > { %v5554_v20 = vmul.f32 %v5553_v22, %v5549_v44 }
0x2a3e   : > { %v9308_v28 = vadd.f32 %v5558_v56, %v5554_v20 }
0x2a40   : > { %7701 = vmatmul.mubr.msk.f32.vlgmr.msra.gmra.mrb[60].mxu0 %vm382_vm2, %v9308_v28 }
0x2a41   : > { %7716 = vmatprep.mubr.msk.f32.mxu0 %vm8222_vm0, %v8221_v0 }
0x2b0d   : > { %v5727_v27 = vpop.f32.mrb[60].mxu1 }
0x2b0e   : > { %v9314_v29 = vadd.f32 %v5727_v27, %v5659_v32  ;;  %v7713_v37 = vpop.f32.mrb[61].mxu1 }
0x2b10   : > { %5965 = vrot.lane.b32.xlu1 %v9314_v29, %s9596_s5  ;;  %5809 = vrot.lane.b32.xlu0 %v9314_v29, %s9592_s7 }
0x2b11   : > { %7715 = vmatpush3.xpose.msk.msra.mxu0 %vm459_vm3, %v9314_v29 }
0x2b12   : > { %7719 = vmatprep.subr.mxu0 %v8221_v0 }
0x2b13   : > { %v5637_v34 = vpop.f32.mrb[60].mxu0 }
0x2b14   : > { %v5638_v30 = vadd.f32 %v5637_v34, %v5567_v2  ;;  %v7702_v35 = vpop.f32.mrb[61].mxu0  ;;  %5887 = vrot.lane.b32.xlu0 %v9314_v29, %s9595_s9 }
0x2b16   : > { %5807 = vrot.lane.b32.xlu1 %v5638_v30, %s9592_s7  ;;  %7717 = vmatmul.mubr.msk.f32.vlgmr.msra.gmra.mrb[62].mxu0 %vm459_vm3, %v5638_v30  ;;  %s6821_s7 = scalar_lea.sflag [#allocation3], %s199_s17 }
0x2b17   : > { %7721 = vmatprep.mubr.msk.f32.mxu0 %vm8222_vm0, %v8221_v0 }
0x2b18   : > { %5885 = vrot.lane.b32.xlu0 %v5638_v30, %s9595_s9 }
0x2b1a   : > { %5963 = vrot.lane.b32.xlu1 %v5638_v30, %s9596_s5 }
0x2b82   : > { %v5810_v25 = vpop.permute.xlu0 %5809  ;;  %v5966_v38 = vpop.permute.xlu1 %5965 }
0x2b83   : > { %7720 = vmatpush3.xpose.msk.msra.mxu0 %vm459_vm3, %v5810_v25 }
0x2b84   : > { %7729 = vmatprep.subr.mxu0 %v8221_v0 }
0x2b86   : > { %v5888_v39 = vpop.permute.xlu0 %5887 }
0x2b87   : > { %7725 = vmatpush3.xpose.msk.msra.mxu1 %vm459_vm3, %v5888_v39 }
0x2b88   : > { %v5808_v40 = vpop.permute.xlu1 %5807  ;;  %7734 = vmatprep.subr.mxu1 %v8221_v0 }
0x2b89   : > { %7722 = vmatmul.mubr.msk.f32.vlgmr.msra.gmra.mrb[64].mxu0 %vm459_vm3, %v5808_v40 }
0x2b8a   : > { %7730 = vmatpush3.xpose.msk.msra.mxu0 %vm459_vm3, %v5966_v38  ;;  %v5886_v41 = vpop.permute.xlu0 %5885  ;;  %7731 = vmatprep.mubr.msk.f32.mxu0 %vm8222_vm0, %v8221_v0 }
0x2b8b   : > { %7727 = vmatmul.mubr.msk.f32.vlgmr.msra.gmra.mrb[62].mxu1 %vm459_vm3, %v5886_v41  ;;  %7739 = vmatprep.subr.mxu0 %v8221_v0 }
0x2b8c   : > { %v5964_v42 = vpop.permute.xlu1 %5963  ;;  %7736 = vmatprep.mubr.msk.f32.mxu1 %vm8222_vm0, %v8221_v0 }
0x2b8d   : > { %7732 = vmatmul.mubr.msk.f32.vlgmr.msra.gmra.mrb[66].mxu0 %vm459_vm3, %v5964_v42 }
0x2b8e   : > { %7741 = vmatprep.mubr.msk.f32.mxu0 %vm8222_vm0, %v8221_v0 }
0x2be9   : > { %v5803_v46 = vpop.f32.mrb[62].mxu0 }
0x2bea   : > { %v6041_v48 = vmul.f32 0.35355338, %v5803_v46  ;;  %v7718_v49 = vpop.f32.mrb[63].mxu0 }
0x2bec   : > { %v6045_v47 = vadd.f32 %v6041_v48, %v8422_v45 }
0x2bee   : > { %v6049_v50 = vsel %vm793_vm7, %v6045_v47, -inf }
0x2bef   : > { %6050 = vmax.xlane.f32.xlu0 %v6049_v50  ;;  %v6417_v50 = vld [vmem:[%s9538_s2 + $0x188] sm:$0xff] }
0x2c5c   : > { %v5881_v51 = vpop.f32.mrb[64].mxu0 }
0x2c5d   : > { %v6042_v52 = vmul.f32 0.35355338, %v5881_v51  ;;  %v7723_v53 = vpop.f32.mrb[65].mxu0  ;;  %v6418_v51 = vld [vmem:[%s9538_s2 + $0x190] sm:$0xff] }
0x2c5e   : > { %v5959_v54 = vpop.f32.mrb[62].mxu1  ;;  %v6419_v53 = vld [vmem:[%s9538_s2 + $0x198] sm:$0xff] }
0x2c5f   : > { %v6046_v55 = vadd.f32 %v6042_v52, %v8422_v45  ;;  %v6043_v13 = vmul.f32 0.35355338, %v5959_v54  ;;  %v7728_v26 = vpop.f32.mrb[63].mxu1  ;;  %v7939_v54 = vpack.c.bf16 %v6419_v53, %v6418_v51 }
0x2c60   : > { %v6037_v19 = vpop.f32.mrb[66].mxu0 }
0x2c61   : > { %v6047_v14 = vadd.f32 %v6043_v13, %v8422_v45  ;;  %v6044_v57 = vmul.f32 0.35355338, %v6037_v19  ;;  %v7733_v33 = vpop.f32.mrb[67].mxu0  ;;  %v6052_v31 = vsel %vm793_vm7, %v6046_v55, -inf }
0x2c62   : > { %6053 = vmax.xlane.f32.xlu1 %v6052_v31 }
0x2c63   : > { %v6048_v59 = vadd.f32 %v6044_v57, %v8422_v45  ;;  %v6055_v61 = vsel %vm793_vm7, %v6047_v14, -inf }
0x2c64   : > { %6056 = vmax.xlane.f32.xlu0 %v6055_v61 }
0x2c65   : > { %v6058_v62 = vsel %vm793_vm7, %v6048_v59, -inf }
0x2c68   : > { %6059 = vmax.xlane.f32.xlu0 %v6058_v62 }
0x2c7c   : > { %v6051_v63 = vpop.xlane.xlu0 %6050 }
0x2c7d   : > { %v6061_v1 = vsub.f32 %v6045_v47, %v6051_v63  ;;  %v6416_v47 = vld [vmem:[%s9538_s2 + $0x180] sm:$0xff] }
0x2c7e   : > { %v7936_v52 = vpack.c.bf16 %v6417_v50, %v6416_v47 }
0x2c7f   : > { %v6065_v2 = vmul.f32 1.442695, %v6061_v1 }
0x2c81   : > { %8130 = vpow2.f32 %v6065_v2 }
0x2c8b   : > { %v8131_v3 = vpop.eup %8130 }
0x2c8c   : > { %v6073_v4 = vsel %vm793_vm7, %v8131_v3, 0.0 }
0x2c8d   : > { %6074 = vadd.xlane.f32.xlu0 %v6073_v4 }
0x2cef   : > { %v6054_v6 = vpop.xlane.xlu1 %6053 }
0x2cf0   : > { %v6062_v7 = vsub.f32 %v6046_v55, %v6054_v6 }
0x2cf1   : > { %v6057_v58 = vpop.xlane.xlu0 %6056 }
0x2cf2   : > { %v6067_v9 = vmul.f32 1.442695, %v6062_v7  ;;  %v6063_v11 = vsub.f32 %v6047_v14, %v6057_v58 }
0x2cf4   : > { %8132 = vpow2.f32 %v6067_v9  ;;  %v6069_v45 = vmul.f32 1.442695, %v6063_v11 }
0x2cf5   : > { %v6060_v22 = vpop.xlane.xlu0 %6059 }
0x2cf6   : > { %8134 = vpow2.f32 %v6069_v45  ;;  %v6064_v24 = vsub.f32 %v6048_v59, %v6060_v22 }
0x2cf8   : > { %v6071_v44 = vmul.f32 1.442695, %v6064_v24  ;;  %v6524_v24 = vld [vmem:[%s9538_s2 + $0x2d8] sm:$0xff] }
0x2cfa   : > { %8136 = vpow2.f32 %v6071_v44 }
0x2cfe   : > { %v8133_v21 = vpop.eup %8132 }
0x2cff   : > { %v6076_v12 = vsel %vm793_vm7, %v8133_v21, 0.0 }
0x2d00   : > { %v8135_v17 = vpop.eup %8134  ;;  %6077 = vadd.xlane.f32.xlu1 %v6076_v12 }
0x2d01   : > { %v6079_v18 = vsel %vm793_vm7, %v8135_v17, 0.0 }
0x2d02   : > { %6080 = vadd.xlane.f32.xlu0 %v6079_v18  ;;  %v6521_v18 = vld [vmem:[%s9538_s2 + $0x2c0] sm:$0xff] }
0x2d04   : > { %v8137_v56 = vpop.eup %8136 }
0x2d05   : > { %v6082_v20 = vsel %vm793_vm7, %v8137_v56, 0.0 }
0x2d11   : > { %6170 = vrot.lane.b32.xlu1 %v9314_v29, %s9591_s6  ;;  %s9494_s6 = scalar_lea.hbm %s9540_s4, %s7030_s24 }
0x2d15   : > { %6247 = vrot.lane.b32.xlu1 %v9314_v29, %s9593_s29  ;;  %s8157_s29 = scalar_lea.vmem %s9496_s22, 64 }
0x2d16   : > { %p8158_p11 = scmp.ne.s32.totalorder %s9496_s22, %s8157_s29 }
0x2d18   : > { %6093 = vrot.lane.b32.xlu0 %v9314_v29, %s9590_s8  ;;  %p8159_p12 = pnand %p8158_p11, %p8305_p5 }
0x2d1a   : > { %v6075_v32 = vpop.xlane.xlu0 %6074  ;;  %p8160_p13 = pneg %p8159_p12 }
0x2d1b   : > { %8138 = vrcp.f32 %v6075_v32  ;;  %v6605_v32 = vld [vmem:[%s9538_s2 + $0x2f0] sm:$0xff] }
0x2d25   : > { %v8139_v34 = vpop.eup %8138 }
0x2d26   : > { %v6086_v35 = vmul.f32 %v8139_v34, %v8131_v3  ;;  %v6423_v3 = vrot.slane %v9136_v36, %v8710_v8  ;;  %v6522_v36 = vld [vmem:[%s9538_s2 + $0x2c8] sm:$0xff] }
0x2d27   : > { %v7942_v22 = vpack.c.bf16 %v6522_v36, %v6521_v18  ;;  %v8240_v18 = vmov 0  }
0x2d28   : > { %8038 = vset.pattern.permute.xlu1 %v8240_v18  ;;  %8039 = vset.pattern.permute.xlu0 %v8240_v18 }
0x2d39   : > { %6083 = vadd.xlane.f32.xlu1 %v6082_v20  ;;  %v6604_v20 = vld [vmem:[%s9538_s2 + $0x2e8] sm:$0xff] }
0x2d4a   : > { %6324 = vrot.lane.b32.xlu1 %v9314_v29, %s9594_s27  ;;  %s8161_s27 = sshll.u32 %s8241_s19, 4  ;;  %s8162_s27 = int_to_ptr.vmem [resolvable:$false] %s8161_s27 }
0x2d4b   : > { %s8163_s9 = scalar_lea.vmem %s8162_s27, 128  ;;  %p8164_p0 = scmp.lt.s32.totalorder %s9496_s22, %s8162_s27 }
0x2d4c   : > { %p8165_p1 = scmp.lt.s32.totalorder %s8163_s9, %s8157_s29 }
0x2d4e   : > { %p8166_p2 = por %p8165_p1, %p8164_p0 }
0x2d50   : > { %p8167_p3 = pnand %p8166_p2, %p8160_p13 }
0x2d8d   : > { %v6078_v27 = vpop.xlane.xlu1 %6077 }
0x2d8e   : > { %8140 = vrcp.f32 %v6078_v27 }
0x2d8f   : > { %v6081_v37 = vpop.xlane.xlu0 %6080 }
0x2d90   : > { %8142 = vrcp.f32 %v6081_v37  ;;  %v6606_v37 = vld [vmem:[%s9538_s2 + $0x2f8] sm:$0xff] }
0x2d91   : > { %v6171_v30 = vpop.permute.xlu1 %6170  ;;  %v7951_v34 = vpack.c.bf16 %v6606_v37, %v6605_v32 }
0x2d92   : > { %7740 = vmatpush3.msk.msra.mxu0 %vm777_vm5, %v6171_v30  ;;  %v6607_v30 = vld [vmem:[%s9538_s2 + $0x300] sm:$0xff] }
0x2d93   : > { %v6094_v25 = vpop.permute.xlu0 %6093  ;;  %7749 = vmatprep.subr.mxu0 %v8221_v0 }
0x2d94   : > { %7735 = vmatpush3.msk.msra.mxu1 %vm777_vm5, %v6094_v25 }
0x2d95   : > { %v6248_v38 = vpop.permute.xlu1 %6247  ;;  %7737 = vmatmul.mubr.msk.f32.vlgmr.msra.gmra.mrb[64].mxu1 %vm793_vm7, %v6086_v35  ;;  %7744 = vmatprep.subr.mxu1 %v8221_v0  ;;  %v6608_v35 = vld [vmem:[%s9538_s2 + $0x308] sm:$0xff] }
0x2d96   : > { %7745 = vmatpush3.msk.msra.mxu1 %vm777_vm5, %v6248_v38  ;;  %7746 = vmatprep.mubr.msk.f32.mxu1 %vm8222_vm0, %v8221_v0  ;;  %v7954_v25 = vpack.c.bf16 %v6608_v35, %v6607_v30 }
0x2d97   : > { %7935 = vmatprep.subr.bf16.mxu1 %v8223_v5 }
0x2d98   : > { %v8141_v29 = vpop.eup %8140 }
0x2d99   : > { %v6088_v39 = vmul.f32 %v8141_v29, %v8133_v21 }
0x2d9a   : > { %v8143_v40 = vpop.eup %8142 }
0x2d9b   : > { %v6090_v41 = vmul.f32 %v8143_v40, %v8135_v17  ;;  %7742 = vmatmul.mubr.msk.f32.vlgmr.msra.gmra.mrb[68].mxu0 %vm793_vm7, %v6088_v39  ;;  %v6514_v40 = vrot.slane %v9164_v43, %v8585_v16  ;;  %v6610_v16 = vld [vmem:[%s9538_s2 + $0x318] sm:$0xff] }
0x2d9c   : > { %7751 = vmatprep.mubr.msk.f32.mxu0 %vm8222_vm0, %v8221_v0 }
0x2d9d   : > { %7747 = vmatmul.mubr.msk.f32.vlgmr.msra.gmra.mrb[66].mxu1 %vm793_vm7, %v6090_v41 }
0x2d9e   : > { %7762 = vmatprep.mubr.msk.f32.mxu1 %vm8222_vm0, %v8221_v0  ;;  %7937 = vmatpush3.bf16.msra.mxu1 %v7936_v52 }
0x2d9f   : > { %7938 = vmatprep.subr.bf16.mxu1 %v8223_v5 }
0x2da2   : > { %7940 = vmatpush3.bf16.msra.mxu1 %v7939_v54 }
0x2da3   : > { %7947 = vmatprep.subr.bf16.mxu1 %v8223_v5 }
0x2dc6   : > { %v6084_v42 = vpop.xlane.xlu1 %6083 }
0x2dc7   : > { %8144 = vrcp.f32 %v6084_v42 }
0x2dca   : > { %v6325_v46 = vpop.permute.xlu1 %6324 }
0x2dcb   : > { %7750 = vmatpush3.msk.msra.mxu0 %vm777_vm5, %v6325_v46  ;;  %v6519_v46 = vrot.slane %v9164_v43, %v8588_v10  ;;  %v8155_v10 = vld [vmem:[%s9539_s3 + $0x28] sm:$0xff] }
0x2dcc   : > { %7941 = vmatprep.subr.bf16.mxu0 %v8223_v5  ;;  %v6528_v50 = vrot.slane %v8155_v10, %v8362_v15  ;;  %v6614_v54 = vrot.slane %v8155_v10, %v8710_v8 }
0x2dd1   : > { %v8145_v48 = vpop.eup %8144 }
0x2dd2   : > { %v6092_v49 = vmul.f32 %v8145_v48, %v8137_v56  ;;  %v6603_v56 = vld [vmem:[%s9538_s2 + $0x2e0] sm:$0xff] }
0x2dd3   : > { %v7948_v27 = vpack.c.bf16 %v6604_v20, %v6603_v56 }
0x2dd4   : > { %7752 = vmatmul.mubr.msk.f32.vlgmr.msra.gmra.mrb[70].mxu0 %vm793_vm7, %v6092_v49 }
0x2dd5   : > { %7773 = vmatprep.mubr.msk.f32.mxu0 %vm8222_vm0, %v8221_v0  ;;  %7943 = vmatpush3.bf16.msra.mxu0 %v7942_v22  ;;  %v217_v22 = vld [vmem:[%s9539_s3 + $0x40] sm:$0xff] }
0x2dd6   : > { %7944 = vmatprep.subr.bf16.mxu0 %v8223_v5  ;;  %v6733_v56 = vrot.slane %v217_v22, %v8710_v8 }
0x2e68   : > { %v6166_v55 = vpop.f32.mrb[64].mxu1 }
0x2e69   : > { %v7738_v13 = vpop.f32.mrb[65].mxu1 }
0x2e6e   : > { %v6243_v26 = vpop.f32.mrb[68].mxu0 }
0x2e6f   : > { %v7743_v19 = vpop.f32.mrb[69].mxu0  ;;  %6402 = vrot.lane.b32.xlu0 %v6243_v26, %s9586_s20 }
0x2e70   : > { %v6320_v14 = vpop.f32.mrb[66].mxu1 }
0x2e71   : > { %6406 = vrot.lane.b32.xlu1 %v6320_v14, %s9588_s14  ;;  %v7748_v57 = vpop.f32.mrb[67].mxu1 }
0x2ea7   : > { %v6397_v33 = vpop.f32.mrb[70].mxu0 }
0x2ea8   : > { %6410 = vrot.lane.b32.xlu0 %v6397_v33, %s9587_s13  ;;  %v7753_v31 = vpop.f32.mrb[71].mxu0 }
0x2ee1   : > { %v6403_v59 = vpop.permute.xlu0 %6402 }
0x2ee2   : > { %v6413_v61 = vsel %vm459_vm3, %v6166_v55, %v6403_v59 }
0x2ee3   : > { %v6407_v62 = vpop.permute.xlu1 %6406 }
0x2ee4   : > { %v6414_v63 = vsel %vm219_vm1, %v6413_v61, %v6407_v62 }
0x2f1a   : > { %v6411_v1 = vpop.permute.xlu0 %6410 }
0x2f1b   : > { %v6415_v2 = vsel %vm1155_vm9, %v6414_v63, %v6411_v1 }
0x2f1c   : > { %7763 = vmatmul.mubr.msk.f32.vlgmr.msra.gmra.mrb[68].mxu1 %vm382_vm2, %v6415_v2  ;;  %v6705_v2 = vrot.slane %v9164_v43, %v8378_v23  ;;  %v8156_v23 = vld [vmem:[%s9539_s3 + $0x10] sm:$0xff] }
0x2f1d   : > { %7792 = vmatprep.mubr.msk.f32.mxu1 %vm8222_vm0, %v8221_v0  ;;  %7949 = vmatpush3.bf16.msra.mxu1 %v7948_v27  ;;  %v6735_v27 = vld [vmem:[%s9538_s2 + $0x18] sm:$0xf] }
0x2f1e   : > { %7950 = vmatprep.subr.bf16.mxu1 %v8223_v5 }
0x2f21   : > { %7952 = vmatpush3.bf16.msra.mxu1 %v7951_v34 }
0x2f22   : > { %7953 = vmatprep.subr.bf16.mxu1 %v8223_v5 }
0x2f25   : > { %7955 = vmatpush3.bf16.msra.mxu1 %v7954_v25 }
0x2f26   : > { %7956 = vmatprep.subr.bf16.mxu1 %v8223_v5  ;;  %v6609_v5 = vld [vmem:[%s9538_s2 + $0x310] sm:$0xff] }
0x2f27   : > { %v7957_v47 = vpack.c.bf16 %v6610_v16, %v6609_v5 }
0x2f29   : > { %7958 = vmatpush3.bf16.msra.mxu1 %v7957_v47 }
0x2fef   : > { %v6493_v4 = vpop.f32.mrb[68].mxu1 }
0x2ff0   : > { %v6494_v6 = vadd.f32 %v6493_v4, %v6423_v3  ;;  %v7764_v7 = vpop.f32.mrb[69].mxu1 }
0x2ff2   : > { %v6497_v58 = vadd.f32 %v6494_v6, %v9308_v28  ;;  %v6523_v28 = vld [vmem:[%s9538_s2 + $0x2d0] sm:$0xff]  ;;  %v6710_v6 = vrot.slane %v9164_v43, %v8489_v60 }
0x2ff3   : > { %v7945_v44 = vpack.c.bf16 %v6524_v24, %v6523_v28  ;;  %v6728_v28 = vrot.slane %v217_v22, %v8362_v15 }
0x2ff4   : > { %v6498_v9 = vsel %vm382_vm2, %v6497_v58, 0.0 }
0x2ff5   : > { %6499 = vadd.xlane.f32.xlu1 %v6498_v9  ;;  %7946 = vmatpush3.bf16.msra.mxu0 %v7945_v44 }
0x2ff6   : > { %7795 = vmatprep.subr.mxu0 %v8221_v0 }
0x3082   : > { %v6500_v11 = vpop.xlane.xlu1 %6499 }
0x3083   : > { %v6501_v45 = vmul.f32 0.03125, %v6500_v11 }
0x3085   : > { %v6502_v21 = vsub.f32 %v6497_v58, %v6501_v45 }
0x3087   : > { %v6503_v12 = vmul.f32 %v6502_v21, %v6502_v21 }
0x3089   : > { %v6504_v17 = vsel %vm382_vm2, %v6503_v12, 0.0 }
0x308a   : > { %6505 = vadd.xlane.f32.xlu0 %v6504_v17 }
0x3117   : > { %v6506_v38 = vpop.xlane.xlu0 %6505 }
0x3118   : > { %v6507_v29 = vmul.f32 0.03125, %v6506_v38 }
0x311a   : > { %v6508_v39 = vadd.f32 1e-05, %v6507_v29 }
0x311c   : > { %8146 = vrsqrt.f32 %v6508_v39 }
0x3126   : > { %v8147_v41 = vpop.eup %8146 }
0x3127   : > { %v6510_v42 = vmul.f32 %v8147_v41, %v6502_v21 }
0x3129   : > { %v6515_v48 = vmul.f32 %v6514_v40, %v6510_v42 }
0x312b   : > { %v6520_v49 = vadd.f32 %v6519_v46, %v6515_v48 }
0x312d   : > { %7774 = vmatmul.mubr.msk.f32.vlgmr.msra.gmra.mrb[72].mxu0 %vm382_vm2, %v6520_v49 }
0x312e   : > { %7797 = vmatprep.mubr.msk.f32.mxu0 %vm8222_vm0, %v8221_v0 }
0x3200   : > { %v6598_v51 = vpop.f32.mrb[72].mxu0 }
0x3201   : > { %v6599_v52 = vadd.f32 %v6598_v51, %v6528_v50  ;;  %v7775_v53 = vpop.f32.mrb[73].mxu0 }
0x3203   : > { %v6602_v0 = vmax.f32 %v6599_v52, 0.0 }
0x3205   : > { %7793 = vmatmul.mubr.msk.f32.vlgmr.msra.gmra.mrb[70].mxu1 %vm1358_vm11, %v6602_v0 }
0x32d8   : > { %v6684_v55 = vpop.f32.mrb[70].mxu1 }
0x32d9   : > { %v6685_v13 = vadd.f32 %v6684_v55, %v6614_v54  ;;  %v7794_v26 = vpop.f32.mrb[71].mxu1 }
0x32db   : > { %v6688_v19 = vadd.f32 %v6685_v13, %v6520_v49 }
0x32dd   : > { %v6689_v14 = vsel %vm382_vm2, %v6688_v19, 0.0 }
0x32de   : > { %6690 = vadd.xlane.f32.xlu0 %v6689_v14 }
0x336b   : > { %v6691_v57 = vpop.xlane.xlu0 %6690 }
0x336c   : > { %v6692_v33 = vmul.f32 0.03125, %v6691_v57 }
0x336e   : > { %v6693_v31 = vsub.f32 %v6688_v19, %v6692_v33 }
0x3370   : > { %v6694_v59 = vmul.f32 %v6693_v31, %v6693_v31 }
0x3372   : > { %v6695_v61 = vsel %vm382_vm2, %v6694_v59, 0.0 }
0x3373   : > { %6696 = vadd.xlane.f32.xlu0 %v6695_v61 }
0x3400   : > { %v6697_v62 = vpop.xlane.xlu0 %6696 }
0x3401   : > { %v6698_v63 = vmul.f32 0.03125, %v6697_v62 }
0x3403   : > { %v6699_v1 = vadd.f32 1e-05, %v6698_v63 }
0x3405   : > { %8148 = vrsqrt.f32 %v6699_v1 }
0x340f   : > { %v8149_v3 = vpop.eup %8148 }
0x3410   : > { %v6701_v4 = vmul.f32 %v8149_v3, %v6693_v31 }
0x3412   : > { %v6706_v7 = vmul.f32 %v6705_v2, %v6701_v4 }
0x3414   : > { %v6711_v58 = vadd.f32 %v6710_v6, %v6706_v7 }
0x3416   : > { %v6712_v9 = vsel %vm382_vm2, %v6711_v58, 0.0 }
0x3417   : > { %6713 = vadd.xlane.f32.xlu1 %v6712_v9 }
0x3428   : > { %6738 = vperm.xlu1 %8038, %v8156_v23  }
0x34a4   : > { %v6714_v11 = vpop.xlane.xlu1 %6713 }
0x34a5   : > { %v6715_v45 = vmul.f32 0.03125, %v6714_v11 }
0x34a7   : > { %v6716_v21 = vsub.f32 %v6711_v58, %v6715_v45 }
0x34a8   : > { %v6739_v37 = vpop.permute.xlu1 %6738 }
0x34a9   : > { %v6717_v12 = vmul.f32 %v6716_v21, %v6716_v21  ;;  %v6740_v34 = vrot.slane %v6739_v37, 2 }
0x34ab   : > { %v6718_v17 = vsel %vm382_vm2, %v6717_v12, 0.0 }
0x34ac   : > { %6719 = vadd.xlane.f32.xlu0 %v6718_v17 }
0x3539   : > { %v6720_v60 = vpop.xlane.xlu0 %6719 }
0x353a   : > { %v6721_v43 = vmul.f32 0.03125, %v6720_v60 }
0x353c   : > { %v6722_v36 = vadd.f32 1e-05, %v6721_v43 }
0x353e   : > { %8150 = vrsqrt.f32 %v6722_v36 }
0x3548   : > { %v8151_v24 = vpop.eup %8150 }
0x3549   : > { %v6724_v44 = vmul.f32 %v8151_v24, %v6716_v21 }
0x354b   : > { %v6729_v20 = vmul.f32 %v6728_v28, %v6724_v44 }
0x354d   : > { %v6734_v32 = vadd.f32 %v6733_v56, %v6729_v20 }
0x354f   : > { %7796 = vmatpush3.xpose.msk.msra.mxu0 %vm382_vm2, %v6734_v32 }
0x3552   : > { %7798 = vmatmul.mubr.msk.f32.vlgmr.msra.gmra.mrb[74].mxu0 %vm382_vm2, %v6735_v27 }
0x3625   : > { %v6814_v15 = vpop.f32.mrb[74].mxu0 }
0x3626   : > { %v6815_v8 = vadd.f32 %v6814_v15, %v6740_v34  ;;  %v7799_v30 = vpop.f32.mrb[75].mxu0 }
0x3628   : > { %6819 = vst.msk [vmem:[%s201_s11] sm:$0xf] %vm6818_vm14, %v6815_v8 }
0x3629   : > { %8170 = shalt.err (!%p8167_p3)
}
0x362a   : > { %s8171_s5 = scalar_lea.hbm %s9494_s6, 64  ;;  %s8175_s13 = scalar_lea.hbm %s9540_s4, 128 }
0x362b   : > { %p8172_p4 = scmp.ne.s32.totalorder %s9494_s6, %s8171_s5  ;;  %p8176_p9 = scmp.lt.u32.totalorder %s9494_s6, %s9540_s4 }
0x362c   : > { %p8177_p10 = scmp.lt.u32.totalorder %s8175_s13, %s8171_s5  ;;  %p8179_p12 = scmp.lt.u32.totalorder %s8171_s5, %s9494_s6 }
0x362d   : > { %p8173_p7 = pnand %p8172_p4, %p8305_p5 }
0x362e   : > { %p8178_p11 = por %p8177_p10, %p8176_p9 }
0x362f   : > { %p8174_p8 = pneg %p8173_p7 }
0x3630   : > { %p8180_p13 = por %p8179_p12, %p8178_p11 }
0x3632   : > { %p8181_p0 = pnand %p8180_p13, %p8174_p8 }
0x3634   : > { %8184 = shalt.err (!%p8181_p0)
}
0x3635   : > { %7959 = dma.vmem_to_hbm [thread:$0]  (%p8305_p5), %s9496_s22, 64, %s9494_s6, %s6821_s7  }
0x3636 PF: > { %p7965_p1 = scmp.ge.s32.totalorder %s8219_s18, 2  ;;  %s6846_s26 = sand.u32 1, %s8207_s15  }
0x3637   : > { %s6847_s30 = scalar_lea.sflag [#allocation3], %s6846_s26 }
0x3638   : > { %p7962_p2 = pnand %p7965_p1, %p8309_p6 }
0x363a   : > { %8202 = dma.done.wait (!%p7962_p2), %s6847_s30, 64  }
0x363b   : > { %8204 = vsyncadd (!%p7962_p2), %s6847_s30, 4294967232  ;;  %s9598_s18 = sld [smem:[#allocation6_spill]]  ;;  %s9599_s0 = sld [smem:[#allocation5_spill]] }
0x363c   : > { %s9600_s17 = sld [smem:[#allocation7_spill]]  ;;  %s9601_s15 = smov %s8211_s16 }
0x3641   : > { %p14_p3 = scmp.ge.s32.totalorder %s9598_s18, 4   ;;  %s9602_s16 = smov %s9599_s0 }
0x3643   :  { %16 = sbr.rel (!%p14_p3) target bundleno = 6 (0x6), region = 74 }
0x364a   :  { %6852 = vsyncpa [#allocation3], 1 }
0x364b   :  { %6854 = vsyncpa [#allocation3 + $0x1], 1 }

</bundles_post_ra>
